<compile_context>
chip_gen: v7x
topology: tpu7x:2x2x1
jax: 0.10.0
libtpu: 0.0.40
codegen_flags: <defaults>
</compile_context>

<pallas_src>
import jax
import jax.numpy as jnp
from jax.experimental import pallas as pl
from jax.experimental.pallas import tpu as pltpu


def mlp_kernel(x_ref, w1_ref, b1_ref, w2_ref, b2_ref, o_ref, acc_ref):
    # x_ref : (tm, d_model)      w1_ref: (d_model, tf)   b1_ref: (1, tf)
    # w2_ref: (tf, d_model)      b2_ref: (1, d_model)
    # o_ref : (tm, d_model)      acc_ref: VMEM (tm, d_model) f32 accumulator
    f = pl.program_id(1)

    @pl.when(f == 0)
    def _():
        acc_ref[...] = jnp.zeros_like(acc_ref)

    # First matmul tile: (tm, d_model) @ (d_model, tf) -> (tm, tf), f32 accumulate.
    h = jnp.dot(x_ref[...], w1_ref[...], preferred_element_type=jnp.float32)
    h = jnp.maximum(h + b1_ref[...].astype(jnp.float32), 0.0)  # bias + ReLU in f32

    # Second matmul tile: (tm, tf) @ (tf, d_model), accumulated over the d_ffn axis.
    acc_ref[...] += jnp.dot(h.astype(x_ref.dtype), w2_ref[...],
                            preferred_element_type=jnp.float32)

    @pl.when(f == pl.num_programs(1) - 1)
    def _():
        o_ref[...] = (acc_ref[...] + b2_ref[...].astype(jnp.float32)).astype(o_ref.dtype)


def _pick_ffn_tile(d_ffn, desired):
    """Largest lane-aligned tile <= desired that divides d_ffn (or the full d_ffn)."""
    for cand in (desired, 1024, 512, 256, 128):
        if cand <= d_ffn and d_ffn % cand == 0 and cand % 128 == 0:
            return cand
    return d_ffn  # full-extent block is always legal


def mlp_forward(x, w1, b1, w2, b2, *, tm=256, tf=512):
    """x: [batch, length, d_model] -> [batch, length, d_model]."""
    batch, length, d_model = x.shape
    d_ffn = w1.shape[1]
    M = batch * length
    dtype = x.dtype
    itemsize = jnp.dtype(dtype).itemsize

    # Row tile: multiple of 8 sublanes, no larger than the (padded) problem.
    tm = max(8, (min(tm, max(8, M)) // 8) * 8)
    M_pad = pl.cdiv(M, tm) * tm

    # d_ffn reduction tile: lane-aligned divisor of d_ffn.
    tf = _pick_ffn_tile(d_ffn, tf)
    n_f = d_ffn // tf

    x2d = x.reshape(M, d_model)
    if M_pad != M:
        x2d = jnp.pad(x2d, ((0, M_pad - M), (0, 0)))
    b1_2d = b1.reshape(1, d_ffn)
    b2_2d = b2.reshape(1, d_model)

    # --- VMEM budget: double-buffered input/output tiles + f32 accumulator. ---
    tile_bytes = (
        2 * tm * d_model * itemsize          # x tiles (double-buffered)
        + 2 * d_model * tf * itemsize        # W1 tiles
        + 2 * tf * itemsize                  # b1 tiles
        + 2 * tf * d_model * itemsize        # W2 tiles
        + 2 * d_model * itemsize             # b2 tiles
        + 2 * tm * d_model * itemsize        # output tiles
        + tm * d_model * 4                   # f32 accumulator scratch
    )
    # ~30% headroom, floored at the smallest per-gen scoped default (16 MiB, v5e) and
    # capped below v7x's 64 MiB physical VMEM.
    vmem_limit = min(max(int(tile_bytes * 1.3) + (1 << 20), 16 << 20), 56 << 20)

    cost = pl.CostEstimate(
        flops=4 * M * d_model * d_ffn,
        transcendentals=0,
        bytes_accessed=itemsize * (M * d_model * 2            # x + out
                                   + d_model * d_ffn * 2      # W1 + W2
                                   + d_ffn + d_model),        # biases
    )

    out2d = pl.pallas_call(
        mlp_kernel,
        out_shape=jax.ShapeDtypeStruct((M_pad, d_model), dtype),
        grid_spec=pltpu.PrefetchScalarGridSpec(
            num_scalar_prefetch=0,
            grid=(M_pad // tm, n_f),                       # reduction axis last
            in_specs=[
                pl.BlockSpec((tm, d_model), lambda i, f: (i, 0)),     # x rows
                pl.BlockSpec((d_model, tf), lambda i, f: (0, f)),     # W1 tile
                pl.BlockSpec((1, tf),       lambda i, f: (0, f)),     # b1 tile
                pl.BlockSpec((tf, d_model), lambda i, f: (f, 0)),     # W2 tile
                pl.BlockSpec((1, d_model),  lambda i, f: (0, 0)),     # b2
            ],
            out_specs=pl.BlockSpec((tm, d_model), lambda i, f: (i, 0)),
            scratch_shapes=[pltpu.VMEM((tm, d_model), jnp.float32)],
        ),
        compiler_params=pltpu.CompilerParams(
            dimension_semantics=("parallel", "arbitrary"),
            vmem_limit_bytes=vmem_limit,
        ),
        cost_estimate=cost,
    )(x2d, w1, b1_2d, w2, b2_2d)

    return out2d[:M].reshape(batch, length, d_model)


def init_params(key, d_model, d_ffn, dtype=jnp.float32):
    """Deterministic init mimicking torch.nn.Linear default (U(-1/sqrt(fan_in), ...))."""
    k1, k2, k3, k4 = jax.random.split(key, 4)
    bound1 = 1.0 / (d_model ** 0.5)
    bound2 = 1.0 / (d_ffn ** 0.5)
    # Stored as [in, out] (transposed vs torch's [out, in]) so the kernel does x @ W.
    w1 = jax.random.uniform(k1, (d_model, d_ffn), dtype, -bound1, bound1)
    b1 = jax.random.uniform(k2, (d_ffn,), dtype, -bound1, bound1)
    w2 = jax.random.uniform(k3, (d_ffn, d_model), dtype, -bound2, bound2)
    b2 = jax.random.uniform(k4, (d_model,), dtype, -bound2, bound2)
    return w1, b1, w2, b2


def _reference(x, w1, b1, w2, b2):
    h = jnp.maximum(jnp.einsum('bld,df->blf', x, w1) + b1, 0.0)
    return jnp.einsum('blf,fd->bld', h, w2) + b2


if __name__ == "__main__":
    key = jax.random.PRNGKey(0)

    # --- Test 1: reference config (d_model=768, d_ffn=3072), small batch/seq, f32. ---
    batch, length, d_model, d_ffn = 2, 8, 768, 3072
    kx, kp, key = jax.random.split(key, 3)
    x = jax.random.normal(kx, (batch, length, d_model), jnp.float32)
    w1, b1, w2, b2 = init_params(kp, d_model, d_ffn)

    out = jax.block_until_ready(mlp_forward(x, w1, b1, w2, b2))
    ref = _reference(x, w1, b1, w2, b2)
    assert out.shape == (batch, length, d_model)
    assert jnp.allclose(out, ref, atol=2e-3, rtol=2e-3)

    # --- Test 2: multi-step d_ffn reduction + row padding path, f32. -----------------
    batch, length, d_model, d_ffn = 2, 24, 128, 1024   # M=48 (not a multiple of tm)
    kx, kp, key = jax.random.split(key, 3)
    x = jax.random.normal(kx, (batch, length, d_model), jnp.float32)
    w1, b1, w2, b2 = init_params(kp, d_model, d_ffn)

    out = jax.block_until_ready(mlp_forward(x, w1, b1, w2, b2, tf=512))
    ref = _reference(x, w1, b1, w2, b2)
    assert out.shape == (batch, length, d_model)
    assert jnp.allclose(out, ref, atol=1e-4, rtol=1e-4)

    # --- Test 3: bf16 activations/weights (MXU fast path), loose tolerance. ----------
    xb = x.astype(jnp.bfloat16)
    pb = tuple(p.astype(jnp.bfloat16) for p in (w1, b1, w2, b2))
    out_bf16 = jax.block_until_ready(mlp_forward(xb, *pb, tf=512))
    ref_bf16 = _reference(x, w1, b1, w2, b2)  # f32 reference; bf16 has ~3 decimal digits
    assert out_bf16.shape == (batch, length, d_model)
    assert jnp.allclose(out_bf16.astype(jnp.float32), ref_bf16, atol=5e-1, rtol=5e-2)

    print("KERNEL_OK")
</pallas_src>

<mosaic_0001>
module attributes {stable_mosaic.version = 11 : i64} {
  func.func @mlp_kernel(%arg0: i32, %arg1: i32, %arg2: memref<16x768xf32, #tpu.memory_space<vmem>>, %arg3: memref<768x512xf32, #tpu.memory_space<vmem>>, %arg4: memref<1x512xf32, #tpu.memory_space<vmem>>, %arg5: memref<512x768xf32, #tpu.memory_space<vmem>>, %arg6: memref<1x768xf32, #tpu.memory_space<vmem>>, %arg7: memref<16x768xf32, #tpu.memory_space<vmem>>, %arg8: memref<16x768xf32, #tpu.memory_space<vmem>>) attributes {dimension_semantics = [#tpu.dimension_semantics<parallel>, #tpu.dimension_semantics<arbitrary>], iteration_bounds = array<i64: 1, 6>, scalar_prefetch = 0 : i64, scratch_operands = 1 : i64, tpu.core_type = #tpu.core_type<tc>, window_params = [{transform_indices = @transform_0, window_bounds = array<i64: 16, 768>}, {transform_indices = @transform_1, window_bounds = array<i64: 768, 512>}, {transform_indices = @transform_2, window_bounds = array<i64: 1, 512>}, {transform_indices = @transform_3, window_bounds = array<i64: 512, 768>}, {pipeline_mode = #tpu.pipeline_mode<synchronous>, transform_indices = @transform_4, window_bounds = array<i64: 1, 768>}, {transform_indices = @transform_5, window_bounds = array<i64: 16, 768>}]} {
    %c0_i32 = arith.constant 0 : i32
    %0 = arith.cmpi eq, %arg1, %c0_i32 : i32
    %1 = arith.extui %0 : i1 to i32
    %c0_i32_0 = arith.constant 0 : i32
    %2 = arith.cmpi ne, %1, %c0_i32_0 : i32
    scf.if %2 {
      %cst_15 = arith.constant 0.000000e+00 : f32
      %19 = vector.broadcast %cst_15 : f32 to vector<16x768xf32>
      %c0_16 = arith.constant 0 : index
      %c0_17 = arith.constant 0 : index
      %20 = vector.load %arg8[%c0_16, %c0_17] : memref<16x768xf32, #tpu.memory_space<vmem>>, vector<16x768xf32>
      tpu.vector_store %arg8[%c0_16, %c0_17], %19 {strides = array<i32>} : memref<16x768xf32, #tpu.memory_space<vmem>>, vector<16x768xf32>,
    } else {
    }
    %c0 = arith.constant 0 : index
    %c0_1 = arith.constant 0 : index
    %3 = vector.load %arg2[%c0, %c0_1] : memref<16x768xf32, #tpu.memory_space<vmem>>, vector<16x768xf32>
    %c0_2 = arith.constant 0 : index
    %c0_3 = arith.constant 0 : index
    %4 = vector.load %arg3[%c0_2, %c0_3] : memref<768x512xf32, #tpu.memory_space<vmem>>, vector<768x512xf32>
    %cst = arith.constant dense<0.000000e+00> : vector<16x512xf32>
    %5 = tpu.matmul %3, %4, %cst {dimension_numbers = #tpu.dot_dimension_numbers<[1], [0], [0], [1], [0, 0, 1, 1], [], []>} : vector<16x768xf32>, vector<768x512xf32>, vector<16x512xf32> -> vector<16x512xf32>
    %c0_4 = arith.constant 0 : index
    %c0_5 = arith.constant 0 : index
    %6 = vector.load %arg4[%c0_4, %c0_5] : memref<1x512xf32, #tpu.memory_space<vmem>>, vector<1x512xf32>
    %7 = vector.broadcast %6 : vector<1x512xf32> to vector<16x512xf32>
    %8 = arith.addf %5, %7 : vector<16x512xf32>
    %cst_6 = arith.constant 0.000000e+00 : f32
    %9 = vector.broadcast %cst_6 : f32 to vector<16x512xf32>
    %10 = arith.maximumf %8, %9 : vector<16x512xf32>
    %c0_7 = arith.constant 0 : index
    %c0_8 = arith.constant 0 : index
    %11 = vector.load %arg8[%c0_7, %c0_8] : memref<16x768xf32, #tpu.memory_space<vmem>>, vector<16x768xf32>
    %c0_9 = arith.constant 0 : index
    %c0_10 = arith.constant 0 : index
    %12 = vector.load %arg5[%c0_9, %c0_10] : memref<512x768xf32, #tpu.memory_space<vmem>>, vector<512x768xf32>
    %cst_11 = arith.constant dense<0.000000e+00> : vector<16x768xf32>
    %13 = tpu.matmul %10, %12, %cst_11 {dimension_numbers = #tpu.dot_dimension_numbers<[1], [0], [0], [1], [0, 0, 1, 1], [], []>} : vector<16x512xf32>, vector<512x768xf32>, vector<16x768xf32> -> vector<16x768xf32>
    %14 = arith.addf %11, %13 : vector<16x768xf32>
    %c0_12 = arith.constant 0 : index
    %c0_13 = arith.constant 0 : index
    %15 = vector.load %arg8[%c0_12, %c0_13] : memref<16x768xf32, #tpu.memory_space<vmem>>, vector<16x768xf32>
    tpu.vector_store %arg8[%c0_12, %c0_13], %14 {strides = array<i32>} : memref<16x768xf32, #tpu.memory_space<vmem>>, vector<16x768xf32>,
    %c5_i32 = arith.constant 5 : i32
    %16 = arith.cmpi eq, %arg1, %c5_i32 : i32
    %17 = arith.extui %16 : i1 to i32
    %c0_i32_14 = arith.constant 0 : i32
    %18 = arith.cmpi ne, %17, %c0_i32_14 : i32
    scf.if %18 {
      %c0_15 = arith.constant 0 : index
      %c0_16 = arith.constant 0 : index
      %19 = vector.load %arg8[%c0_15, %c0_16] : memref<16x768xf32, #tpu.memory_space<vmem>>, vector<16x768xf32>
      %c0_17 = arith.constant 0 : index
      %c0_18 = arith.constant 0 : index
      %20 = vector.load %arg6[%c0_17, %c0_18] : memref<1x768xf32, #tpu.memory_space<vmem>>, vector<1x768xf32>
      %21 = vector.broadcast %20 : vector<1x768xf32> to vector<16x768xf32>
      %22 = arith.addf %19, %21 : vector<16x768xf32>
      %c0_19 = arith.constant 0 : index
      %c0_20 = arith.constant 0 : index
      %23 = vector.load %arg7[%c0_19, %c0_20] : memref<16x768xf32, #tpu.memory_space<vmem>>, vector<16x768xf32>
      tpu.vector_store %arg7[%c0_19, %c0_20], %22 {strides = array<i32>} : memref<16x768xf32, #tpu.memory_space<vmem>>, vector<16x768xf32>,
    } else {
    }
    return
  }
  func.func @transform_0(%arg0: i32, %arg1: i32) -> (i32, i32) {
    %c0_i32 = arith.constant 0 : i32
    %c0_i32_0 = arith.constant 0 : i32
    return %arg0, %c0_i32 : i32, i32
  }
  func.func @transform_1(%arg0: i32, %arg1: i32) -> (i32, i32) {
    %c0_i32 = arith.constant 0 : i32
    %c0_i32_0 = arith.constant 0 : i32
    return %c0_i32, %arg1 : i32, i32
  }
  func.func @transform_2(%arg0: i32, %arg1: i32) -> (i32, i32) {
    %c0_i32 = arith.constant 0 : i32
    %c0_i32_0 = arith.constant 0 : i32
    return %c0_i32, %arg1 : i32, i32
  }
  func.func @transform_3(%arg0: i32, %arg1: i32) -> (i32, i32) {
    %c0_i32 = arith.constant 0 : i32
    %c0_i32_0 = arith.constant 0 : i32
    return %arg1, %c0_i32 : i32, i32
  }
  func.func @transform_4(%arg0: i32, %arg1: i32) -> (i32, i32) {
    %c0_i32 = arith.constant 0 : i32
    %c0_i32_0 = arith.constant 0 : i32
    %c0_i32_1 = arith.constant 0 : i32
    return %c0_i32, %c0_i32_0 : i32, i32
  }
  func.func @transform_5(%arg0: i32, %arg1: i32) -> (i32, i32) {
    %c0_i32 = arith.constant 0 : i32
    %c0_i32_0 = arith.constant 0 : i32
    return %arg0, %c0_i32 : i32, i32
  }
}

</mosaic_0001>

<bundles_post_ra>
// kernel: tpu_custom_call.1
= control target key start
LH: loop header
LB: loop body
LE: loop exit
PB: predicated region body
PF: predicated region fallthrough
CT: control target
= control target key end

     0   :  { %s4773_s0 = inlined_call_operand.hbm [shape: f32[16,768], index: 0, kind: input, shape index: {}]   ;;  %s4774_s1 = inlined_call_operand.hbm [shape: f32[768,3072], index: 1, kind: input, shape index: {}]   ;;  %s4775_s2 = inlined_call_operand.hbm [shape: f32[1,3072], index: 2, kind: input, shape index: {}]   ;;  %s4776_s3 = inlined_call_operand.hbm [shape: f32[3072,768], index: 3, kind: input, shape index: {}]   ;;  %s4777_s4 = inlined_call_operand.hbm [shape: f32[1,768], index: 4, kind: input, shape index: {}]   ;;  %s4778_s5 = inlined_call_operand.hbm [shape: f32[16,768], index: 5, kind: output, shape index: {}]  }
   0x1   :  { %4793 = sst [smem:[#allocation21_spill]] %s4774_s1 }
   0x2   :  { %4794 = sst [smem:[#allocation22_spill]] %s4777_s4 }
   0x3   :  { %4795 = sst [smem:[#allocation23_spill]] %s4778_s5 }
   0x4   :  { %10 = vsyncpa [#allocation4], 0 }
   0x5   :  { %11 = vsyncpa [#allocation7], 0 }
   0x6   :  { %13 = vsyncpa [#allocation7 + $0x1], 0 }
   0x7   :  { %14 = vsyncpa [#allocation10], 0 }
   0x8   :  { %16 = vsyncpa [#allocation10 + $0x1], 0 }
   0x9   :  { %17 = vsyncpa [#allocation5], 0  ;;  %s3581_s18 = smov 0   ;;  %s3583_s19 = smov 0  }
   0xa   :  { %s3585_s20 = smov 0   ;;  %s3587_s21 = smov 0  }
   0xb   :  { %s3589_s22 = smov 0   ;;  %s3591_s23 = smov 0  }
   0xc LB: > { %4796 = sst [smem:[#allocation18_spill]] %s3527_s21  ;;  %s3610_s24 = sadd.s32 4294967295, %s3535_s23   ;;  %s3535_s23 = sphi %s3591_s23, %s23_s23   ;;  %s3531_s22 = sphi %s3589_s22, %s4829_s22   ;;  %s3527_s21 = sphi %s3587_s21, %s4828_s21   ;;  %s3523_s20 = sphi %s3585_s20, %s4827_s20   ;;  %s3519_s19 = sphi %s3583_s19, %s4826_s19   ;;  %s3515_s18 = sphi %s3581_s18, %s4825_s18  }
   0xd   : > { %s68_s25 = sadd.s32 1, %s3523_s20  ;;  %p75_p0 = scmp.ne.s32.totalorder %s3523_s20, %s3519_s19 }
   0xe   : > { %p76_p1 = scmp.eq.s32.totalorder %s3535_s23, 0  ;;  %p81_p2 = scmp.ne.s32.totalorder %s3519_s19, %s3515_s18 }
   0xf   : > { %p4779_p3 = scmp.eq.s32.totalorder %s3610_s24, 0  ;;  %p2364_p5 = scmp.ge.s32.totalorder %s3535_s23, 1 }
  0x10   : > { %p77_p4 = por %p76_p1, %p75_p0  ;;  %p191_p7 = scmp.lt.s32.totalorder %s3535_s23, 7 }
  0x11   : > { %p3621_p6 = por %p4779_p3, %p81_p2  ;;  %s3537_s28 = smov [#allocation11]  }
  0x12   : > { %p3626_p8 = pnand %p2364_p5, %p191_p7  ;;  %s221_s29 = sshll.u32 %s3537_s28, 4  ;;  %s222_s29 = int_to_ptr.vmem [resolvable:$true] %s221_s29 }
  0x13   : > { %s4797_s26 = scalar_select %p3621_p6, 1, 0 }
  0x14   : > { %s4798_s27 = scalar_select %p3626_p8, 1, 0 }
  0x15   : > { %p3214_p9 = pneg %p3626_p8  ;;  %p3233_p10 = scmp.lt.s32.totalorder %s3535_s23, 6 }
  0x16   : > { %s4783_s30 = sand.u32 1, %s3535_s23   ;;  %s4801_s4 = sld [smem:[#allocation22_spill]] }
  0x17   : > { %p3636_p11 = pnand %p3214_p9, %p4779_p3  ;;  %p3640_p12 = pnand %p3233_p10, %p77_p4 }
  0x19   : > { %s4799_s6 = scalar_select %p3636_p11, 1, 0 }
  0x1a   : > { %s4800_s7 = scalar_select %p3640_p12, 1, 0 }
  0x1b   : > { %p4784_p0 = pneg %p3636_p11 }
  0x1c   : > { %s3297_s10 = scalar_lea.hbm %s4801_s4, 96 }
  0x1d   : > { %p3298_p13 = scmp.ne.s32.totalorder %s4801_s4, %s3297_s10  ;;  %p3304_p4 = scmp.lt.u32.totalorder %s3297_s10, %s4801_s4 }
  0x1f   : > { %p3300_p1 = pnand %p4784_p0, %p3298_p13 }
  0x21   : > { %p3301_p2 = pneg %p3300_p1 }
  0x23   : > { %p3306_p5 = pnand %p3304_p4, %p3301_p2 }
  0x25   : > { %3309 = shalt.err (!%p3306_p5)
}
  0x26   : > { %s3310_s15 = scalar_lea.vmem %s222_s29, 96  ;;  %p3318_p3 = scmp.lt.s32.totalorder %s222_s29, %s222_s29 }
  0x27   : > { %p3311_p7 = scmp.ne.s32.totalorder %s222_s29, %s3310_s15  ;;  %p3319_p6 = scmp.lt.s32.totalorder %s3310_s15, %s3310_s15 }
  0x29   : > { %p3313_p9 = pnand %p3311_p7, %p4784_p0  ;;  %p3320_p8 = por %p3319_p6, %p3318_p3 }
  0x2b   : > { %p3314_p10 = pneg %p3313_p9 }
  0x2d   : > { %p3321_p12 = pnand %p3320_p8, %p3314_p10 }
  0x2f   : > { %3324 = shalt.err (!%p3321_p12)
}
  0x30   : > { %3220 = dma.hbm_to_vmem [thread:$0]  (!%p3636_p11), %s4801_s4, 96, %s222_s29, [#allocation10]  }
  0x31   : > { %s32_s18 = sadd.s32 1, %s3531_s22  ;;  %s4787_s28 = sand.u32 1, %s3523_s20  }
  0x32   : > { %p33_p3 = scmp.ge.s32.totalorder %s32_s18, 6  ;;  %s3670_s8 = smul.u32 3072, %s4787_s28 }
  0x33   : > { %s2386_s9 = sshll.u32 %s3531_s22, 9  ;;  %s4803_s1 = sld [smem:[#allocation21_spill]] }
  0x34   : > { %s4831_s18 = smov (%p33_p3, %s32_s18), 0  ;;  %s236_s13 = scalar_lea.vmem [#allocation6], %s3670_s8 }
  0x35   : > { %4802 = sst [smem:[#allocation19_spill]] %s4831_s18  ;;  %s65_s29 = ssub.s32 %s3531_s22, %s4831_s18 }
  0x36   : > { %s243_s14 = sshll.u32 %s236_s13, 4  ;;  %p66_p6 = scmp.eq.s32.totalorder %s65_s29, 0  ;;  %s3683_s14 = int_to_ptr.vmem [resolvable:$true] %s243_s14 }
  0x37   : > { %s3692_s16 = scalar_lea.sflag [#allocation7], %s4783_s30  ;;  %p4805_p12 = scmp.ne.s32.totalorder %s4800_s7, 0 }
  0x38   : > { %s3688_s15 = scalar_select %p66_p6, %s3523_s20, %s68_s25  }
  0x39   : > { %s3678_s12 = scalar_lea.hbm %s4803_s1, %s2386_s9  ;;  %p3698_p13 = pneg %p4805_p12 }
  0x3a   : > { %4804 = sst [smem:[#allocation20_spill]] %s3688_s15  ;;  %s3325_s17 = scalar_lea.hbm %s3678_s12, 49152 }
  0x3b   : > { %p3326_p8 = scmp.ne.s32.totalorder %s3678_s12, %s3325_s17  ;;  %s3330_s29 = scalar_lea.hbm %s4803_s1, 294912 }
  0x3c   : > { %s4806_s9 = scalar_select %p3698_p13, 1, 0 }
  0x3d   : > { %p3328_p1 = pnand %p3698_p13, %p3326_p8  ;;  %p3331_p4 = scmp.lt.u32.totalorder %s3678_s12, %s4803_s1 }
  0x3e   : > { %p3332_p5 = scmp.lt.u32.totalorder %s3330_s29, %s3325_s17  ;;  %p3334_p9 = scmp.lt.u32.totalorder %s3325_s17, %s3678_s12 }
  0x3f   : > { %p3329_p2 = pneg %p3328_p1 }
  0x40   : > { %p3333_p7 = por %p3332_p5, %p3331_p4 }
  0x42   : > { %p3335_p10 = por %p3334_p9, %p3333_p7 }
  0x44   : > { %p3336_p3 = pnand %p3335_p10, %p3329_p2 }
  0x46   : > { %3339 = shalt.err (!%p3336_p3)
}
  0x47   : > { %s3340_s30 = scalar_lea.vmem %s3683_s14, 49152  ;;  %s3538_s10 = smov [#allocation6]  }
  0x48   : > { %p3341_p6 = scmp.ne.s32.totalorder %s3683_s14, %s3340_s30  ;;  %s3345_s11 = sshll.u32 %s3538_s10, 4  ;;  %s3346_s11 = int_to_ptr.vmem [resolvable:$false] %s3345_s11 }
  0x49   : > { %s3347_s25 = scalar_lea.vmem %s3346_s11, 98304  ;;  %p3348_p0 = scmp.lt.s32.totalorder %s3683_s14, %s3346_s11 }
  0x4a   : > { %p3343_p8 = pnand %p3341_p6, %p3698_p13  ;;  %p3349_p11 = scmp.lt.s32.totalorder %s3347_s25, %s3340_s30 }
  0x4c   : > { %p3344_p1 = pneg %p3343_p8  ;;  %p3350_p4 = por %p3349_p11, %p3348_p0 }
  0x4e   : > { %p3351_p5 = pnand %p3350_p4, %p3344_p1 }
  0x50   : > { %3354 = shalt.err (!%p3351_p5)
}
  0x51   : > { %s3539_s17 = smov 3072   ;;  %s3540_s29 = smov 512  }
  0x52   : > { %s3541_s13 = smov 32   ;;  %s3542_s28 = smov [#allocation3]  }
  0x53   : > { %3224 = dma.hbm_to_vmem [thread:$0]  (!%p4805_p12), %s3678_s12, 49152, %s3683_s14, %s3692_s16, %s3539_s17, %s3540_s29, %s3541_s13  }
  0x54   : > { %s207_s10 = sshll.u32 %s3542_s28, 4  ;;  %s4807_s1 = sand.u32 1, %s3523_s20   ;;  %s208_s10 = int_to_ptr.vmem [resolvable:$true] %s207_s10 }
  0x55   : > { %s2370_s11 = sshll.u32 %s4807_s1, 2  ;;  %s3355_s4 = scalar_lea.hbm %s4773_s0, 1536 }
  0x56   : > { %p3356_p11 = scmp.ne.s32.totalorder %s4773_s0, %s3355_s4  ;;  %p4808_p0 = scmp.ne.s32.totalorder %s4799_s6, 0 }
  0x57   : > { %p3362_p10 = scmp.lt.u32.totalorder %s3355_s4, %s4773_s0 }
  0x58   : > { %p4809_p2 = pneg %p4808_p0 }
  0x5a   : > { %p3358_p7 = pnand %p3356_p11, %p4809_p2 }
  0x5c   : > { %p3359_p9 = pneg %p3358_p7 }
  0x5e   : > { %p3364_p3 = pnand %p3362_p10, %p3359_p9 }
  0x60   : > { %3367 = shalt.err (!%p3364_p3)
}
  0x61   : > { %s3368_s28 = scalar_lea.vmem %s208_s10, 1536  ;;  %p4810_p8 = pmov %p4809_p2 }
  0x62   : > { %p3369_p6 = scmp.ne.s32.totalorder %s208_s10, %s3368_s28  ;;  %p3376_p5 = scmp.lt.s32.totalorder %s208_s10, %s208_s10 }
  0x63   : > { %p3377_p12 = scmp.lt.s32.totalorder %s3368_s28, %s3368_s28 }
  0x64   : > { %p3371_p1 = pnand %p3369_p6, %p4810_p8 }
  0x65   : > { %p3378_p13 = por %p3377_p12, %p3376_p5 }
  0x66   : > { %p3372_p4 = pneg %p3371_p1 }
  0x68   : > { %p3379_p2 = pnand %p3378_p13, %p3372_p4 }
  0x6a   : > { %3382 = shalt.err (!%p3379_p2)
}
  0x6b   : > { %s3543_s1 = smov 768   ;;  %s3544_s5 = smov 48  }
  0x6c   : > { %3217 = dma.hbm_to_vmem [thread:$0]  (!%p4808_p0), %s4773_s0, 1536, %s208_s10, [#allocation4], %s3543_s1, %s3543_s1, %s3544_s5  }
  0x6d   : > { %s2387_s18 = sshll.u32 %s3531_s22, 6  ;;  %s257_s17 = scalar_lea.vmem [#allocation8], %s2370_s11 }
  0x6e   : > { %s3751_s15 = scalar_lea.hbm %s4775_s2, %s2387_s18  ;;  %s265_s29 = sshll.u32 %s257_s17, 4  ;;  %s266_s29 = int_to_ptr.vmem [resolvable:$true] %s265_s29 }
  0x6f   : > { %s3383_s6 = scalar_lea.hbm %s3751_s15, 64  ;;  %p4811_p13 = scmp.ne.s32.totalorder %s4806_s9, 0 }
  0x70   : > { %p3384_p12 = scmp.ne.s32.totalorder %s3751_s15, %s3383_s6  ;;  %s3388_s30 = scalar_lea.hbm %s4775_s2, 384 }
  0x71   : > { %p3389_p0 = scmp.lt.u32.totalorder %s3751_s15, %s4775_s2  ;;  %p3390_p9 = scmp.lt.u32.totalorder %s3388_s30, %s3383_s6 }
  0x72   : > { %p3386_p11 = pnand %p3384_p12, %p4811_p13  ;;  %p3392_p3 = scmp.lt.u32.totalorder %s3383_s6, %s3751_s15 }
  0x73   : > { %p3391_p10 = por %p3390_p9, %p3389_p0 }
  0x74   : > { %p3387_p7 = pneg %p3386_p11 }
  0x75   : > { %p3393_p6 = por %p3392_p3, %p3391_p10 }
  0x77   : > { %p3394_p8 = pnand %p3393_p6, %p3387_p7 }
  0x79   : > { %3397 = shalt.err (!%p3394_p8)
}
  0x7a   : > { %s3398_s11 = scalar_lea.vmem %s266_s29, 64  ;;  %s3545_s4 = smov [#allocation8]  }
  0x7b   : > { %p3399_p1 = scmp.ne.s32.totalorder %s266_s29, %s3398_s11  ;;  %s3403_s21 = sshll.u32 %s3545_s4, 4  ;;  %s3404_s21 = int_to_ptr.vmem [resolvable:$false] %s3403_s21 }
  0x7c   : > { %s3405_s18 = scalar_lea.vmem %s3404_s21, 128  ;;  %p3406_p2 = scmp.lt.s32.totalorder %s266_s29, %s3404_s21 }
  0x7d   : > { %p3401_p4 = pnand %p3399_p1, %p4811_p13  ;;  %p3407_p12 = scmp.lt.s32.totalorder %s3405_s18, %s3398_s11 }
  0x7f   : > { %p3402_p5 = pneg %p3401_p4  ;;  %p3408_p11 = por %p3407_p12, %p3406_p2 }
  0x81   : > { %p3409_p0 = pnand %p3408_p11, %p3402_p5 }
  0x83   : > { %3412 = shalt.err (!%p3409_p0)
}
  0x84   : > { %p4812_p9 = scmp.ne.s32.totalorder %s4800_s7, 0  ;;  %s3194_s12 = smul.u32 49152, %s3531_s22 }
  0x85   : > { %s276_s14 = scalar_lea.vmem [#allocation9], %s3670_s8  ;;  %s4813_s30 = sand.u32 1, %s3535_s23  }
  0x86   : > { %3227 = dma.hbm_to_vmem [thread:$0]  (!%p4812_p9), %s3751_s15, 64, %s266_s29, %s3692_s16  }
  0x87   : > { %s284_s17 = sshll.u32 %s276_s14, 4  ;;  %s3776_s10 = scalar_lea.hbm %s4776_s3, %s3194_s12  ;;  %s3778_s17 = int_to_ptr.vmem [resolvable:$true] %s284_s17 }
  0x88   : > { %s3782_s25 = scalar_lea.sflag [#allocation10], %s4813_s30  ;;  %s3413_s28 = scalar_lea.hbm %s3776_s10, 49152 }
  0x89   : > { %p3414_p7 = scmp.ne.s32.totalorder %s3776_s10, %s3413_s28  ;;  %s3418_s15 = scalar_lea.hbm %s4776_s3, 294912 }
  0x8a   : > { %p3419_p6 = scmp.lt.u32.totalorder %s3776_s10, %s4776_s3  ;;  %p3420_p8 = scmp.lt.u32.totalorder %s3418_s15, %s3413_s28 }
  0x8b   : > { %p3416_p10 = pnand %p3414_p7, %p4811_p13  ;;  %p3422_p4 = scmp.lt.u32.totalorder %s3413_s28, %s3776_s10 }
  0x8c   : > { %p3421_p1 = por %p3420_p8, %p3419_p6 }
  0x8d   : > { %p3417_p3 = pneg %p3416_p10 }
  0x8e   : > { %p3423_p5 = por %p3422_p4, %p3421_p1 }
  0x90   : > { %p3424_p2 = pnand %p3423_p5, %p3417_p3 }
  0x92   : > { %3427 = shalt.err (!%p3424_p2)
}
  0x93   : > { %s3428_s4 = scalar_lea.vmem %s3778_s17, 49152  ;;  %s3546_s21 = smov [#allocation9]  }
  0x94   : > { %p3429_p12 = scmp.ne.s32.totalorder %s3778_s17, %s3428_s4  ;;  %s3433_s18 = sshll.u32 %s3546_s21, 4  ;;  %s3434_s18 = int_to_ptr.vmem [resolvable:$false] %s3433_s18 }
  0x95   : > { %s3435_s12 = scalar_lea.vmem %s3434_s18, 98304  ;;  %p3436_p7 = scmp.lt.s32.totalorder %s3778_s17, %s3434_s18 }
  0x96   : > { %p3431_p11 = pnand %p3429_p12, %p4811_p13  ;;  %p3437_p10 = scmp.lt.s32.totalorder %s3435_s12, %s3428_s4 }
  0x98   : > { %p3432_p0 = pneg %p3431_p11  ;;  %p3438_p6 = por %p3437_p10, %p3436_p7 }
  0x9a   : > { %p3439_p8 = pnand %p3438_p6, %p3432_p0 }
  0x9c   : > { %3442 = shalt.err (!%p3439_p8)
}
  0x9d   : > { %3230 = dma.hbm_to_vmem [thread:$0]  (!%p4812_p9), %s3776_s10, 49152, %s3778_s17, %s3782_s25, %s3543_s1, %s3543_s1, %s3544_s5  }
  0x9e   : > { %p4814_p13 = scmp.ne.s32.totalorder %s4798_s27, 0 }
  0x9f   : > { %p4815_p3 = scmp.eq.s32.totalorder (!%p4814_p13), %s3610_s24, 0 }
  0xa0   : > { %296 = sbr.rel (%p4814_p13) target bundleno = 1063 (0x427), region = 40 }
  0xa7   : > { %3494 = dma.done.wait (%p4815_p3), [#allocation4], 1536   ;;  %p4816_p1 = pmov %p4815_p3 }
  0xa8   : > { %s302_s7 = sand.u32 1, %s3610_s24   ;;  %s304_s9 = sand.u32 1, %s3519_s19  }
  0xa9   : > { %3496 = vsyncadd (%p4816_p1), [#allocation4], 4294965760  ;;  %s3195_s14 = smul.u32 3072, %s304_s9  ;;  %s303_s6 = scalar_lea.sflag [#allocation7], %s302_s7 }
  0xaa   : > { %p4817_p4 = scmp.ne.s32.totalorder %s4797_s26, 0 }
  0xab   : > { %s3817_s13 = scalar_lea.vmem [#allocation6], %s3195_s14 }
  0xac   : > { %3498 = dma.done.wait (%p4817_p4), %s303_s6, 49216  }
  0xad   : > { %3500 = vsyncadd (%p4817_p4), %s303_s6, 4294918080  ;;  %s3823_s27 = sshll.u32 %s304_s9, 2  ;;  %s321_s5 = scalar_lea.sflag [#allocation10], %s302_s7 }
  0xae   : > { %s315_s1 = scalar_lea.vmem [#allocation8], %s3823_s27  ;;  %s3826_s17 = scalar_lea.vmem [#allocation9], %s3195_s14 }
  0xaf   : > { %3502 = dma.done.wait (%p4817_p4), %s321_s5, 49152  }
  0xb0   : > { %3504 = vsyncadd (%p4817_p4), %s321_s5, 4294918144  ;;  %p4818_p9 = pmov %p4816_p1 }
  0xb1   : > { %p4819_p5 = pmov %p4816_p1 }
  0xb2   : > { %3506 = dma.done.wait (%p4818_p9), [#allocation10], 96  }
  0xb3   : > { %3508 = vsyncadd (%p4819_p5), [#allocation10], 4294967200  ;;  %s4820_s10 = sld [smem:[#allocation18_spill]] }
  0xb9   : > { %p2380_p2 = scmp.ne.s32.totalorder %s4820_s10, 0 }
  0xba   : > { %v3547_v0 = vmov (!%p2380_p2), 0.0  }
  0xbb   : > { %368 = sbr.rel (%p2380_p2) target bundleno = 194 (0xc2), region = 64  ;;  %369 = vst [vmem:[#allocation2] sm:$0xff] (!%p2380_p2), %v3547_v0  ;;  %370 = vst [vmem:[#allocation2 + $0x8] sm:$0xff] (!%p2380_p2), %v3547_v0 }
  0xbc   : > { %371 = vst [vmem:[#allocation2 + $0x10] sm:$0xff] (!%p2380_p2), %v3547_v0  ;;  %372 = vst [vmem:[#allocation2 + $0x18] sm:$0xff] (!%p2380_p2), %v3547_v0 }
  0xbd   : > { %373 = vst [vmem:[#allocation2 + $0x20] sm:$0xff] (!%p2380_p2), %v3547_v0  ;;  %374 = vst [vmem:[#allocation2 + $0x28] sm:$0xff] (!%p2380_p2), %v3547_v0 }
  0xbe   : > { %375 = vst [vmem:[#allocation2 + $0x30] sm:$0xff] (!%p2380_p2), %v3547_v0  ;;  %376 = vst [vmem:[#allocation2 + $0x38] sm:$0xff] (!%p2380_p2), %v3547_v0 }
  0xbf   : > { %377 = vst [vmem:[#allocation2 + $0x40] sm:$0xff] (!%p2380_p2), %v3547_v0  ;;  %378 = vst [vmem:[#allocation2 + $0x48] sm:$0xff] (!%p2380_p2), %v3547_v0 }
  0xc0   : > { %379 = vst [vmem:[#allocation2 + $0x50] sm:$0xff] (!%p2380_p2), %v3547_v0  ;;  %380 = vst [vmem:[#allocation2 + $0x58] sm:$0xff] (!%p2380_p2), %v3547_v0 }
  0xc2 PF: > { %v394_v1 = vld [vmem:[%s3817_s13 + $0x8] sm:$0xff]  ;;  %v393_v6 = vld [vmem:[%s3817_s13] sm:$0xff]  ;;  %s4821_s26 = sld [smem:[#allocation18_spill]] }
  0xc3   : > { %v398_v2 = vld [vmem:[%s3817_s13 + $0x28] sm:$0xff]  ;;  %v397_v7 = vld [vmem:[%s3817_s13 + $0x20] sm:$0xff] }
  0xc4   : > { %v522_v3 = vld [vmem:[%s3817_s13 + $0x408] sm:$0xff]  ;;  %v2388_v4 = vpack.c.bf16 %v398_v2, %v394_v1  ;;  %v2390_v9 = vpack.c.bf16 %v397_v7, %v393_v6  ;;  %v521_v10 = vld [vmem:[%s3817_s13 + $0x400] sm:$0xff] }
  0xc5   : > { %v526_v5 = vld [vmem:[%s3817_s13 + $0x428] sm:$0xff]  ;;  %v525_v11 = vld [vmem:[%s3817_s13 + $0x420] sm:$0xff] }
  0xc6   : > { %v2452_v8 = vpack.c.bf16 %v526_v5, %v522_v3  ;;  %v402_v12 = vld [vmem:[%s3817_s13 + $0x48] sm:$0xff]  ;;  %2389 = vmatprep.subr.bf16.mxu1 %v2388_v4  ;;  %v2454_v13 = vpack.c.bf16 %v525_v11, %v521_v10  ;;  %v401_v19 = vld [vmem:[%s3817_s13 + $0x40] sm:$0xff] }
  0xc7   : > { %v406_v14 = vld [vmem:[%s3817_s13 + $0x68] sm:$0xff]  ;;  %2391 = vmatpush1.bf16.msra.mxu1 %v2390_v9  ;;  %v405_v20 = vld [vmem:[%s3817_s13 + $0x60] sm:$0xff] }
  0xc8   : > { %v530_v15 = vld [vmem:[%s3817_s13 + $0x448] sm:$0xff]  ;;  %2453 = vmatprep.subr.bf16.mxu0 %v2452_v8  ;;  %v2392_v17 = vpack.c.bf16 %v406_v14, %v402_v12  ;;  %v529_v21 = vld [vmem:[%s3817_s13 + $0x440] sm:$0xff]  ;;  %v2394_v22 = vpack.c.bf16 %v405_v20, %v401_v19  ;;  %p2381_p12 = scmp.ne.s32.totalorder %s4821_s26, 5 }
  0xc9   : > { %v534_v16 = vld [vmem:[%s3817_s13 + $0x468] sm:$0xff]  ;;  %2455 = vmatpush1.bf16.msra.mxu0 %v2454_v13  ;;  %v533_v23 = vld [vmem:[%s3817_s13 + $0x460] sm:$0xff] }
  0xca   : > { %v2456_v18 = vpack.c.bf16 %v534_v16, %v530_v15  ;;  %v410_v24 = vld [vmem:[%s3817_s13 + $0x88] sm:$0xff]  ;;  %2393 = vmatprep.subr.bf16.mxu1 %v2392_v17  ;;  %v2458_v26 = vpack.c.bf16 %v533_v23, %v529_v21  ;;  %v409_v30 = vld [vmem:[%s3817_s13 + $0x80] sm:$0xff] }
  0xcb   : > { %v414_v25 = vld [vmem:[%s3817_s13 + $0xa8] sm:$0xff]  ;;  %v413_v32 = vld [vmem:[%s3817_s13 + $0xa0] sm:$0xff]  ;;  %2395 = vmatpush1.bf16.msra.mxu1 %v2394_v22 }
  0xcc   : > { %2457 = vmatprep.subr.bf16.mxu0 %v2456_v18  ;;  %v2396_v27 = vpack.c.bf16 %v414_v25, %v410_v24  ;;  %v538_v28 = vld [vmem:[%s3817_s13 + $0x488] sm:$0xff]  ;;  %v537_v33 = vld [vmem:[%s3817_s13 + $0x480] sm:$0xff]  ;;  %v2398_v35 = vpack.c.bf16 %v413_v32, %v409_v30 }
  0xcd   : > { %v542_v29 = vld [vmem:[%s3817_s13 + $0x4a8] sm:$0xff]  ;;  %v541_v34 = vld [vmem:[%s3817_s13 + $0x4a0] sm:$0xff]  ;;  %2459 = vmatpush1.bf16.msra.mxu0 %v2458_v26 }
  0xce   : > { %v2460_v31 = vpack.c.bf16 %v542_v29, %v538_v28  ;;  %v418_v36 = vld [vmem:[%s3817_s13 + $0xc8] sm:$0xff]  ;;  %2397 = vmatprep.subr.bf16.mxu1 %v2396_v27  ;;  %v2462_v39 = vpack.c.bf16 %v541_v34, %v537_v33  ;;  %v417_v42 = vld [vmem:[%s3817_s13 + $0xc0] sm:$0xff] }
  0xcf   : > { %v422_v37 = vld [vmem:[%s3817_s13 + $0xe8] sm:$0xff]  ;;  %v421_v43 = vld [vmem:[%s3817_s13 + $0xe0] sm:$0xff]  ;;  %2399 = vmatpush1.bf16.msra.mxu1 %v2398_v35 }
  0xd0   : > { %v546_v38 = vld [vmem:[%s3817_s13 + $0x4c8] sm:$0xff]  ;;  %v2400_v40 = vpack.c.bf16 %v422_v37, %v418_v36  ;;  %2461 = vmatprep.subr.bf16.mxu0 %v2460_v31  ;;  %v545_v45 = vld [vmem:[%s3817_s13 + $0x4c0] sm:$0xff]  ;;  %v2402_v51 = vpack.c.bf16 %v421_v43, %v417_v42 }
  0xd1   : > { %v550_v41 = vld [vmem:[%s3817_s13 + $0x4e8] sm:$0xff]  ;;  %v549_v46 = vld [vmem:[%s3817_s13 + $0x4e0] sm:$0xff]  ;;  %2463 = vmatpush1.bf16.msra.mxu0 %v2462_v39 }
  0xd2   : > { %v2464_v44 = vpack.c.bf16 %v550_v41, %v546_v38  ;;  %v426_v47 = vld [vmem:[%s3817_s13 + $0x108] sm:$0xff]  ;;  %2401 = vmatprep.subr.bf16.mxu1 %v2400_v40  ;;  %v2466_v52 = vpack.c.bf16 %v549_v46, %v545_v45  ;;  %v425_v54 = vld [vmem:[%s3817_s13 + $0x100] sm:$0xff] }
  0xd3   : > { %v430_v48 = vld [vmem:[%s3817_s13 + $0x128] sm:$0xff]  ;;  %v429_v55 = vld [vmem:[%s3817_s13 + $0x120] sm:$0xff]  ;;  %2403 = vmatpush1.bf16.msra.mxu1 %v2402_v51 }
  0xd4   : > { %v554_v49 = vld [vmem:[%s3817_s13 + $0x508] sm:$0xff]  ;;  %v2404_v53 = vpack.c.bf16 %v430_v48, %v426_v47  ;;  %v553_v56 = vld [vmem:[%s3817_s13 + $0x500] sm:$0xff]  ;;  %2465 = vmatprep.subr.bf16.mxu0 %v2464_v44  ;;  %v2406_v63 = vpack.c.bf16 %v429_v55, %v425_v54 }
  0xd5   : > { %v558_v50 = vld [vmem:[%s3817_s13 + $0x528] sm:$0xff]  ;;  %v557_v58 = vld [vmem:[%s3817_s13 + $0x520] sm:$0xff]  ;;  %2467 = vmatpush1.bf16.msra.mxu0 %v2466_v52 }
  0xd6   : > { %v2468_v57 = vpack.c.bf16 %v558_v50, %v554_v49  ;;  %v434_v59 = vld [vmem:[%s3817_s13 + $0x148] sm:$0xff]  ;;  %2405 = vmatprep.subr.bf16.mxu1 %v2404_v53  ;;  %v2470_v0 = vpack.c.bf16 %v557_v58, %v553_v56  ;;  %v433_v2 = vld [vmem:[%s3817_s13 + $0x140] sm:$0xff] }
  0xd7   : > { %v438_v60 = vld [vmem:[%s3817_s13 + $0x168] sm:$0xff]  ;;  %v437_v3 = vld [vmem:[%s3817_s13 + $0x160] sm:$0xff]  ;;  %2407 = vmatpush1.bf16.msra.mxu1 %v2406_v63 }
  0xd8   : > { %v562_v61 = vld [vmem:[%s3817_s13 + $0x548] sm:$0xff]  ;;  %v2408_v1 = vpack.c.bf16 %v438_v60, %v434_v59  ;;  %v561_v4 = vld [vmem:[%s3817_s13 + $0x540] sm:$0xff]  ;;  %2469 = vmatprep.subr.bf16.mxu0 %v2468_v57  ;;  %v2410_v11 = vpack.c.bf16 %v437_v3, %v433_v2 }
  0xd9   : > { %v566_v62 = vld [vmem:[%s3817_s13 + $0x568] sm:$0xff]  ;;  %v565_v6 = vld [vmem:[%s3817_s13 + $0x560] sm:$0xff]  ;;  %2471 = vmatpush1.bf16.msra.mxu0 %v2470_v0 }
  0xda   : > { %v2472_v5 = vpack.c.bf16 %v566_v62, %v562_v61  ;;  %v442_v7 = vld [vmem:[%s3817_s13 + $0x188] sm:$0xff]  ;;  %2409 = vmatprep.subr.bf16.mxu1 %v2408_v1  ;;  %v2474_v12 = vpack.c.bf16 %v565_v6, %v561_v4  ;;  %v441_v14 = vld [vmem:[%s3817_s13 + $0x180] sm:$0xff] }
  0xdb   : > { %v446_v8 = vld [vmem:[%s3817_s13 + $0x1a8] sm:$0xff]  ;;  %v445_v15 = vld [vmem:[%s3817_s13 + $0x1a0] sm:$0xff]  ;;  %2411 = vmatpush1.bf16.msra.mxu1 %v2410_v11 }
  0xdc   : > { %v570_v9 = vld [vmem:[%s3817_s13 + $0x588] sm:$0xff]  ;;  %v2412_v13 = vpack.c.bf16 %v446_v8, %v442_v7  ;;  %v569_v16 = vld [vmem:[%s3817_s13 + $0x580] sm:$0xff]  ;;  %2473 = vmatprep.subr.bf16.mxu0 %v2472_v5  ;;  %v2414_v23 = vpack.c.bf16 %v445_v15, %v441_v14 }
  0xdd   : > { %v574_v10 = vld [vmem:[%s3817_s13 + $0x5a8] sm:$0xff]  ;;  %v573_v18 = vld [vmem:[%s3817_s13 + $0x5a0] sm:$0xff]  ;;  %2475 = vmatpush1.bf16.msra.mxu0 %v2474_v12 }
  0xde   : > { %v2476_v17 = vpack.c.bf16 %v574_v10, %v570_v9  ;;  %v450_v19 = vld [vmem:[%s3817_s13 + $0x1c8] sm:$0xff]  ;;  %2413 = vmatprep.subr.bf16.mxu1 %v2412_v13  ;;  %v2478_v24 = vpack.c.bf16 %v573_v18, %v569_v16  ;;  %v449_v26 = vld [vmem:[%s3817_s13 + $0x1c0] sm:$0xff] }
  0xdf   : > { %v454_v20 = vld [vmem:[%s3817_s13 + $0x1e8] sm:$0xff]  ;;  %v453_v27 = vld [vmem:[%s3817_s13 + $0x1e0] sm:$0xff]  ;;  %2415 = vmatpush1.bf16.msra.mxu1 %v2414_v23 }
  0xe0   : > { %v578_v21 = vld [vmem:[%s3817_s13 + $0x5c8] sm:$0xff]  ;;  %v2416_v25 = vpack.c.bf16 %v454_v20, %v450_v19  ;;  %v577_v28 = vld [vmem:[%s3817_s13 + $0x5c0] sm:$0xff]  ;;  %2477 = vmatprep.subr.bf16.mxu0 %v2476_v17  ;;  %v2418_v35 = vpack.c.bf16 %v453_v27, %v449_v26  ;;  %v3940_v20 = vld [vmem:[#allocation3 + $0x18] sm:$0xff] }
  0xe1   : > { %v582_v22 = vld [vmem:[%s3817_s13 + $0x5e8] sm:$0xff]  ;;  %v581_v30 = vld [vmem:[%s3817_s13 + $0x5e0] sm:$0xff]  ;;  %2479 = vmatpush1.bf16.msra.mxu0 %v2478_v24  ;;  %940 = vmatprep.mubr.f32.mxu0 %v3940_v20 }
  0xe2   : > { %v2480_v29 = vpack.c.bf16 %v582_v22, %v578_v21  ;;  %v458_v31 = vld [vmem:[%s3817_s13 + $0x208] sm:$0xff]  ;;  %2417 = vmatprep.subr.bf16.mxu1 %v2416_v25  ;;  %v2482_v36 = vpack.c.bf16 %v581_v30, %v577_v28  ;;  %v457_v38 = vld [vmem:[%s3817_s13 + $0x200] sm:$0xff] }
  0xe3   : > { %v462_v32 = vld [vmem:[%s3817_s13 + $0x228] sm:$0xff]  ;;  %v461_v39 = vld [vmem:[%s3817_s13 + $0x220] sm:$0xff]  ;;  %2419 = vmatpush1.bf16.msra.mxu1 %v2418_v35 }
  0xe4   : > { %v586_v33 = vld [vmem:[%s3817_s13 + $0x608] sm:$0xff]  ;;  %v2420_v37 = vpack.c.bf16 %v462_v32, %v458_v31  ;;  %v585_v40 = vld [vmem:[%s3817_s13 + $0x600] sm:$0xff]  ;;  %2481 = vmatprep.subr.bf16.mxu0 %v2480_v29  ;;  %v2422_v47 = vpack.c.bf16 %v461_v39, %v457_v38 }
  0xe5   : > { %v590_v34 = vld [vmem:[%s3817_s13 + $0x628] sm:$0xff]  ;;  %v589_v42 = vld [vmem:[%s3817_s13 + $0x620] sm:$0xff]  ;;  %2483 = vmatpush1.bf16.msra.mxu0 %v2482_v36 }
  0xe6   : > { %v2484_v41 = vpack.c.bf16 %v590_v34, %v586_v33  ;;  %v466_v43 = vld [vmem:[%s3817_s13 + $0x248] sm:$0xff]  ;;  %2421 = vmatprep.subr.bf16.mxu1 %v2420_v37  ;;  %v2486_v48 = vpack.c.bf16 %v589_v42, %v585_v40  ;;  %v465_v50 = vld [vmem:[%s3817_s13 + $0x240] sm:$0xff] }
  0xe7   : > { %v470_v44 = vld [vmem:[%s3817_s13 + $0x268] sm:$0xff]  ;;  %v469_v51 = vld [vmem:[%s3817_s13 + $0x260] sm:$0xff]  ;;  %2423 = vmatpush1.bf16.msra.mxu1 %v2422_v47 }
  0xe8   : > { %v594_v45 = vld [vmem:[%s3817_s13 + $0x648] sm:$0xff]  ;;  %v2424_v49 = vpack.c.bf16 %v470_v44, %v466_v43  ;;  %v593_v52 = vld [vmem:[%s3817_s13 + $0x640] sm:$0xff]  ;;  %2485 = vmatprep.subr.bf16.mxu0 %v2484_v41  ;;  %v2426_v59 = vpack.c.bf16 %v469_v51, %v465_v50 }
  0xe9   : > { %v598_v46 = vld [vmem:[%s3817_s13 + $0x668] sm:$0xff]  ;;  %v597_v54 = vld [vmem:[%s3817_s13 + $0x660] sm:$0xff]  ;;  %2487 = vmatpush1.bf16.msra.mxu0 %v2486_v48 }
  0xea   : > { %v2488_v53 = vpack.c.bf16 %v598_v46, %v594_v45  ;;  %v474_v55 = vld [vmem:[%s3817_s13 + $0x288] sm:$0xff]  ;;  %2425 = vmatprep.subr.bf16.mxu1 %v2424_v49  ;;  %v2490_v60 = vpack.c.bf16 %v597_v54, %v593_v52  ;;  %v473_v62 = vld [vmem:[%s3817_s13 + $0x280] sm:$0xff] }
  0xeb   : > { %v478_v56 = vld [vmem:[%s3817_s13 + $0x2a8] sm:$0xff]  ;;  %v477_v63 = vld [vmem:[%s3817_s13 + $0x2a0] sm:$0xff]  ;;  %2427 = vmatpush1.bf16.msra.mxu1 %v2426_v59 }
  0xec   : > { %v602_v57 = vld [vmem:[%s3817_s13 + $0x688] sm:$0xff]  ;;  %v2428_v61 = vpack.c.bf16 %v478_v56, %v474_v55  ;;  %v601_v0 = vld [vmem:[%s3817_s13 + $0x680] sm:$0xff]  ;;  %2489 = vmatprep.subr.bf16.mxu0 %v2488_v53  ;;  %v2430_v7 = vpack.c.bf16 %v477_v63, %v473_v62 }
  0xed   : > { %v606_v58 = vld [vmem:[%s3817_s13 + $0x6a8] sm:$0xff]  ;;  %v605_v2 = vld [vmem:[%s3817_s13 + $0x6a0] sm:$0xff]  ;;  %2491 = vmatpush1.bf16.msra.mxu0 %v2490_v60 }
  0xee   : > { %v2492_v1 = vpack.c.bf16 %v606_v58, %v602_v57  ;;  %v482_v3 = vld [vmem:[%s3817_s13 + $0x2c8] sm:$0xff]  ;;  %v481_v8 = vld [vmem:[%s3817_s13 + $0x2c0] sm:$0xff]  ;;  %2429 = vmatprep.subr.bf16.mxu1 %v2428_v61  ;;  %v2494_v9 = vpack.c.bf16 %v605_v2, %v601_v0  ;;  %v400_v2 = vld [vmem:[%s3817_s13 + $0x38] sm:$0xff] }
  0xef   : > { %v486_v4 = vld [vmem:[%s3817_s13 + $0x2e8] sm:$0xff]  ;;  %v485_v11 = vld [vmem:[%s3817_s13 + $0x2e0] sm:$0xff]  ;;  %2431 = vmatpush1.bf16.msra.mxu1 %v2430_v7 }
  0xf0   : > { %v610_v5 = vld [vmem:[%s3817_s13 + $0x6c8] sm:$0xff]  ;;  %v2432_v10 = vpack.c.bf16 %v486_v4, %v482_v3  ;;  %v609_v12 = vld [vmem:[%s3817_s13 + $0x6c0] sm:$0xff]  ;;  %2493 = vmatprep.subr.bf16.mxu0 %v2492_v1  ;;  %v2434_v21 = vpack.c.bf16 %v485_v11, %v481_v8  ;;  %v396_v1 = vld [vmem:[%s3817_s13 + $0x18] sm:$0xff] }
  0xf1   : > { %v614_v6 = vld [vmem:[%s3817_s13 + $0x6e8] sm:$0xff]  ;;  %v613_v13 = vld [vmem:[%s3817_s13 + $0x6e0] sm:$0xff]  ;;  %2495 = vmatpush1.bf16.msra.mxu0 %v2494_v9  ;;  %v2580_v7 = vpack.c.bf16 %v400_v2, %v396_v1  ;;  %v395_v9 = vld [vmem:[%s3817_s13 + $0x10] sm:$0xff] }
  0xf2   : > { %v2496_v14 = vpack.c.bf16 %v614_v6, %v610_v5  ;;  %v490_v15 = vld [vmem:[%s3817_s13 + $0x308] sm:$0xff]  ;;  %2433 = vmatprep.subr.bf16.mxu1 %v2432_v10  ;;  %v2498_v22 = vpack.c.bf16 %v613_v13, %v609_v12  ;;  %v489_v24 = vld [vmem:[%s3817_s13 + $0x300] sm:$0xff]  ;;  %v399_v10 = vld [vmem:[%s3817_s13 + $0x30] sm:$0xff] }
  0xf3   : > { %v494_v16 = vld [vmem:[%s3817_s13 + $0x328] sm:$0xff]  ;;  %v493_v25 = vld [vmem:[%s3817_s13 + $0x320] sm:$0xff]  ;;  %2435 = vmatpush1.bf16.msra.mxu1 %v2434_v21  ;;  %v404_v13 = vld [vmem:[%s3817_s13 + $0x58] sm:$0xff]  ;;  %v2582_v21 = vpack.c.bf16 %v399_v10, %v395_v9 }
  0xf4   : > { %v3935_v17 = vld [vmem:[#allocation3 + $0x8] sm:$0xff]  ;;  %v2436_v23 = vpack.c.bf16 %v494_v16, %v490_v15  ;;  %v617_v26 = vld [vmem:[%s3817_s13 + $0x700] sm:$0xff]  ;;  %2497 = vmatprep.subr.bf16.mxu0 %v2496_v14  ;;  %v2438_v33 = vpack.c.bf16 %v493_v25, %v489_v24  ;;  %v408_v14 = vld [vmem:[%s3817_s13 + $0x78] sm:$0xff] }
  0xf5   : > { %v618_v18 = vld [vmem:[%s3817_s13 + $0x708] sm:$0xff]  ;;  %863 = vmatprep.mubr.f32.mxu1 %v3935_v17  ;;  %v621_v28 = vld [vmem:[%s3817_s13 + $0x720] sm:$0xff]  ;;  %2499 = vmatpush1.bf16.msra.mxu0 %v2498_v22  ;;  %v403_v25 = vld [vmem:[%s3817_s13 + $0x50] sm:$0xff] }
  0xf6   : > { %v622_v19 = vld [vmem:[%s3817_s13 + $0x728] sm:$0xff]  ;;  %2437 = vmatprep.subr.bf16.mxu1 %v2436_v23  ;;  %v2502_v34 = vpack.c.bf16 %v621_v28, %v617_v26  ;;  %v497_v36 = vld [vmem:[%s3817_s13 + $0x340] sm:$0xff]  ;;  %v2584_v23 = vpack.c.bf16 %v408_v14, %v404_v13  ;;  %v407_v26 = vld [vmem:[%s3817_s13 + $0x70] sm:$0xff] }
  0xf7   : > { %v2500_v27 = vpack.c.bf16 %v622_v19, %v618_v18  ;;  %v498_v29 = vld [vmem:[%s3817_s13 + $0x348] sm:$0xff]  ;;  %v501_v37 = vld [vmem:[%s3817_s13 + $0x360] sm:$0xff]  ;;  %2439 = vmatpush1.bf16.msra.mxu1 %v2438_v33  ;;  %v3985_v19 = vld [vmem:[#allocation3 + $0x10] sm:$0xff]  ;;  %v2586_v33 = vpack.c.bf16 %v407_v26, %v403_v25 }
  0xf8   : > { %v502_v30 = vld [vmem:[%s3817_s13 + $0x368] sm:$0xff]  ;;  %v625_v38 = vld [vmem:[%s3817_s13 + $0x740] sm:$0xff]  ;;  %v2442_v45 = vpack.c.bf16 %v501_v37, %v497_v36  ;;  %v411_v37 = vld [vmem:[%s3817_s13 + $0x90] sm:$0xff] }
  0xf9   : > { %v626_v31 = vld [vmem:[%s3817_s13 + $0x748] sm:$0xff]  ;;  %v2440_v35 = vpack.c.bf16 %v502_v30, %v498_v29  ;;  %2501 = vmatprep.subr.bf16.mxu0 %v2500_v27  ;;  %v629_v40 = vld [vmem:[%s3817_s13 + $0x760] sm:$0xff]  ;;  %v412_v29 = vld [vmem:[%s3817_s13 + $0x98] sm:$0xff] }
  0xfa   : > { %v630_v32 = vld [vmem:[%s3817_s13 + $0x768] sm:$0xff]  ;;  %2503 = vmatpush1.bf16.msra.mxu0 %v2502_v34  ;;  %v2506_v46 = vpack.c.bf16 %v629_v40, %v625_v38  ;;  %v505_v48 = vld [vmem:[%s3817_s13 + $0x380] sm:$0xff]  ;;  %v416_v30 = vld [vmem:[%s3817_s13 + $0xb8] sm:$0xff] }
  0xfb   : > { %v2504_v39 = vpack.c.bf16 %v630_v32, %v626_v31  ;;  %v506_v41 = vld [vmem:[%s3817_s13 + $0x388] sm:$0xff]  ;;  %2441 = vmatprep.subr.bf16.mxu1 %v2440_v35  ;;  %v509_v49 = vld [vmem:[%s3817_s13 + $0x3a0] sm:$0xff]  ;;  %v2588_v35 = vpack.c.bf16 %v416_v30, %v412_v29  ;;  %v415_v38 = vld [vmem:[%s3817_s13 + $0xb0] sm:$0xff] }
  0xfc   : > { %v510_v42 = vld [vmem:[%s3817_s13 + $0x3a8] sm:$0xff]  ;;  %v633_v50 = vld [vmem:[%s3817_s13 + $0x780] sm:$0xff]  ;;  %2443 = vmatpush1.bf16.msra.mxu1 %v2442_v45  ;;  %v2446_v57 = vpack.c.bf16 %v509_v49, %v505_v48  ;;  %v2590_v45 = vpack.c.bf16 %v415_v38, %v411_v37  ;;  %v419_v49 = vld [vmem:[%s3817_s13 + $0xd0] sm:$0xff] }
  0xfd   : > { %v634_v43 = vld [vmem:[%s3817_s13 + $0x788] sm:$0xff]  ;;  %v2444_v47 = vpack.c.bf16 %v510_v42, %v506_v41  ;;  %2505 = vmatprep.subr.bf16.mxu0 %v2504_v39  ;;  %v637_v52 = vld [vmem:[%s3817_s13 + $0x7a0] sm:$0xff]  ;;  %v420_v41 = vld [vmem:[%s3817_s13 + $0xd8] sm:$0xff] }
  0xfe   : > { %v638_v44 = vld [vmem:[%s3817_s13 + $0x7a8] sm:$0xff]  ;;  %2507 = vmatpush1.bf16.msra.mxu0 %v2506_v46  ;;  %v2510_v58 = vpack.c.bf16 %v637_v52, %v633_v50  ;;  %v513_v60 = vld [vmem:[%s3817_s13 + $0x3c0] sm:$0xff]  ;;  %v424_v42 = vld [vmem:[%s3817_s13 + $0xf8] sm:$0xff] }
  0xff   : > { %v2508_v51 = vpack.c.bf16 %v638_v44, %v634_v43  ;;  %v514_v53 = vld [vmem:[%s3817_s13 + $0x3c8] sm:$0xff]  ;;  %2445 = vmatprep.subr.bf16.mxu1 %v2444_v47  ;;  %v517_v61 = vld [vmem:[%s3817_s13 + $0x3e0] sm:$0xff]  ;;  %v2592_v47 = vpack.c.bf16 %v424_v42, %v420_v41  ;;  %v423_v50 = vld [vmem:[%s3817_s13 + $0xf0] sm:$0xff] }
 0x100   : > { %v518_v54 = vld [vmem:[%s3817_s13 + $0x3e8] sm:$0xff]  ;;  %v641_v62 = vld [vmem:[%s3817_s13 + $0x7c0] sm:$0xff]  ;;  %2447 = vmatpush1.bf16.msra.mxu1 %v2446_v57  ;;  %v2450_v5 = vpack.c.bf16 %v517_v61, %v513_v60  ;;  %v2594_v57 = vpack.c.bf16 %v423_v50, %v419_v49  ;;  %v427_v61 = vld [vmem:[%s3817_s13 + $0x110] sm:$0xff] }
 0x101   : > { %v642_v55 = vld [vmem:[%s3817_s13 + $0x7c8] sm:$0xff]  ;;  %v2448_v59 = vpack.c.bf16 %v518_v54, %v514_v53  ;;  %2509 = vmatprep.subr.bf16.mxu0 %v2508_v51  ;;  %v645_v0 = vld [vmem:[%s3817_s13 + $0x7e0] sm:$0xff]  ;;  %v428_v53 = vld [vmem:[%s3817_s13 + $0x118] sm:$0xff] }
 0x102   : > { %v646_v56 = vld [vmem:[%s3817_s13 + $0x7e8] sm:$0xff]  ;;  %2511 = vmatpush1.bf16.msra.mxu0 %v2510_v58  ;;  %v2514_v6 = vpack.c.bf16 %v645_v0, %v641_v62  ;;  %v649_v8 = vld [vmem:[%s3817_s13 + $0x800] sm:$0xff]  ;;  %v432_v54 = vld [vmem:[%s3817_s13 + $0x138] sm:$0xff] }
 0x103   : > { %v2512_v63 = vpack.c.bf16 %v646_v56, %v642_v55  ;;  %v650_v3 = vld [vmem:[%s3817_s13 + $0x808] sm:$0xff]  ;;  %2449 = vmatprep.subr.bf16.mxu1 %v2448_v59  ;;  %v653_v12 = vld [vmem:[%s3817_s13 + $0x820] sm:$0xff]  ;;  %v2596_v59 = vpack.c.bf16 %v432_v54, %v428_v53  ;;  %v431_v62 = vld [vmem:[%s3817_s13 + $0x130] sm:$0xff] }
 0x104   : > { %v654_v4 = vld [vmem:[%s3817_s13 + $0x828] sm:$0xff]  ;;  %2451 = vmatpush1.bf16.msra.mxu1 %v2450_v5  ;;  %v3983_v18 = vld [vmem:[#allocation3] sm:$0xff]  ;;  %v2518_v22 = vpack.c.bf16 %v653_v12, %v649_v8  ;;  %v436_v1 = vld [vmem:[%s3817_s13 + $0x158] sm:$0xff]  ;;  %v2598_v5 = vpack.c.bf16 %v431_v62, %v427_v61 }
 0x105   : > { %2513 = vmatprep.subr.bf16.mxu0 %v2512_v63  ;;  %v2516_v11 = vpack.c.bf16 %v654_v4, %v650_v3  ;;  %v658_v15 = vld [vmem:[%s3817_s13 + $0x848] sm:$0xff]  ;;  %2581 = vmatprep.subr.bf16.mxu1 %v2580_v7  ;;  %v657_v24 = vld [vmem:[%s3817_s13 + $0x840] sm:$0xff]  ;;  %v440_v2 = vld [vmem:[%s3817_s13 + $0x178] sm:$0xff] }
 0x106   : > { %v662_v16 = vld [vmem:[%s3817_s13 + $0x868] sm:$0xff]  ;;  %2515 = vmatpush1.bf16.msra.mxu0 %v2514_v6  ;;  %v661_v28 = vld [vmem:[%s3817_s13 + $0x860] sm:$0xff]  ;;  %v2600_v7 = vpack.c.bf16 %v440_v2, %v436_v1  ;;  %v435_v9 = vld [vmem:[%s3817_s13 + $0x150] sm:$0xff] }
 0x107   : > { %2517 = vmatprep.subr.bf16.mxu0 %v2516_v11  ;;  %v2520_v27 = vpack.c.bf16 %v662_v16, %v658_v15  ;;  %864 = vmatmul.mubr.f32.vlgmr.msra.gmra.mrb[0].mxu1 %v3983_v18  ;;  %v666_v31 = vld [vmem:[%s3817_s13 + $0x888] sm:$0xff]  ;;  %v2522_v34 = vpack.c.bf16 %v661_v28, %v657_v24  ;;  %v665_v36 = vld [vmem:[%s3817_s13 + $0x880] sm:$0xff]  ;;  %v439_v10 = vld [vmem:[%s3817_s13 + $0x170] sm:$0xff] }
 0x108   : > { %v670_v32 = vld [vmem:[%s3817_s13 + $0x8a8] sm:$0xff]  ;;  %2583 = vmatpush1.bf16.msra.mxu1 %v2582_v21  ;;  %v669_v40 = vld [vmem:[%s3817_s13 + $0x8a0] sm:$0xff]  ;;  %v444_v13 = vld [vmem:[%s3817_s13 + $0x198] sm:$0xff]  ;;  %v2602_v21 = vpack.c.bf16 %v439_v10, %v435_v9 }
 0x109   : > { %941 = vmatmul.mubr.f32.vlgmr.msra.gmra.mrb[0].mxu0 %v3985_v19  ;;  %2585 = vmatprep.subr.bf16.mxu1 %v2584_v23  ;;  %v2524_v39 = vpack.c.bf16 %v670_v32, %v666_v31  ;;  %v674_v43 = vld [vmem:[%s3817_s13 + $0x8c8] sm:$0xff]  ;;  %v2526_v46 = vpack.c.bf16 %v669_v40, %v665_v36  ;;  %v673_v48 = vld [vmem:[%s3817_s13 + $0x8c0] sm:$0xff]  ;;  %v448_v14 = vld [vmem:[%s3817_s13 + $0x1b8] sm:$0xff] }
 0x10a   : > { %2519 = vmatpush1.bf16.msra.mxu0 %v2518_v22  ;;  %v678_v44 = vld [vmem:[%s3817_s13 + $0x8e8] sm:$0xff]  ;;  %v677_v52 = vld [vmem:[%s3817_s13 + $0x8e0] sm:$0xff]  ;;  %v4030_v23 = vld [vmem:[#allocation3 + $0x38] sm:$0xff] }
 0x10b   : > { %2521 = vmatprep.subr.bf16.mxu0 %v2520_v27  ;;  %v2528_v51 = vpack.c.bf16 %v678_v44, %v674_v43  ;;  %v682_v55 = vld [vmem:[%s3817_s13 + $0x908] sm:$0xff]  ;;  %v2530_v58 = vpack.c.bf16 %v677_v52, %v673_v48  ;;  %v681_v60 = vld [vmem:[%s3817_s13 + $0x900] sm:$0xff]  ;;  %v4034_v25 = vld [vmem:[#allocation3 + $0x30] sm:$0xff]  ;;  %v2604_v27 = vpack.c.bf16 %v448_v14, %v444_v13  ;;  %869 = vmatprep.mubr.f32.mxu1 %v4030_v23 }
 0x10c   : > { %2587 = vmatpush1.bf16.msra.mxu1 %v2586_v33  ;;  %v686_v56 = vld [vmem:[%s3817_s13 + $0x928] sm:$0xff]  ;;  %v685_v0 = vld [vmem:[%s3817_s13 + $0x920] sm:$0xff]  ;;  %v443_v28 = vld [vmem:[%s3817_s13 + $0x190] sm:$0xff] }
 0x10d   : > { %2589 = vmatprep.subr.bf16.mxu1 %v2588_v35  ;;  %v2532_v63 = vpack.c.bf16 %v686_v56, %v682_v55  ;;  %v690_v3 = vld [vmem:[%s3817_s13 + $0x948] sm:$0xff]  ;;  %v2534_v6 = vpack.c.bf16 %v685_v0, %v681_v60  ;;  %v689_v8 = vld [vmem:[%s3817_s13 + $0x940] sm:$0xff]  ;;  %v447_v29 = vld [vmem:[%s3817_s13 + $0x1b0] sm:$0xff]  ;;  %870 = vmatmul.mubr.f32.gmra.mrb[2].mxu1 %v4034_v25 }
 0x10e   : > { %2523 = vmatpush1.bf16.msra.mxu0 %v2522_v34  ;;  %v694_v4 = vld [vmem:[%s3817_s13 + $0x968] sm:$0xff]  ;;  %v693_v12 = vld [vmem:[%s3817_s13 + $0x960] sm:$0xff]  ;;  %v452_v33 = vld [vmem:[%s3817_s13 + $0x1d8] sm:$0xff]  ;;  %v2606_v37 = vpack.c.bf16 %v447_v29, %v443_v28  ;;  %1094 = vmatprep.mubr.f32.mxu1 %v3935_v17 }
 0x10f   : > { %2525 = vmatprep.subr.bf16.mxu0 %v2524_v39  ;;  %v2536_v11 = vpack.c.bf16 %v694_v4, %v690_v3  ;;  %v698_v15 = vld [vmem:[%s3817_s13 + $0x988] sm:$0xff]  ;;  %v697_v22 = vld [vmem:[%s3817_s13 + $0x980] sm:$0xff]  ;;  %v2538_v26 = vpack.c.bf16 %v693_v12, %v689_v8  ;;  %v456_v34 = vld [vmem:[%s3817_s13 + $0x1f8] sm:$0xff] }
 0x110   : > { %2591 = vmatpush1.bf16.msra.mxu1 %v2590_v45  ;;  %v702_v16 = vld [vmem:[%s3817_s13 + $0x9a8] sm:$0xff]  ;;  %v4038_v30 = vld [vmem:[#allocation3 + $0x40] sm:$0xff]  ;;  %v2608_v40 = vpack.c.bf16 %v456_v34, %v452_v33  ;;  %v451_v42 = vld [vmem:[%s3817_s13 + $0x1d0] sm:$0xff] }
 0x111   : > { %2593 = vmatprep.subr.bf16.mxu1 %v2592_v47  ;;  %v4032_v24 = vld [vmem:[#allocation3 + $0x48] sm:$0xff]  ;;  %v2540_v31 = vpack.c.bf16 %v702_v16, %v698_v15  ;;  %v701_v32 = vld [vmem:[%s3817_s13 + $0x9a0] sm:$0xff]  ;;  %v455_v43 = vld [vmem:[%s3817_s13 + $0x1f0] sm:$0xff] }
 0x112   : > { %2527 = vmatpush1.bf16.msra.mxu0 %v2526_v46  ;;  %v706_v35 = vld [vmem:[%s3817_s13 + $0x9c8] sm:$0xff]  ;;  %946 = vmatprep.mubr.f32.mxu0 %v4032_v24  ;;  %v2542_v39 = vpack.c.bf16 %v701_v32, %v697_v22  ;;  %v705_v41 = vld [vmem:[%s3817_s13 + $0x9c0] sm:$0xff]  ;;  %v460_v46 = vld [vmem:[%s3817_s13 + $0x218] sm:$0xff]  ;;  %v2610_v50 = vpack.c.bf16 %v455_v43, %v451_v42 }
 0x113   : > { %2529 = vmatprep.subr.bf16.mxu0 %v2528_v51  ;;  %v710_v36 = vld [vmem:[%s3817_s13 + $0x9e8] sm:$0xff]  ;;  %947 = vmatmul.mubr.f32.gmra.mrb[2].mxu0 %v4038_v30  ;;  %v709_v45 = vld [vmem:[%s3817_s13 + $0x9e0] sm:$0xff]  ;;  %v464_v47 = vld [vmem:[%s3817_s13 + $0x238] sm:$0xff] }
 0x114   : > { %2595 = vmatpush1.bf16.msra.mxu1 %v2594_v57  ;;  %v4049_v38 = vld [vmem:[#allocation3 + $0x28] sm:$0xff]  ;;  %v2544_v44 = vpack.c.bf16 %v710_v36, %v706_v35  ;;  %v2546_v51 = vpack.c.bf16 %v709_v45, %v705_v41  ;;  %v2612_v52 = vpack.c.bf16 %v464_v47, %v460_v46  ;;  %v713_v53 = vld [vmem:[%s3817_s13 + $0xa00] sm:$0xff]  ;;  %v459_v54 = vld [vmem:[%s3817_s13 + $0x210] sm:$0xff] }
 0x115   : > { %2597 = vmatprep.subr.bf16.mxu1 %v2596_v59  ;;  %1017 = vmatprep.mubr.f32.mxu0 %v4049_v38  ;;  %v714_v48 = vld [vmem:[%s3817_s13 + $0xa08] sm:$0xff]  ;;  %v463_v55 = vld [vmem:[%s3817_s13 + $0x230] sm:$0xff]  ;;  %v717_v57 = vld [vmem:[%s3817_s13 + $0xa20] sm:$0xff] }
 0x116   : > { %2531 = vmatpush1.bf16.msra.mxu0 %v2530_v58  ;;  %v718_v49 = vld [vmem:[%s3817_s13 + $0xa28] sm:$0xff]  ;;  %v468_v58 = vld [vmem:[%s3817_s13 + $0x258] sm:$0xff]  ;;  %v2614_v61 = vpack.c.bf16 %v463_v55, %v459_v54  ;;  %v2550_v62 = vpack.c.bf16 %v717_v57, %v713_v53  ;;  %v721_v0 = vld [vmem:[%s3817_s13 + $0xa40] sm:$0xff] }
 0x117   : > { %2533 = vmatprep.subr.bf16.mxu0 %v2532_v63  ;;  %v2548_v56 = vpack.c.bf16 %v718_v49, %v714_v48  ;;  %v472_v17 = vld [vmem:[%s3817_s13 + $0x278] sm:$0xff]  ;;  %v722_v59 = vld [vmem:[%s3817_s13 + $0xa48] sm:$0xff]  ;;  %v467_v1 = vld [vmem:[%s3817_s13 + $0x250] sm:$0xff] }
 0x118   : > { %2599 = vmatpush1.bf16.msra.mxu1 %v2598_v5  ;;  %v726_v60 = vld [vmem:[%s3817_s13 + $0xa68] sm:$0xff]  ;;  %v2616_v63 = vpack.c.bf16 %v472_v17, %v468_v58  ;;  %v471_v2 = vld [vmem:[%s3817_s13 + $0x270] sm:$0xff]  ;;  %v725_v4 = vld [vmem:[%s3817_s13 + $0xa60] sm:$0xff] }
 0x119   : > { %2601 = vmatprep.subr.bf16.mxu1 %v2600_v7  ;;  %v2552_v3 = vpack.c.bf16 %v726_v60, %v722_v59  ;;  %v476_v5 = vld [vmem:[%s3817_s13 + $0x298] sm:$0xff]  ;;  %v730_v7 = vld [vmem:[%s3817_s13 + $0xa88] sm:$0xff]  ;;  %v2618_v9 = vpack.c.bf16 %v471_v2, %v467_v1  ;;  %v2554_v10 = vpack.c.bf16 %v725_v4, %v721_v0  ;;  %v729_v12 = vld [vmem:[%s3817_s13 + $0xa80] sm:$0xff] }
 0x11a   : > { %2535 = vmatpush1.bf16.msra.mxu0 %v2534_v6  ;;  %v480_v6 = vld [vmem:[%s3817_s13 + $0x2b8] sm:$0xff]  ;;  %v734_v8 = vld [vmem:[%s3817_s13 + $0xaa8] sm:$0xff]  ;;  %v475_v13 = vld [vmem:[%s3817_s13 + $0x290] sm:$0xff] }
 0x11b   : > { %2537 = vmatprep.subr.bf16.mxu0 %v2536_v11  ;;  %v2620_v11 = vpack.c.bf16 %v480_v6, %v476_v5  ;;  %v479_v14 = vld [vmem:[%s3817_s13 + $0x2b0] sm:$0xff]  ;;  %v2556_v15 = vpack.c.bf16 %v734_v8, %v730_v7  ;;  %v733_v16 = vld [vmem:[%s3817_s13 + $0xaa0] sm:$0xff]  ;;  %v488_v22 = vld [vmem:[%s3817_s13 + $0x2f8] sm:$0xff] }
 0x11c   : > { %2603 = vmatpush1.bf16.msra.mxu1 %v2602_v21  ;;  %v484_v21 = vld [vmem:[%s3817_s13 + $0x2d8] sm:$0xff]  ;;  %v2622_v28 = vpack.c.bf16 %v479_v14, %v475_v13  ;;  %v2558_v29 = vpack.c.bf16 %v733_v16, %v729_v12  ;;  %v737_v32 = vld [vmem:[%s3817_s13 + $0xac0] sm:$0xff]  ;;  %v483_v33 = vld [vmem:[%s3817_s13 + $0x2d0] sm:$0xff] }
 0x11d   : > { %2605 = vmatprep.subr.bf16.mxu1 %v2604_v27  ;;  %v742_v27 = vld [vmem:[%s3817_s13 + $0xae8] sm:$0xff]  ;;  %v487_v34 = vld [vmem:[%s3817_s13 + $0x2f0] sm:$0xff]  ;;  %v741_v36 = vld [vmem:[%s3817_s13 + $0xae0] sm:$0xff] }
 0x11e   : > { %2539 = vmatpush1.bf16.msra.mxu0 %v2538_v26  ;;  %v738_v26 = vld [vmem:[%s3817_s13 + $0xac8] sm:$0xff]  ;;  %v2626_v42 = vpack.c.bf16 %v487_v34, %v483_v33  ;;  %v2562_v43 = vpack.c.bf16 %v741_v36, %v737_v32  ;;  %v745_v45 = vld [vmem:[%s3817_s13 + $0xb00] sm:$0xff]  ;;  %v491_v46 = vld [vmem:[%s3817_s13 + $0x310] sm:$0xff] }
 0x11f   : > { %2541 = vmatprep.subr.bf16.mxu0 %v2540_v31  ;;  %v2624_v31 = vpack.c.bf16 %v488_v22, %v484_v21  ;;  %v2560_v35 = vpack.c.bf16 %v742_v27, %v738_v26  ;;  %v750_v41 = vld [vmem:[%s3817_s13 + $0xb28] sm:$0xff]  ;;  %v495_v47 = vld [vmem:[%s3817_s13 + $0x330] sm:$0xff]  ;;  %v749_v49 = vld [vmem:[%s3817_s13 + $0xb20] sm:$0xff] }
 0x120   : > { %2607 = vmatpush1.bf16.msra.mxu1 %v2606_v37  ;;  %v492_v37 = vld [vmem:[%s3817_s13 + $0x318] sm:$0xff]  ;;  %v758_v53 = vld [vmem:[%s3817_s13 + $0xb68] sm:$0xff]  ;;  %v2630_v54 = vpack.c.bf16 %v495_v47, %v491_v46  ;;  %v2566_v55 = vpack.c.bf16 %v749_v49, %v745_v45  ;;  %v753_v57 = vld [vmem:[%s3817_s13 + $0xb40] sm:$0xff] }
 0x121   : > { %2609 = vmatprep.subr.bf16.mxu1 %v2608_v40  ;;  %v746_v40 = vld [vmem:[%s3817_s13 + $0xb08] sm:$0xff]  ;;  %v499_v58 = vld [vmem:[%s3817_s13 + $0x350] sm:$0xff]  ;;  %v757_v60 = vld [vmem:[%s3817_s13 + $0xb60] sm:$0xff] }
 0x122   : > { %2543 = vmatpush1.bf16.msra.mxu0 %v2542_v39  ;;  %v496_v39 = vld [vmem:[%s3817_s13 + $0x338] sm:$0xff]  ;;  %v2564_v48 = vpack.c.bf16 %v750_v41, %v746_v40  ;;  %v503_v17 = vld [vmem:[%s3817_s13 + $0x370] sm:$0xff]  ;;  %v766_v0 = vld [vmem:[%s3817_s13 + $0xba8] sm:$0xff]  ;;  %v2570_v2 = vpack.c.bf16 %v757_v60, %v753_v57 }
 0x123   : > { %2545 = vmatprep.subr.bf16.mxu0 %v2544_v44  ;;  %v2628_v44 = vpack.c.bf16 %v496_v39, %v492_v37  ;;  %v2634_v1 = vpack.c.bf16 %v503_v17, %v499_v58  ;;  %v761_v4 = vld [vmem:[%s3817_s13 + $0xb80] sm:$0xff]  ;;  %v507_v5 = vld [vmem:[%s3817_s13 + $0x390] sm:$0xff]  ;;  %v774_v12 = vld [vmem:[%s3817_s13 + $0xbe8] sm:$0xff] }
 0x124   : > { %2611 = vmatpush1.bf16.msra.mxu1 %v2610_v50  ;;  %v500_v50 = vld [vmem:[%s3817_s13 + $0x358] sm:$0xff]  ;;  %v511_v6 = vld [vmem:[%s3817_s13 + $0x3b0] sm:$0xff]  ;;  %v765_v8 = vld [vmem:[%s3817_s13 + $0xba0] sm:$0xff] }
 0x125   : > { %2613 = vmatprep.subr.bf16.mxu1 %v2612_v52  ;;  %v754_v52 = vld [vmem:[%s3817_s13 + $0xb48] sm:$0xff]  ;;  %v2638_v13 = vpack.c.bf16 %v511_v6, %v507_v5  ;;  %v2574_v14 = vpack.c.bf16 %v765_v8, %v761_v4  ;;  %v769_v16 = vld [vmem:[%s3817_s13 + $0xbc0] sm:$0xff]  ;;  %v515_v21 = vld [vmem:[%s3817_s13 + $0x3d0] sm:$0xff] }
 0x126   : > { %2547 = vmatpush1.bf16.msra.mxu0 %v2546_v51  ;;  %v504_v51 = vld [vmem:[%s3817_s13 + $0x378] sm:$0xff]  ;;  %v2568_v59 = vpack.c.bf16 %v758_v53, %v754_v52  ;;  %v519_v22 = vld [vmem:[%s3817_s13 + $0x3f0] sm:$0xff]  ;;  %v773_v27 = vld [vmem:[%s3817_s13 + $0xbe0] sm:$0xff] }
 0x127   : > { %2549 = vmatprep.subr.bf16.mxu0 %v2548_v56  ;;  %v2632_v56 = vpack.c.bf16 %v504_v51, %v500_v50  ;;  %v2578_v32 = vpack.c.bf16 %v773_v27, %v769_v16  ;;  %v523_v34 = vld [vmem:[%s3817_s13 + $0x410] sm:$0xff]  ;;  %v532_v36 = vld [vmem:[%s3817_s13 + $0x458] sm:$0xff]  ;;  %v4127_v40 = vld [vmem:[#allocation3 + $0x20] sm:$0xff] }
 0x128   : > { %2615 = vmatpush1.bf16.msra.mxu1 %v2614_v61  ;;  %v508_v61 = vld [vmem:[%s3817_s13 + $0x398] sm:$0xff]  ;;  %v539_v50 = vld [vmem:[%s3817_s13 + $0x490] sm:$0xff]  ;;  %v1281_v16 = vld [vmem:[%s3826_s17] sm:$0xff] }
 0x129   : > { %2617 = vmatprep.subr.bf16.mxu1 %v2616_v63  ;;  %v762_v63 = vld [vmem:[%s3817_s13 + $0xb88] sm:$0xff]  ;;  %v536_v37 = vld [vmem:[%s3817_s13 + $0x478] sm:$0xff]  ;;  %v543_v51 = vld [vmem:[%s3817_s13 + $0x4b0] sm:$0xff] }
 0x12a   : > { %2551 = vmatpush1.bf16.msra.mxu0 %v2550_v62  ;;  %v512_v62 = vld [vmem:[%s3817_s13 + $0x3b8] sm:$0xff]  ;;  %v2572_v7 = vpack.c.bf16 %v766_v0, %v762_v63  ;;  %v2648_v41 = vpack.c.bf16 %v536_v37, %v532_v36  ;;  %v555_v17 = vld [vmem:[%s3817_s13 + $0x510] sm:$0xff] }
 0x12b   : > { %2553 = vmatprep.subr.bf16.mxu0 %v2552_v3  ;;  %v2636_v3 = vpack.c.bf16 %v512_v62, %v508_v61  ;;  %v540_v45 = vld [vmem:[%s3817_s13 + $0x498] sm:$0xff]  ;;  %v563_v63 = vld [vmem:[%s3817_s13 + $0x550] sm:$0xff] }
 0x12c   : > { %2619 = vmatpush1.bf16.msra.mxu1 %v2618_v9  ;;  %v516_v9 = vld [vmem:[%s3817_s13 + $0x3d8] sm:$0xff]  ;;  %v567_v0 = vld [vmem:[%s3817_s13 + $0x570] sm:$0xff] }
 0x12d   : > { %2621 = vmatprep.subr.bf16.mxu1 %v2620_v11  ;;  %v770_v11 = vld [vmem:[%s3817_s13 + $0xbc8] sm:$0xff]  ;;  %v544_v46 = vld [vmem:[%s3817_s13 + $0x4b8] sm:$0xff]  ;;  %v571_v5 = vld [vmem:[%s3817_s13 + $0x590] sm:$0xff] }
 0x12e   : > { %2555 = vmatpush1.bf16.msra.mxu0 %v2554_v10  ;;  %v520_v10 = vld [vmem:[%s3817_s13 + $0x3f8] sm:$0xff]  ;;  %v2576_v26 = vpack.c.bf16 %v774_v12, %v770_v11  ;;  %v2652_v49 = vpack.c.bf16 %v544_v46, %v540_v45  ;;  %v575_v6 = vld [vmem:[%s3817_s13 + $0x5b0] sm:$0xff]  ;;  %v1288_v12 = vld [vmem:[%s3826_s17 + $0x38] sm:$0xff] }
 0x12f   : > { %2557 = vmatprep.subr.bf16.mxu0 %v2556_v15  ;;  %v2640_v15 = vpack.c.bf16 %v520_v10, %v516_v9  ;;  %v548_v52 = vld [vmem:[%s3817_s13 + $0x4d8] sm:$0xff]  ;;  %v2670_v9 = vpack.c.bf16 %v575_v6, %v571_v5  ;;  %v579_v10 = vld [vmem:[%s3817_s13 + $0x5d0] sm:$0xff]  ;;  %v1348_v6 = vld [vmem:[%s3826_s17 + $0x218] sm:$0xff] }
 0x130   : > { %2623 = vmatpush1.bf16.msra.mxu1 %v2622_v28  ;;  %v524_v28 = vld [vmem:[%s3817_s13 + $0x418] sm:$0xff]  ;;  %v1282_v11 = vld [vmem:[%s3826_s17 + $0x8] sm:$0xff] }
 0x131   : > { %2625 = vmatprep.subr.bf16.mxu1 %v2624_v31  ;;  %v2642_v31 = vpack.c.bf16 %v519_v22, %v515_v21  ;;  %v552_v53 = vld [vmem:[%s3817_s13 + $0x4f8] sm:$0xff]  ;;  %v591_v37 = vld [vmem:[%s3817_s13 + $0x630] sm:$0xff] }
 0x132   : > { %2559 = vmatpush1.bf16.msra.mxu0 %v2558_v29  ;;  %v528_v29 = vld [vmem:[%s3817_s13 + $0x438] sm:$0xff]  ;;  %v1342_v5 = vld [vmem:[%s3826_s17 + $0x1e8] sm:$0xff] }
 0x133   : > { %2561 = vmatprep.subr.bf16.mxu0 %v2560_v35  ;;  %v2644_v33 = vpack.c.bf16 %v528_v29, %v524_v28  ;;  %v527_v35 = vld [vmem:[%s3817_s13 + $0x430] sm:$0xff]  ;;  %v556_v57 = vld [vmem:[%s3817_s13 + $0x518] sm:$0xff]  ;;  %v1300_v29 = vld [vmem:[%s3826_s17 + $0x98] sm:$0xff] }
 0x134   : > { %2627 = vmatpush1.bf16.msra.mxu1 %v2626_v42  ;;  %v2646_v39 = vpack.c.bf16 %v527_v35, %v523_v34  ;;  %v531_v42 = vld [vmem:[%s3817_s13 + $0x450] sm:$0xff]  ;;  %v564_v60 = vld [vmem:[%s3817_s13 + $0x558] sm:$0xff]  ;;  %v1293_v34 = vld [vmem:[%s3826_s17 + $0x60] sm:$0xff] }
 0x135   : > { %2629 = vmatprep.subr.bf16.mxu1 %v2628_v44  ;;  %v4131_v44 = vld [vmem:[#allocation3 + $0x58] sm:$0xff]  ;;  %v1294_v28 = vld [vmem:[%s3826_s17 + $0x68] sm:$0xff] }
 0x136   : > { %2563 = vmatpush1.bf16.msra.mxu0 %v2562_v43  ;;  %v535_v43 = vld [vmem:[%s3817_s13 + $0x470] sm:$0xff]  ;;  %v568_v61 = vld [vmem:[%s3817_s13 + $0x578] sm:$0xff] }
 0x137   : > { %2565 = vmatprep.subr.bf16.mxu0 %v2564_v48  ;;  %v2650_v47 = vpack.c.bf16 %v535_v43, %v531_v42  ;;  %v4138_v48 = vld [vmem:[#allocation3 + $0x50] sm:$0xff]  ;;  %v584_v8 = vld [vmem:[%s3817_s13 + $0x5f8] sm:$0xff]  ;;  %v1312_v42 = vld [vmem:[%s3826_s17 + $0xf8] sm:$0xff] }
 0x138   : > { %2631 = vmatpush1.bf16.msra.mxu1 %v2630_v54  ;;  %v2656_v54 = vpack.c.bf16 %v552_v53, %v548_v52  ;;  %v1287_v21 = vld [vmem:[%s3826_s17 + $0x30] sm:$0xff]  ;;  %v1318_v53 = vld [vmem:[%s3826_s17 + $0x128] sm:$0xff] }
 0x139   : > { %2633 = vmatprep.subr.bf16.mxu1 %v2632_v56  ;;  %v551_v56 = vld [vmem:[%s3817_s13 + $0x4f0] sm:$0xff]  ;;  %v588_v22 = vld [vmem:[%s3817_s13 + $0x618] sm:$0xff]  ;;  %v2774_v27 = vpack.c.bf16 %v1287_v21, %v1281_v16 }
 0x13a   : > { %2567 = vmatpush1.bf16.msra.mxu0 %v2566_v55  ;;  %v547_v55 = vld [vmem:[%s3817_s13 + $0x4d0] sm:$0xff]  ;;  %v1299_v35 = vld [vmem:[%s3826_s17 + $0x90] sm:$0xff] }
 0x13b   : > { %2569 = vmatprep.subr.bf16.mxu0 %v2568_v59  ;;  %v559_v59 = vld [vmem:[%s3817_s13 + $0x530] sm:$0xff]  ;;  %v596_v43 = vld [vmem:[%s3817_s13 + $0x658] sm:$0xff] }
 0x13c   : > { %2635 = vmatpush1.bf16.msra.mxu1 %v2634_v1  ;;  %v2662_v62 = vpack.c.bf16 %v559_v59, %v555_v17  ;;  %v572_v1 = vld [vmem:[%s3817_s13 + $0x598] sm:$0xff]  ;;  %v1330_v17 = vld [vmem:[%s3826_s17 + $0x188] sm:$0xff]  ;;  %v1336_v59 = vld [vmem:[%s3826_s17 + $0x1b8] sm:$0xff] }
 0x13d   : > { %2637 = vmatprep.subr.bf16.mxu1 %v2636_v3  ;;  %v2666_v3 = vpack.c.bf16 %v567_v0, %v563_v63  ;;  %v600_v45 = vld [vmem:[%s3817_s13 + $0x678] sm:$0xff]  ;;  %v1354_v21 = vld [vmem:[%s3826_s17 + $0x248] sm:$0xff] }
 0x13e   : > { %2571 = vmatpush1.bf16.msra.mxu0 %v2570_v2  ;;  %v576_v2 = vld [vmem:[%s3817_s13 + $0x5b8] sm:$0xff] }
 0x13f   : > { %2573 = vmatprep.subr.bf16.mxu0 %v2572_v7  ;;  %v2668_v4 = vpack.c.bf16 %v576_v2, %v572_v1  ;;  %v580_v7 = vld [vmem:[%s3817_s13 + $0x5d8] sm:$0xff]  ;;  %v2788_v1 = vpack.c.bf16 %v1336_v59, %v1330_v17  ;;  %v1329_v2 = vld [vmem:[%s3826_s17 + $0x180] sm:$0xff] }
 0x140   : > { %2639 = vmatpush1.bf16.msra.mxu1 %v2638_v13  ;;  %v2672_v13 = vpack.c.bf16 %v584_v8, %v580_v7  ;;  %v612_v0 = vld [vmem:[%s3817_s13 + $0x6d8] sm:$0xff]  ;;  %v611_v8 = vld [vmem:[%s3817_s13 + $0x6d0] sm:$0xff]  ;;  %v1377_v17 = vld [vmem:[%s3826_s17 + $0x300] sm:$0xff] }
 0x141   : > { %2641 = vmatprep.subr.bf16.mxu1 %v2640_v15  ;;  %v2772_v15 = vpack.c.bf16 %v1288_v12, %v1282_v11  ;;  %v620_v12 = vld [vmem:[%s3817_s13 + $0x718] sm:$0xff] }
 0x142   : > { %2575 = vmatpush1.bf16.msra.mxu0 %v2574_v14  ;;  %v583_v14 = vld [vmem:[%s3817_s13 + $0x5f0] sm:$0xff]  ;;  %v624_v16 = vld [vmem:[%s3817_s13 + $0x738] sm:$0xff] }
 0x143   : > { %2577 = vmatprep.subr.bf16.mxu0 %v2576_v26  ;;  %v592_v26 = vld [vmem:[%s3817_s13 + $0x638] sm:$0xff] }
 0x144   : > { %2643 = vmatpush1.bf16.msra.mxu1 %v2642_v31  ;;  %v2674_v31 = vpack.c.bf16 %v583_v14, %v579_v10  ;;  %v2676_v36 = vpack.c.bf16 %v592_v26, %v588_v22  ;;  %v1341_v14 = vld [vmem:[%s3826_s17 + $0x1e0] sm:$0xff]  ;;  %v1360_v22 = vld [vmem:[%s3826_s17 + $0x278] sm:$0xff]  ;;  %v1383_v59 = vld [vmem:[%s3826_s17 + $0x330] sm:$0xff] }
 0x145   : > { %2645 = vmatprep.subr.bf16.mxu1 %v2644_v33  ;;  %v2776_v33 = vpack.c.bf16 %v1300_v29, %v1294_v28  ;;  %v623_v28 = vld [vmem:[%s3817_s13 + $0x730] sm:$0xff] }
 0x146   : > { %2579 = vmatpush1.bf16.msra.mxu0 %v2578_v32  ;;  %v587_v32 = vld [vmem:[%s3817_s13 + $0x610] sm:$0xff] }
 0x147   : > { %1095 = vmatmul.mubr.f32.vlgmr.msra.gmra.mrb[4].mxu1 %v3983_v18  ;;  %v2654_v18 = vpack.c.bf16 %v543_v51, %v539_v50  ;;  %2773 = vmatprep.subr.bf16.mxu0 %v2772_v15  ;;  %v2678_v50 = vpack.c.bf16 %v591_v37, %v587_v32  ;;  %v595_v51 = vld [vmem:[%s3817_s13 + $0x650] sm:$0xff]  ;;  %v1347_v15 = vld [vmem:[%s3826_s17 + $0x210] sm:$0xff] }
 0x148   : > { %2647 = vmatpush1.bf16.msra.mxu1 %v2646_v39  ;;  %1100 = vmatprep.mubr.f32.mxu1 %v4030_v23  ;;  %v560_v23 = vld [vmem:[%s3817_s13 + $0x538] sm:$0xff]  ;;  %v2778_v39 = vpack.c.bf16 %v1299_v35, %v1293_v34  ;;  %v2794_v29 = vpack.c.bf16 %v1347_v15, %v1341_v14  ;;  %v1353_v34 = vld [vmem:[%s3826_s17 + $0x240] sm:$0xff]  ;;  %v1366_v37 = vld [vmem:[%s3826_s17 + $0x2a8] sm:$0xff] }
 0x149   : > { %1018 = vmatmul.mubr.f32.vlgmr.msra.gmra.mrb[0].mxu0 %v4127_v40  ;;  %2649 = vmatprep.subr.bf16.mxu1 %v2648_v41  ;;  %v2660_v58 = vpack.c.bf16 %v560_v23, %v556_v57  ;;  %v1306_v41 = vld [vmem:[%s3826_s17 + $0xc8] sm:$0xff]  ;;  %v1317_v57 = vld [vmem:[%s3826_s17 + $0x120] sm:$0xff]  ;;  %v1323_v23 = vld [vmem:[%s3826_s17 + $0x150] sm:$0xff] }
 0x14a   : > { %1023 = vmatprep.mubr.f32.mxu0 %v4131_v44  ;;  %2775 = vmatpush1.bf16.msra.mxu0 %v2774_v27  ;;  %v2780_v46 = vpack.c.bf16 %v1312_v42, %v1306_v41  ;;  %v619_v27 = vld [vmem:[%s3817_s13 + $0x710] sm:$0xff]  ;;  %v628_v32 = vld [vmem:[%s3817_s13 + $0x758] sm:$0xff] }
 0x14b   : > { %1101 = vmatmul.mubr.f32.gmra.mrb[6].mxu1 %v4034_v25  ;;  %v2658_v25 = vpack.c.bf16 %v551_v56, %v547_v55  ;;  %2777 = vmatprep.subr.bf16.mxu0 %v2776_v33  ;;  %v599_v55 = vld [vmem:[%s3817_s13 + $0x670] sm:$0xff]  ;;  %v2796_v33 = vpack.c.bf16 %v1360_v22, %v1354_v21  ;;  %v1359_v35 = vld [vmem:[%s3826_s17 + $0x270] sm:$0xff]  ;;  %v2694_v41 = vpack.c.bf16 %v623_v28, %v619_v27  ;;  %v1401_v22 = vld [vmem:[%s3826_s17 + $0x3c0] sm:$0xff] }
 0x14c   : > { %2651 = vmatpush1.bf16.msra.mxu1 %v2650_v47  ;;  %1171 = vmatprep.mubr.f32.mxu1 %v3940_v20  ;;  %v2664_v20 = vpack.c.bf16 %v568_v61, %v564_v60  ;;  %v1305_v47 = vld [vmem:[%s3826_s17 + $0xc0] sm:$0xff]  ;;  %v2682_v60 = vpack.c.bf16 %v599_v55, %v595_v51  ;;  %v603_v61 = vld [vmem:[%s3817_s13 + $0x690] sm:$0xff]  ;;  %v1371_v51 = vld [vmem:[%s3826_s17 + $0x2d0] sm:$0xff] }
 0x14d   : > { %1024 = vmatmul.mubr.f32.gmra.mrb[2].mxu0 %v4138_v48  ;;  %2653 = vmatprep.subr.bf16.mxu1 %v2652_v49  ;;  %v1311_v49 = vld [vmem:[%s3826_s17 + $0xf0] sm:$0xff]  ;;  %v627_v42 = vld [vmem:[%s3817_s13 + $0x750] sm:$0xff]  ;;  %v1420_v28 = vld [vmem:[%s3826_s17 + $0x458] sm:$0xff] }
 0x14e   : > { %2779 = vmatpush1.bf16.msra.mxu0 %v2778_v39  ;;  %v2782_v52 = vpack.c.bf16 %v1311_v49, %v1305_v47  ;;  %v1372_v39 = vld [vmem:[%s3826_s17 + $0x2d8] sm:$0xff]  ;;  %v636_v47 = vld [vmem:[%s3817_s13 + $0x798] sm:$0xff]  ;;  %v635_v55 = vld [vmem:[%s3817_s13 + $0x790] sm:$0xff] }
 0x14f   : > { %2781 = vmatprep.subr.bf16.mxu0 %v2780_v46  ;;  %v2800_v49 = vpack.c.bf16 %v1372_v39, %v1366_v37  ;;  %v655_v14 = vld [vmem:[%s3817_s13 + $0x830] sm:$0xff]  ;;  %v660_v15 = vld [vmem:[%s3817_s13 + $0x858] sm:$0xff]  ;;  %v1413_v39 = vld [vmem:[%s3826_s17 + $0x420] sm:$0xff] }
 0x150   : > { %2655 = vmatpush1.bf16.msra.mxu1 %v2654_v18  ;;  %v1324_v18 = vld [vmem:[%s3826_s17 + $0x158] sm:$0xff]  ;;  %v664_v21 = vld [vmem:[%s3817_s13 + $0x878] sm:$0xff]  ;;  %v1414_v27 = vld [vmem:[%s3826_s17 + $0x428] sm:$0xff] }
 0x151   : > { %2657 = vmatprep.subr.bf16.mxu1 %v2656_v54  ;;  %v2680_v54 = vpack.c.bf16 %v600_v45, %v596_v43  ;;  %v2784_v56 = vpack.c.bf16 %v1324_v18, %v1318_v53  ;;  %v631_v43 = vld [vmem:[%s3817_s13 + $0x770] sm:$0xff]  ;;  %v2798_v45 = vpack.c.bf16 %v1359_v35, %v1353_v34  ;;  %v1384_v18 = vld [vmem:[%s3826_s17 + $0x338] sm:$0xff]  ;;  %v668_v34 = vld [vmem:[%s3817_s13 + $0x898] sm:$0xff]  ;;  %v2816_v37 = vpack.c.bf16 %v1420_v28, %v1414_v27 }
 0x152   : > { %2783 = vmatpush1.bf16.msra.mxu0 %v2782_v52  ;;  %v640_v52 = vld [vmem:[%s3817_s13 + $0x7b8] sm:$0xff]  ;;  %v1378_v53 = vld [vmem:[%s3826_s17 + $0x308] sm:$0xff]  ;;  %v1468_v28 = vld [vmem:[%s3826_s17 + $0x5d8] sm:$0xff] }
 0x153   : > { %2785 = vmatprep.subr.bf16.mxu0 %v2784_v56  ;;  %v639_v56 = vld [vmem:[%s3817_s13 + $0x7b0] sm:$0xff] }
 0x154   : > { %2659 = vmatpush1.bf16.msra.mxu1 %v2658_v25  ;;  %v604_v25 = vld [vmem:[%s3817_s13 + $0x698] sm:$0xff]  ;;  %v1462_v27 = vld [vmem:[%s3826_s17 + $0x5a8] sm:$0xff] }
 0x155   : > { %2661 = vmatprep.subr.bf16.mxu1 %v2660_v58  ;;  %v608_v58 = vld [vmem:[%s3817_s13 + $0x6b8] sm:$0xff] }
 0x156   : > { %v2684_v63 = vpack.c.bf16 %v608_v58, %v604_v25  ;;  %v644_v25 = vld [vmem:[%s3817_s13 + $0x7d8] sm:$0xff]  ;;  %v2804_v58 = vpack.c.bf16 %v1384_v18, %v1378_v53  ;;  %v1425_v53 = vld [vmem:[%s3826_s17 + $0x480] sm:$0xff] }
 0x157   : > { %v1431_v18 = vld [vmem:[%s3826_s17 + $0x4b0] sm:$0xff] }
 0x158   : > { %2663 = vmatpush1.bf16.msra.mxu1 %v2662_v62  ;;  %v607_v62 = vld [vmem:[%s3817_s13 + $0x6b0] sm:$0xff] }
 0x159   : > { %2665 = vmatprep.subr.bf16.mxu1 %v2664_v20  ;;  %v2786_v20 = vpack.c.bf16 %v1323_v23, %v1317_v57  ;;  %v2686_v7 = vpack.c.bf16 %v607_v62, %v603_v61  ;;  %v2700_v23 = vpack.c.bf16 %v640_v52, %v636_v47  ;;  %v1390_v61 = vld [vmem:[%s3826_s17 + $0x368] sm:$0xff]  ;;  %v1396_v62 = vld [vmem:[%s3826_s17 + $0x398] sm:$0xff] }
 0x15a   : > { %v667_v47 = vld [vmem:[%s3817_s13 + $0x890] sm:$0xff] }
 0x15b   : > { %2787 = vmatpush1.bf16.msra.mxu0 %v2786_v20  ;;  %v2702_v20 = vpack.c.bf16 %v639_v56, %v635_v55 }
 0x15c   : > { %2667 = vmatpush1.bf16.msra.mxu1 %v2666_v3  ;;  %v1335_v3 = vld [vmem:[%s3826_s17 + $0x1b0] sm:$0xff]  ;;  %2789 = vmatprep.subr.bf16.mxu0 %v2788_v1  ;;  %v2806_v1 = vpack.c.bf16 %v1383_v59, %v1377_v17  ;;  %v1437_v59 = vld [vmem:[%s3826_s17 + $0x4e0] sm:$0xff] }
 0x15d   : > { %2669 = vmatprep.subr.bf16.mxu1 %v2668_v4  ;;  %v616_v4 = vld [vmem:[%s3817_s13 + $0x6f8] sm:$0xff]  ;;  %v2790_v10 = vpack.c.bf16 %v1335_v3, %v1329_v2 }
 0x15e   : > { %v2688_v11 = vpack.c.bf16 %v616_v4, %v612_v0  ;;  %v647_v0 = vld [vmem:[%s3817_s13 + $0x7f0] sm:$0xff]  ;;  %v652_v3 = vld [vmem:[%s3817_s13 + $0x818] sm:$0xff]  ;;  %v2808_v4 = vpack.c.bf16 %v1396_v62, %v1390_v61  ;;  %v1456_v62 = vld [vmem:[%s3826_s17 + $0x578] sm:$0xff] }
 0x15f   : > { %2791 = vmatpush1.bf16.msra.mxu0 %v2790_v10  ;;  %v1450_v61 = vld [vmem:[%s3826_s17 + $0x548] sm:$0xff] }
 0x160   : > { %2671 = vmatpush1.bf16.msra.mxu1 %v2670_v9  ;;  %v615_v9 = vld [vmem:[%s3817_s13 + $0x6f0] sm:$0xff] }
 0x161   : > { %2673 = vmatprep.subr.bf16.mxu1 %v2672_v13  ;;  %v2792_v13 = vpack.c.bf16 %v1348_v6, %v1342_v5  ;;  %v2690_v26 = vpack.c.bf16 %v615_v9, %v611_v8  ;;  %v1389_v5 = vld [vmem:[%s3826_s17 + $0x360] sm:$0xff]  ;;  %v1395_v6 = vld [vmem:[%s3826_s17 + $0x390] sm:$0xff]  ;;  %v1402_v8 = vld [vmem:[%s3826_s17 + $0x3c8] sm:$0xff] }
 0x162   : > { %v1408_v9 = vld [vmem:[%s3826_s17 + $0x3f8] sm:$0xff] }
 0x163   : > { %2793 = vmatprep.subr.bf16.mxu0 %v2792_v13  ;;  %v651_v13 = vld [vmem:[%s3817_s13 + $0x810] sm:$0xff] }
 0x164   : > { %2675 = vmatpush1.bf16.msra.mxu1 %v2674_v31  ;;  %v2692_v31 = vpack.c.bf16 %v624_v16, %v620_v12  ;;  %2795 = vmatpush1.bf16.msra.mxu0 %v2794_v29  ;;  %v2812_v16 = vpack.c.bf16 %v1408_v9, %v1402_v8  ;;  %v2710_v29 = vpack.c.bf16 %v655_v14, %v651_v13  ;;  %v695_v8 = vld [vmem:[%s3817_s13 + $0x970] sm:$0xff]  ;;  %v700_v9 = vld [vmem:[%s3817_s13 + $0x998] sm:$0xff] }
 0x165   : > { %2677 = vmatprep.subr.bf16.mxu1 %v2676_v36  ;;  %v632_v36 = vld [vmem:[%s3817_s13 + $0x778] sm:$0xff]  ;;  %2797 = vmatprep.subr.bf16.mxu0 %v2796_v33  ;;  %v663_v33 = vld [vmem:[%s3817_s13 + $0x870] sm:$0xff] }
 0x166   : > { %v2696_v46 = vpack.c.bf16 %v632_v36, %v628_v32  ;;  %v659_v32 = vld [vmem:[%s3817_s13 + $0x850] sm:$0xff]  ;;  %v672_v36 = vld [vmem:[%s3817_s13 + $0x8b8] sm:$0xff] }
 0x167   : > { %v1455_v13 = vld [vmem:[%s3826_s17 + $0x570] sm:$0xff] }
 0x168   : > { %2679 = vmatpush1.bf16.msra.mxu1 %v2678_v50  ;;  %v1365_v50 = vld [vmem:[%s3826_s17 + $0x2a0] sm:$0xff]  ;;  %2799 = vmatpush1.bf16.msra.mxu0 %v2798_v45  ;;  %v2714_v45 = vpack.c.bf16 %v663_v33, %v659_v32  ;;  %v1467_v33 = vld [vmem:[%s3826_s17 + $0x5d0] sm:$0xff] }
 0x169   : > { %2681 = vmatprep.subr.bf16.mxu1 %v2680_v54  ;;  %v2698_v54 = vpack.c.bf16 %v631_v43, %v627_v42  ;;  %v2802_v57 = vpack.c.bf16 %v1371_v51, %v1365_v50  ;;  %2801 = vmatprep.subr.bf16.mxu0 %v2800_v49  ;;  %v1426_v42 = vld [vmem:[%s3826_s17 + $0x488] sm:$0xff]  ;;  %v1432_v43 = vld [vmem:[%s3826_s17 + $0x4b8] sm:$0xff]  ;;  %v676_v50 = vld [vmem:[%s3817_s13 + $0x8d8] sm:$0xff] }
 0x16a   : > { %v671_v49 = vld [vmem:[%s3817_s13 + $0x8b0] sm:$0xff]  ;;  %v2820_v52 = vpack.c.bf16 %v1432_v43, %v1426_v42  ;;  %v1461_v32 = vld [vmem:[%s3826_s17 + $0x5a0] sm:$0xff] }
 0x16b   : > { %v2718_v55 = vpack.c.bf16 %v671_v49, %v667_v47  ;;  %v724_v47 = vld [vmem:[%s3817_s13 + $0xa58] sm:$0xff] }
 0x16c   : > { %2683 = vmatpush1.bf16.msra.mxu1 %v2682_v60  ;;  %v648_v60 = vld [vmem:[%s3817_s13 + $0x7f8] sm:$0xff]  ;;  %2803 = vmatpush1.bf16.msra.mxu0 %v2802_v57  ;;  %v675_v57 = vld [vmem:[%s3817_s13 + $0x8d0] sm:$0xff] }
 0x16d   : > { %2685 = vmatprep.subr.bf16.mxu1 %v2684_v63  ;;  %v643_v63 = vld [vmem:[%s3817_s13 + $0x7d0] sm:$0xff]  ;;  %v2704_v2 = vpack.c.bf16 %v648_v60, %v644_v25  ;;  %2805 = vmatprep.subr.bf16.mxu0 %v2804_v58  ;;  %v684_v25 = vld [vmem:[%s3817_s13 + $0x918] sm:$0xff]  ;;  %v2822_v58 = vpack.c.bf16 %v1431_v18, %v1425_v53 }
 0x16e   : > { %v2706_v10 = vpack.c.bf16 %v647_v0, %v643_v63  ;;  %v1443_v60 = vld [vmem:[%s3826_s17 + $0x510] sm:$0xff]  ;;  %v683_v63 = vld [vmem:[%s3817_s13 + $0x910] sm:$0xff] }
 0x16f   : > { %v687_v0 = vld [vmem:[%s3817_s13 + $0x930] sm:$0xff]  ;;  %v728_v49 = vld [vmem:[%s3817_s13 + $0xa78] sm:$0xff] }
 0x170   : > { %2687 = vmatpush1.bf16.msra.mxu1 %v2686_v7  ;;  %v656_v7 = vld [vmem:[%s3817_s13 + $0x838] sm:$0xff]  ;;  %2807 = vmatpush1.bf16.msra.mxu0 %v2806_v1  ;;  %v2826_v1 = vpack.c.bf16 %v1443_v60, %v1437_v59  ;;  %v739_v60 = vld [vmem:[%s3817_s13 + $0xad0] sm:$0xff] }
 0x171   : > { %2689 = vmatprep.subr.bf16.mxu1 %v2688_v11  ;;  %v2810_v11 = vpack.c.bf16 %v1395_v6, %v1389_v5  ;;  %v2708_v12 = vpack.c.bf16 %v656_v7, %v652_v3  ;;  %2809 = vmatprep.subr.bf16.mxu0 %v2808_v4  ;;  %v696_v3 = vld [vmem:[%s3817_s13 + $0x978] sm:$0xff]  ;;  %v2828_v4 = vpack.c.bf16 %v1456_v62, %v1450_v61  ;;  %v691_v7 = vld [vmem:[%s3817_s13 + $0x950] sm:$0xff] }
 0x172   : > { %v2726_v5 = vpack.c.bf16 %v687_v0, %v683_v63  ;;  %v732_v53 = vld [vmem:[%s3817_s13 + $0xa98] sm:$0xff]  ;;  %v743_v61 = vld [vmem:[%s3817_s13 + $0xaf0] sm:$0xff] }
 0x173   : > { %v736_v18 = vld [vmem:[%s3817_s13 + $0xab8] sm:$0xff]  ;;  %v747_v0 = vld [vmem:[%s3817_s13 + $0xb10] sm:$0xff] }
 0x174   : > { %2691 = vmatpush1.bf16.msra.mxu1 %v2690_v26  ;;  %v1407_v26 = vld [vmem:[%s3826_s17 + $0x3f0] sm:$0xff]  ;;  %2811 = vmatpush1.bf16.msra.mxu0 %v2810_v11  ;;  %v2730_v11 = vpack.c.bf16 %v695_v8, %v691_v7  ;;  %v759_v7 = vld [vmem:[%s3817_s13 + $0xb70] sm:$0xff] }
 0x175   : > { %2693 = vmatprep.subr.bf16.mxu1 %v2692_v31  ;;  %v2712_v31 = vpack.c.bf16 %v664_v21, %v660_v15  ;;  %2813 = vmatprep.subr.bf16.mxu0 %v2812_v16  ;;  %v2814_v35 = vpack.c.bf16 %v1407_v26, %v1401_v22  ;;  %v699_v15 = vld [vmem:[%s3817_s13 + $0x990] sm:$0xff]  ;;  %v708_v22 = vld [vmem:[%s3817_s13 + $0x9d8] sm:$0xff] }
 0x176   : > { %v703_v16 = vld [vmem:[%s3817_s13 + $0x9b0] sm:$0xff]  ;;  %v712_v26 = vld [vmem:[%s3817_s13 + $0x9f8] sm:$0xff] }
 0x177   : > { %v748_v62 = vld [vmem:[%s3817_s13 + $0xb18] sm:$0xff] }
 0x178   : > { %2695 = vmatpush1.bf16.msra.mxu1 %v2694_v41  ;;  %v1419_v41 = vld [vmem:[%s3826_s17 + $0x450] sm:$0xff]  ;;  %2815 = vmatpush1.bf16.msra.mxu0 %v2814_v35  ;;  %v707_v35 = vld [vmem:[%s3817_s13 + $0x9d0] sm:$0xff] }
 0x179   : > { %2697 = vmatprep.subr.bf16.mxu1 %v2696_v46  ;;  %v2716_v46 = vpack.c.bf16 %v672_v36, %v668_v34  ;;  %v2818_v51 = vpack.c.bf16 %v1419_v41, %v1413_v39  ;;  %2817 = vmatprep.subr.bf16.mxu0 %v2816_v37  ;;  %v2736_v34 = vpack.c.bf16 %v712_v26, %v708_v22  ;;  %v711_v36 = vld [vmem:[%s3817_s13 + $0x9f0] sm:$0xff]  ;;  %v716_v39 = vld [vmem:[%s3817_s13 + $0xa18] sm:$0xff] }
 0x17a   : > { %v2834_v37 = vpack.c.bf16 %v1467_v33, %v1461_v32  ;;  %v720_v41 = vld [vmem:[%s3817_s13 + $0xa38] sm:$0xff]  ;;  %v2738_v42 = vpack.c.bf16 %v711_v36, %v707_v35  ;;  %v771_v22 = vld [vmem:[%s3817_s13 + $0xbd0] sm:$0xff]  ;;  %v1289_v33 = vld [vmem:[%s3826_s17 + $0x40] sm:$0xff] }
 0x17b   : > { %v2740_v43 = vpack.c.bf16 %v720_v41, %v716_v39  ;;  %v764_v8 = vld [vmem:[%s3817_s13 + $0xb98] sm:$0xff]  ;;  %v775_v26 = vld [vmem:[%s3817_s13 + $0xbf0] sm:$0xff]  ;;  %v1301_v41 = vld [vmem:[%s3826_s17 + $0xa0] sm:$0xff] }
 0x17c   : > { %2699 = vmatpush1.bf16.msra.mxu1 %v2698_v54  ;;  %v1444_v54 = vld [vmem:[%s3826_s17 + $0x518] sm:$0xff]  ;;  %2819 = vmatpush1.bf16.msra.mxu0 %v2818_v51  ;;  %v2744_v51 = vpack.c.bf16 %v728_v49, %v724_v47  ;;  %v1283_v32 = vld [vmem:[%s3826_s17 + $0x10] sm:$0xff]  ;;  %v1302_v35 = vld [vmem:[%s3826_s17 + $0xa8] sm:$0xff] }
 0x17d   : > { %2701 = vmatprep.subr.bf16.mxu1 %v2700_v23  ;;  %v679_v23 = vld [vmem:[%s3817_s13 + $0x8f0] sm:$0xff]  ;;  %2821 = vmatprep.subr.bf16.mxu0 %v2820_v52  ;;  %v2902_v36 = vpack.c.bf16 %v1289_v33, %v1283_v32  ;;  %v1295_v39 = vld [vmem:[%s3826_s17 + $0x70] sm:$0xff]  ;;  %v1313_v49 = vld [vmem:[%s3826_s17 + $0x100] sm:$0xff] }
 0x17e   : > { %v727_v52 = vld [vmem:[%s3817_s13 + $0xa70] sm:$0xff]  ;;  %v1307_v47 = vld [vmem:[%s3826_s17 + $0xd0] sm:$0xff]  ;;  %v1416_v32 = vld [vmem:[%s3826_s17 + $0x438] sm:$0xff] }
 0x17f   : > { %v1422_v33 = vld [vmem:[%s3826_s17 + $0x468] sm:$0xff] }
 0x180   : > { %2703 = vmatpush1.bf16.msra.mxu1 %v2702_v20  ;;  %2823 = vmatpush1.bf16.msra.mxu0 %v2822_v58  ;;  %v740_v58 = vld [vmem:[%s3817_s13 + $0xad8] sm:$0xff] }
 0x181   : > { %2705 = vmatprep.subr.bf16.mxu1 %v2704_v2  ;;  %v692_v2 = vld [vmem:[%s3817_s13 + $0x958] sm:$0xff] }
 0x182   : > { %v2728_v6 = vpack.c.bf16 %v696_v3, %v692_v2  ;;  %v756_v2 = vld [vmem:[%s3817_s13 + $0xb58] sm:$0xff] }
 0x183   : > { %v760_v3 = vld [vmem:[%s3817_s13 + $0xb78] sm:$0xff] }
 0x184   : > { %2707 = vmatpush1.bf16.msra.mxu1 %v2706_v10  ;;  %v704_v10 = vld [vmem:[%s3817_s13 + $0x9b8] sm:$0xff] }
 0x185   : > { %2709 = vmatprep.subr.bf16.mxu1 %v2708_v12  ;;  %v1449_v12 = vld [vmem:[%s3826_s17 + $0x540] sm:$0xff]  ;;  %v2732_v14 = vpack.c.bf16 %v704_v10, %v700_v9  ;;  %v768_v9 = vld [vmem:[%s3817_s13 + $0xbb8] sm:$0xff] }
 0x186   : > { %v2830_v21 = vpack.c.bf16 %v1455_v13, %v1449_v12  ;;  %v763_v12 = vld [vmem:[%s3817_s13 + $0xb90] sm:$0xff] }
 0x187   : > { %1172 = vmatmul.mubr.f32.vlgmr.msra.gmra.mrb[4].mxu1 %v3985_v19  ;;  %v680_v19 = vld [vmem:[%s3817_s13 + $0x8f8] sm:$0xff]  ;;  %v767_v13 = vld [vmem:[%s3817_s13 + $0xbb0] sm:$0xff] }
 0x188   : > { %2711 = vmatpush1.bf16.msra.mxu1 %v2710_v29  ;;  %1177 = vmatprep.mubr.f32.mxu1 %v4032_v24  ;;  %v1438_v24 = vld [vmem:[%s3826_s17 + $0x4e8] sm:$0xff]  ;;  %v2720_v56 = vpack.c.bf16 %v680_v19, %v676_v50  ;;  %v2734_v29 = vpack.c.bf16 %v703_v16, %v699_v15  ;;  %v776_v15 = vld [vmem:[%s3817_s13 + $0xbf8] sm:$0xff]  ;;  %v2766_v16 = vpack.c.bf16 %v767_v13, %v763_v12  ;;  %v1392_v12 = vld [vmem:[%s3826_s17 + $0x378] sm:$0xff] }
 0x189   : > { %2713 = vmatprep.subr.bf16.mxu1 %v2712_v31  ;;  %v2824_v17 = vpack.c.bf16 %v1444_v54, %v1438_v24  ;;  %v2832_v31 = vpack.c.bf16 %v1468_v28, %v1462_v27  ;;  %v723_v19 = vld [vmem:[%s3817_s13 + $0xa50] sm:$0xff]  ;;  %v1480_v54 = vld [vmem:[%s3826_s17 + $0x638] sm:$0xff] }
 0x18a   : > { %v1474_v24 = vld [vmem:[%s3826_s17 + $0x608] sm:$0xff]  ;;  %v1284_v27 = vld [vmem:[%s3826_s17 + $0x18] sm:$0xff] }
 0x18b   : > { %1178 = vmatmul.mubr.f32.gmra.mrb[6].mxu1 %v4038_v30  ;;  %v688_v30 = vld [vmem:[%s3817_s13 + $0x938] sm:$0xff]  ;;  %2825 = vmatprep.subr.bf16.mxu0 %v2824_v17  ;;  %v1290_v28 = vld [vmem:[%s3826_s17 + $0x48] sm:$0xff] }
 0x18c   : > { %2715 = vmatpush1.bf16.msra.mxu1 %v2714_v45  ;;  %1248 = vmatprep.mubr.f32.mxu1 %v4049_v38  ;;  %v2722_v38 = vpack.c.bf16 %v679_v23, %v675_v57  ;;  %v2724_v20 = vpack.c.bf16 %v688_v30, %v684_v25  ;;  %v715_v45 = vld [vmem:[%s3817_s13 + $0xa10] sm:$0xff]  ;;  %v2748_v57 = vpack.c.bf16 %v736_v18, %v732_v53  ;;  %v744_v30 = vld [vmem:[%s3817_s13 + $0xaf8] sm:$0xff]  ;;  %v1332_v53 = vld [vmem:[%s3826_s17 + $0x198] sm:$0xff] }
 0x18d   : > { %2717 = vmatprep.subr.bf16.mxu1 %v2716_v46  ;;  %2827 = vmatpush1.bf16.msra.mxu0 %v2826_v1  ;;  %v719_v46 = vld [vmem:[%s3817_s13 + $0xa30] sm:$0xff]  ;;  %v2752_v59 = vpack.c.bf16 %v744_v30, %v740_v58  ;;  %v1343_v58 = vld [vmem:[%s3826_s17 + $0x1f0] sm:$0xff]  ;;  %v1349_v30 = vld [vmem:[%s3826_s17 + $0x220] sm:$0xff] }
 0x18e   : > { %2829 = vmatprep.subr.bf16.mxu0 %v2828_v4  ;;  %v2742_v50 = vpack.c.bf16 %v719_v46, %v715_v45  ;;  %v731_v23 = vld [vmem:[%s3817_s13 + $0xa90] sm:$0xff]  ;;  %v2906_v45 = vpack.c.bf16 %v1301_v41, %v1295_v39  ;;  %v1428_v39 = vld [vmem:[%s3826_s17 + $0x498] sm:$0xff] }
 0x18f   : > { %v735_v25 = vld [vmem:[%s3817_s13 + $0xab0] sm:$0xff] }
 0x190   : > { %2719 = vmatpush1.bf16.msra.mxu1 %v2718_v55  ;;  %v2836_v55 = vpack.c.bf16 %v1480_v54, %v1474_v24  ;;  %v2750_v17 = vpack.c.bf16 %v735_v25, %v731_v23  ;;  %v751_v1 = vld [vmem:[%s3817_s13 + $0xb30] sm:$0xff] }
 0x191   : > { %2721 = vmatprep.subr.bf16.mxu1 %v2720_v56  ;;  %2831 = vmatpush1.bf16.msra.mxu0 %v2830_v21  ;;  %v2746_v56 = vpack.c.bf16 %v727_v52, %v723_v19  ;;  %v2758_v4 = vpack.c.bf16 %v751_v1, %v747_v0  ;;  %v1319_v19 = vld [vmem:[%s3826_s17 + $0x130] sm:$0xff]  ;;  %v1325_v52 = vld [vmem:[%s3826_s17 + $0x160] sm:$0xff]  ;;  %v1338_v18 = vld [vmem:[%s3826_s17 + $0x1c8] sm:$0xff] }
 0x192   : > { %2833 = vmatprep.subr.bf16.mxu0 %v2832_v31  ;;  %v2900_v31 = vpack.c.bf16 %v1290_v28, %v1284_v27  ;;  %v2914_v24 = vpack.c.bf16 %v1325_v52, %v1319_v19  ;;  %v2916_v54 = vpack.c.bf16 %v1338_v18, %v1332_v53  ;;  %v1374_v0 = vld [vmem:[%s3826_s17 + $0x2e8] sm:$0xff]  ;;  %v1439_v19 = vld [vmem:[%s3826_s17 + $0x4f0] sm:$0xff]  ;;  %v1445_v52 = vld [vmem:[%s3826_s17 + $0x520] sm:$0xff] }
 0x193   : > { %v1398_v13 = vld [vmem:[%s3826_s17 + $0x3a8] sm:$0xff]  ;;  %v1452_v53 = vld [vmem:[%s3826_s17 + $0x558] sm:$0xff] }
 0x194   : > { %2723 = vmatpush1.bf16.msra.mxu1 %v2722_v38  ;;  %v752_v38 = vld [vmem:[%s3817_s13 + $0xb38] sm:$0xff]  ;;  %v1434_v41 = vld [vmem:[%s3826_s17 + $0x4c8] sm:$0xff] }
 0x195   : > { %2725 = vmatprep.subr.bf16.mxu1 %v2724_v20  ;;  %2835 = vmatpush1.bf16.msra.mxu0 %v2834_v37  ;;  %v2754_v20 = vpack.c.bf16 %v743_v61, %v739_v60  ;;  %v2756_v63 = vpack.c.bf16 %v752_v38, %v748_v62  ;;  %v2922_v60 = vpack.c.bf16 %v1349_v30, %v1343_v58  ;;  %v1355_v62 = vld [vmem:[%s3826_s17 + $0x250] sm:$0xff]  ;;  %v1361_v38 = vld [vmem:[%s3826_s17 + $0x280] sm:$0xff]  ;;  %v1458_v18 = vld [vmem:[%s3826_s17 + $0x588] sm:$0xff] }
 0x196   : > { %2837 = vmatprep.subr.bf16.mxu0 %v2836_v55  ;;  %v1331_v55 = vld [vmem:[%s3826_s17 + $0x190] sm:$0xff]  ;;  %v1469_v30 = vld [vmem:[%s3826_s17 + $0x5e0] sm:$0xff] }
 0x197   : > { %v1463_v58 = vld [vmem:[%s3826_s17 + $0x5b0] sm:$0xff] }
 0x198   : > { %2727 = vmatpush1.bf16.msra.mxu1 %v2726_v5  ;;  %v2760_v5 = vpack.c.bf16 %v760_v3, %v756_v2  ;;  %v2926_v2 = vpack.c.bf16 %v1361_v38, %v1355_v62  ;;  %v779_v62 = vlaneseq }
 0x199   : > { %2729 = vmatprep.subr.bf16.mxu1 %v2728_v6  ;;  %v755_v6 = vld [vmem:[%s3817_s13 + $0xb50] sm:$0xff] }
 0x19a   : > { %v2762_v10 = vpack.c.bf16 %v759_v7, %v755_v6  ;;  %v1380_v6 = vld [vmem:[%s3826_s17 + $0x318] sm:$0xff]  ;;  %v1386_v7 = vld [vmem:[%s3826_s17 + $0x348] sm:$0xff]  ;;  %v4405_v38 = vshrl.u32 %v779_v62, 7 }
 0x19b   : > { %v1528_v62 = vld [vmem:[%s3826_s17 + $0x7b8] sm:$0xff] }
 0x19c   : > { %2731 = vmatpush1.bf16.msra.mxu1 %v2730_v11  ;;  %v2764_v11 = vpack.c.bf16 %v768_v9, %v764_v8  ;;  %v2932_v9 = vpack.c.bf16 %v1386_v7, %v1380_v6 }
 0x19d   : > { %2733 = vmatprep.subr.bf16.mxu1 %v2732_v14  ;;  %v772_v14 = vld [vmem:[%s3817_s13 + $0xbd8] sm:$0xff] }
 0x19e   : > { %v2768_v21 = vpack.c.bf16 %v776_v15, %v772_v14  ;;  %v2936_v15 = vpack.c.bf16 %v1398_v13, %v1392_v12  ;;  %v1475_v12 = vld [vmem:[%s3826_s17 + $0x610] sm:$0xff]  ;;  %v1481_v13 = vld [vmem:[%s3826_s17 + $0x640] sm:$0xff] }
 0x1a0   : > { %2735 = vmatpush1.bf16.msra.mxu1 %v2734_v29  ;;  %v2770_v29 = vpack.c.bf16 %v775_v26, %v771_v22  ;;  %v1404_v22 = vld [vmem:[%s3826_s17 + $0x3d8] sm:$0xff]  ;;  %v1410_v26 = vld [vmem:[%s3826_s17 + $0x408] sm:$0xff] }
 0x1a1   : > { %2737 = vmatprep.subr.bf16.mxu1 %v2736_v34  ;;  %v1296_v34 = vld [vmem:[%s3826_s17 + $0x78] sm:$0xff]  ;;  %v2940_v28 = vpack.c.bf16 %v1410_v26, %v1404_v22  ;;  %v1494_v22 = vld [vmem:[%s3826_s17 + $0x6a8] sm:$0xff] }
 0x1a2   : > { %v2904_v37 = vpack.c.bf16 %v1302_v35, %v1296_v34  ;;  %v2944_v35 = vpack.c.bf16 %v1422_v33, %v1416_v32  ;;  %v1491_v32 = vld [vmem:[%s3826_s17 + $0x690] sm:$0xff] }
 0x1a4   : > { %2739 = vmatpush1.bf16.msra.mxu1 %v2738_v42  ;;  %v1308_v42 = vld [vmem:[%s3826_s17 + $0xd8] sm:$0xff] }
 0x1a5   : > { %2741 = vmatprep.subr.bf16.mxu1 %v2740_v43  ;;  %v1314_v43 = vld [vmem:[%s3826_s17 + $0x108] sm:$0xff] }
 0x1a6   : > { %v2908_v46 = vpack.c.bf16 %v1314_v43, %v1308_v42 }
 0x1a8   : > { %2743 = vmatpush1.bf16.msra.mxu1 %v2742_v50  ;;  %v1320_v50 = vld [vmem:[%s3826_s17 + $0x138] sm:$0xff] }
 0x1a9   : > { %2745 = vmatprep.subr.bf16.mxu1 %v2744_v51  ;;  %v1326_v51 = vld [vmem:[%s3826_s17 + $0x168] sm:$0xff] }
 0x1ac   : > { %2747 = vmatpush1.bf16.msra.mxu1 %v2746_v56  ;;  %v1344_v56 = vld [vmem:[%s3826_s17 + $0x1f8] sm:$0xff] }
 0x1ad   : > { %2749 = vmatprep.subr.bf16.mxu1 %v2748_v57  ;;  %v1350_v57 = vld [vmem:[%s3826_s17 + $0x228] sm:$0xff] }
 0x1ae   : > { %v2920_v25 = vpack.c.bf16 %v1350_v57, %v1344_v56  ;;  %v1464_v56 = vld [vmem:[%s3826_s17 + $0x5b8] sm:$0xff]  ;;  %v1470_v57 = vld [vmem:[%s3826_s17 + $0x5e8] sm:$0xff] }
 0x1b0   : > { %2751 = vmatpush1.bf16.msra.mxu1 %v2750_v17  ;;  %v1356_v17 = vld [vmem:[%s3826_s17 + $0x258] sm:$0xff] }
 0x1b1   : > { %2753 = vmatprep.subr.bf16.mxu1 %v2752_v59  ;;  %v1362_v59 = vld [vmem:[%s3826_s17 + $0x288] sm:$0xff] }
 0x1b2   : > { %v2924_v61 = vpack.c.bf16 %v1362_v59, %v1356_v17  ;;  %v1476_v17 = vld [vmem:[%s3826_s17 + $0x618] sm:$0xff]  ;;  %v1482_v59 = vld [vmem:[%s3826_s17 + $0x648] sm:$0xff] }
 0x1b4   : > { %2755 = vmatpush1.bf16.msra.mxu1 %v2754_v20 }
 0x1b5   : > { %2757 = vmatprep.subr.bf16.mxu1 %v2756_v63  ;;  %v1368_v63 = vld [vmem:[%s3826_s17 + $0x2b8] sm:$0xff] }
 0x1b6   : > { %v2928_v3 = vpack.c.bf16 %v1374_v0, %v1368_v63  ;;  %v781_v63 = vsub.s32 0, %v4405_v38  ;;  %v4410_v0 = vld [vmem:[%s315_s1] sm:$0xf] }
 0x1b8   : > { %2759 = vmatpush1.bf16.msra.mxu1 %v2758_v4  ;;  %v1367_v4 = vld [vmem:[%s3826_s17 + $0x2b0] sm:$0xff] }
 0x1b9   : > { %2761 = vmatprep.subr.bf16.mxu1 %v2760_v5  ;;  %v1373_v5 = vld [vmem:[%s3826_s17 + $0x2e0] sm:$0xff] }
 0x1ba   : > { %v2930_v8 = vpack.c.bf16 %v1373_v5, %v1367_v4 }
 0x1bc   : > { %2763 = vmatpush1.bf16.msra.mxu1 %v2762_v10  ;;  %v1379_v10 = vld [vmem:[%s3826_s17 + $0x310] sm:$0xff] }
 0x1bd   : > { %2765 = vmatprep.subr.bf16.mxu1 %v2764_v11  ;;  %v1385_v11 = vld [vmem:[%s3826_s17 + $0x340] sm:$0xff] }
 0x1be   : > { %v2934_v14 = vpack.c.bf16 %v1385_v11, %v1379_v10 }
 0x1c0   : > { %2767 = vmatpush1.bf16.msra.mxu1 %v2766_v16  ;;  %v1391_v16 = vld [vmem:[%s3826_s17 + $0x370] sm:$0xff] }
 0x1c1   : > { %2769 = vmatprep.subr.bf16.mxu1 %v2768_v21  ;;  %v1397_v21 = vld [vmem:[%s3826_s17 + $0x3a0] sm:$0xff] }
 0x1c2   : > { %v2938_v27 = vpack.c.bf16 %v1397_v21, %v1391_v16  ;;  %v1492_v16 = vld [vmem:[%s3826_s17 + $0x698] sm:$0xff] }
 0x1c3   : > { %v1488_v21 = vld [vmem:[%s3826_s17 + $0x678] sm:$0xff] }
 0x1c4   : > { %2771 = vmatpush1.bf16.msra.mxu1 %v2770_v29  ;;  %v1403_v29 = vld [vmem:[%s3826_s17 + $0x3d0] sm:$0xff] }
 0x1c5   : > { %2901 = vmatprep.subr.bf16.mxu1 %v2900_v31  ;;  %v1409_v31 = vld [vmem:[%s3826_s17 + $0x400] sm:$0xff] }
 0x1c6   : > { %v2942_v34 = vpack.c.bf16 %v1409_v31, %v1403_v29  ;;  %v2966_v29 = vpack.c.bf16 %v1481_v13, %v1475_v12  ;;  %v1485_v31 = vld [vmem:[%s3826_s17 + $0x660] sm:$0xff]  ;;  %v1534_v13 = vld [vmem:[%s3826_s17 + $0x7e8] sm:$0xff] }
 0x1c7   : > { %1249 = vmatmul.mubr.f32.vlgmr.msra.gmra.mrb[4].mxu1 %v4127_v40  ;;  %v2910_v40 = vpack.c.bf16 %v1313_v49, %v1307_v47  ;;  %v1427_v47 = vld [vmem:[%s3826_s17 + $0x490] sm:$0xff]  ;;  %v1433_v49 = vld [vmem:[%s3826_s17 + $0x4c0] sm:$0xff] }
 0x1c8   : > { %1254 = vmatprep.mubr.f32.mxu1 %v4131_v44  ;;  %2903 = vmatpush1.bf16.msra.mxu1 %v2902_v36  ;;  %v2912_v44 = vpack.c.bf16 %v1326_v51, %v1320_v50  ;;  %v1415_v36 = vld [vmem:[%s3826_s17 + $0x430] sm:$0xff]  ;;  %v1440_v50 = vld [vmem:[%s3826_s17 + $0x4f8] sm:$0xff]  ;;  %v1446_v51 = vld [vmem:[%s3826_s17 + $0x528] sm:$0xff] }
 0x1c9   : > { %2905 = vmatprep.subr.bf16.mxu1 %v2904_v37  ;;  %v1421_v37 = vld [vmem:[%s3826_s17 + $0x460] sm:$0xff] }
 0x1ca   : > { %v1529_v12 = vld [vmem:[%s3826_s17 + $0x7c0] sm:$0xff] }
 0x1cb   : > { %1255 = vmatmul.mubr.f32.gmra.mrb[6].mxu1 %v4138_v48  ;;  %v1337_v48 = vld [vmem:[%s3826_s17 + $0x1c0] sm:$0xff] }
 0x1cc   : > { %2907 = vmatpush1.bf16.msra.mxu1 %v2906_v45  ;;  %v2918_v23 = vpack.c.bf16 %v1337_v48, %v1331_v55  ;;  %v2946_v45 = vpack.c.bf16 %v1421_v37, %v1415_v36  ;;  %v1451_v55 = vld [vmem:[%s3826_s17 + $0x550] sm:$0xff]  ;;  %v1457_v48 = vld [vmem:[%s3826_s17 + $0x580] sm:$0xff]  ;;  %v2968_v37 = vpack.c.bf16 %v1494_v22, %v1488_v21 }
 0x1cd   : > { %2909 = vmatprep.subr.bf16.mxu1 %v2908_v46  ;;  %v2948_v46 = vpack.c.bf16 %v1434_v41, %v1428_v39  ;;  %v1487_v39 = vld [vmem:[%s3826_s17 + $0x670] sm:$0xff]  ;;  %v1493_v41 = vld [vmem:[%s3826_s17 + $0x6a0] sm:$0xff] }
 0x1d0   : > { %2911 = vmatpush1.bf16.msra.mxu1 %v2910_v40  ;;  %v2950_v40 = vpack.c.bf16 %v1433_v49, %v1427_v47  ;;  %v1506_v47 = vld [vmem:[%s3826_s17 + $0x708] sm:$0xff] }
 0x1d1   : > { %2913 = vmatprep.subr.bf16.mxu1 %v2912_v44  ;;  %v2952_v44 = vpack.c.bf16 %v1446_v51, %v1440_v50  ;;  %v2842_v50 = vpack.c.bf16 %v1491_v32, %v1485_v31  ;;  %v2970_v51 = vpack.c.bf16 %v1493_v41, %v1487_v39  ;;  %v1541_v31 = vld [vmem:[%s3826_s17 + $0x820] sm:$0xff]  ;;  %v1546_v32 = vld [vmem:[%s3826_s17 + $0x848] sm:$0xff] }
 0x1d2   : > { %v1545_v41 = vld [vmem:[%s3826_s17 + $0x840] sm:$0xff] }
 0x1d4   : > { %2915 = vmatpush1.bf16.msra.mxu1 %v2914_v24  ;;  %v2954_v24 = vpack.c.bf16 %v1445_v52, %v1439_v19 }
 0x1d5   : > { %2917 = vmatprep.subr.bf16.mxu1 %v2916_v54  ;;  %v2956_v54 = vpack.c.bf16 %v1458_v18, %v1452_v53  ;;  %v1499_v18 = vld [vmem:[%s3826_s17 + $0x6d0] sm:$0xff] }
 0x1d8   : > { %2919 = vmatpush1.bf16.msra.mxu1 %v2918_v23  ;;  %v2958_v23 = vpack.c.bf16 %v1457_v48, %v1451_v55  ;;  %v1516_v55 = vld [vmem:[%s3826_s17 + $0x758] sm:$0xff] }
 0x1d9   : > { %2921 = vmatprep.subr.bf16.mxu1 %v2920_v25  ;;  %v2960_v25 = vpack.c.bf16 %v1470_v57, %v1464_v56  ;;  %v1512_v48 = vld [vmem:[%s3826_s17 + $0x738] sm:$0xff]  ;;  %v1518_v56 = vld [vmem:[%s3826_s17 + $0x768] sm:$0xff] }
 0x1da   : > { %v4363_v20 = vpop.f32.mrb[0].mxu1 }
 0x1db   : > { %v4367_v1 = vpop.f32.mrb[1].mxu1 }
 0x1dc   : > { %2923 = vmatpush1.bf16.msra.mxu1 %v2922_v60  ;;  %v2962_v60 = vpack.c.bf16 %v1469_v30, %v1463_v58  ;;  %v1515_v58 = vld [vmem:[%s3826_s17 + $0x750] sm:$0xff] }
 0x1dd   : > { %2925 = vmatprep.subr.bf16.mxu1 %v2924_v61  ;;  %v2964_v61 = vpack.c.bf16 %v1482_v59, %v1476_v17  ;;  %v2976_v17 = vpack.c.bf16 %v1518_v56, %v1512_v48  ;;  %v1511_v59 = vld [vmem:[%s3826_s17 + $0x730] sm:$0xff]  ;;  %v1565_v56 = vld [vmem:[%s3826_s17 + $0x8e0] sm:$0xff] }
 0x1de   : > { %v1559_v48 = vld [vmem:[%s3826_s17 + $0x8b0] sm:$0xff] }
 0x1e0   : > { %2927 = vmatpush1.bf16.msra.mxu1 %v2926_v2  ;;  %v871_v42 = vpop.f32.mrb[2].mxu1  ;;  %v785_v2 = vsub.s32 1, %v4405_v38 }
 0x1e1   : > { %2929 = vmatprep.subr.bf16.mxu1 %v2928_v3  ;;  %v873_v43 = vpop.f32.mrb[3].mxu1  ;;  %v782_v3 = vrot.slane %v4410_v0, %v781_v63 }
 0x1e2   : > { %v786_v4 = vrot.slane %v4410_v0, %v785_v2 }
 0x1e3   : > { %v866_v5 = vadd.f32 %v4363_v20, %v782_v3  ;;  %v872_v20 = vadd.f32 %v871_v42, %v782_v3  ;;  %v1498_v42 = vld [vmem:[%s3826_s17 + $0x6c8] sm:$0xff]  ;;  %v1524_v3 = vld [vmem:[%s3826_s17 + $0x798] sm:$0xff] }
 0x1e4   : > { %2931 = vmatpush1.bf16.msra.mxu1 %v2930_v8  ;;  %v868_v6 = vadd.f32 %v4367_v1, %v786_v4  ;;  %v1473_v8 = vld [vmem:[%s3826_s17 + $0x600] sm:$0xff]  ;;  %v874_v26 = vadd.f32 %v873_v43, %v786_v4  ;;  %v1530_v4 = vld [vmem:[%s3826_s17 + $0x7c8] sm:$0xff] }
 0x1e5   : > { %2933 = vmatprep.subr.bf16.mxu1 %v2932_v9  ;;  %v1479_v9 = vld [vmem:[%s3826_s17 + $0x630] sm:$0xff] }
 0x1e8   : > { %2935 = vmatpush1.bf16.msra.mxu1 %v2934_v14  ;;  %v1486_v14 = vld [vmem:[%s3826_s17 + $0x668] sm:$0xff] }
 0x1e9   : > { %2937 = vmatprep.subr.bf16.mxu1 %v2936_v15  ;;  %v2840_v36 = vpack.c.bf16 %v1492_v16, %v1486_v14  ;;  %v1540_v14 = vld [vmem:[%s3826_s17 + $0x818] sm:$0xff]  ;;  %v1542_v16 = vld [vmem:[%s3826_s17 + $0x828] sm:$0xff] }
 0x1ec   : > { %2939 = vmatpush1.bf16.msra.mxu1 %v2938_v27 }
 0x1ed   : > { %2941 = vmatprep.subr.bf16.mxu1 %v2940_v28  ;;  %v2838_v28 = vpack.c.bf16 %v1479_v9, %v1473_v8  ;;  %v1527_v8 = vld [vmem:[%s3826_s17 + $0x7b0] sm:$0xff] }
 0x1f0   : > { %2943 = vmatpush1.bf16.msra.mxu1 %v2942_v34 }
 0x1f1   : > { %2945 = vmatprep.subr.bf16.mxu1 %v2944_v35 }
 0x1f4   : > { %2947 = vmatpush1.bf16.msra.mxu1 %v2946_v45  ;;  %v1504_v45 = vld [vmem:[%s3826_s17 + $0x6f8] sm:$0xff] }
 0x1f5   : > { %2949 = vmatprep.subr.bf16.mxu1 %v2948_v46  ;;  %v1500_v46 = vld [vmem:[%s3826_s17 + $0x6d8] sm:$0xff]  ;;  %v2844_v52 = vpack.c.bf16 %v1504_v45, %v1498_v42  ;;  %v1551_v42 = vld [vmem:[%s3826_s17 + $0x870] sm:$0xff] }
 0x1f6   : > { %v2972_v53 = vpack.c.bf16 %v1506_v47, %v1500_v46  ;;  %v1547_v46 = vld [vmem:[%s3826_s17 + $0x850] sm:$0xff]  ;;  %v1553_v47 = vld [vmem:[%s3826_s17 + $0x880] sm:$0xff] }
 0x1f8   : > { %2951 = vmatpush1.bf16.msra.mxu1 %v2950_v40  ;;  %v1497_v40 = vld [vmem:[%s3826_s17 + $0x6c0] sm:$0xff] }
 0x1f9   : > { %2953 = vmatprep.subr.bf16.mxu1 %v2952_v44  ;;  %v1503_v44 = vld [vmem:[%s3826_s17 + $0x6f0] sm:$0xff] }
 0x1fa   : > { %v2846_v57 = vpack.c.bf16 %v1503_v44, %v1497_v40  ;;  %v1560_v40 = vld [vmem:[%s3826_s17 + $0x8b8] sm:$0xff]  ;;  %v1566_v44 = vld [vmem:[%s3826_s17 + $0x8e8] sm:$0xff] }
 0x1fc   : > { %2955 = vmatpush1.bf16.msra.mxu1 %v2954_v24  ;;  %v1505_v24 = vld [vmem:[%s3826_s17 + $0x700] sm:$0xff] }
 0x1fd   : > { %2957 = vmatprep.subr.bf16.mxu1 %v2956_v54  ;;  %v1510_v54 = vld [vmem:[%s3826_s17 + $0x728] sm:$0xff] }
 0x1fe   : > { %v2848_v30 = vpack.c.bf16 %v1516_v55, %v1510_v54  ;;  %v2992_v55 = vpack.c.bf16 %v1566_v44, %v1560_v40  ;;  %v1607_v40 = vld [vmem:[%s3826_s17 + $0xa30] sm:$0xff]  ;;  %v1613_v44 = vld [vmem:[%s3826_s17 + $0xa60] sm:$0xff] }
 0x200   : > { %2959 = vmatpush1.bf16.msra.mxu1 %v2958_v23  ;;  %v2974_v23 = vpack.c.bf16 %v1505_v24, %v1499_v18  ;;  %v1557_v18 = vld [vmem:[%s3826_s17 + $0x8a0] sm:$0xff]  ;;  %v1563_v24 = vld [vmem:[%s3826_s17 + $0x8d0] sm:$0xff] }
 0x201   : > { %2961 = vmatprep.subr.bf16.mxu1 %v2960_v25  ;;  %v1509_v25 = vld [vmem:[%s3826_s17 + $0x720] sm:$0xff] }
 0x204   : > { %2963 = vmatpush1.bf16.msra.mxu1 %v2962_v60  ;;  %v1517_v60 = vld [vmem:[%s3826_s17 + $0x760] sm:$0xff] }
 0x205   : > { %2965 = vmatprep.subr.bf16.mxu1 %v2964_v61  ;;  %v1522_v61 = vld [vmem:[%s3826_s17 + $0x788] sm:$0xff] }
 0x206   : > { %v2852_v9 = vpack.c.bf16 %v1528_v62, %v1522_v61 }
 0x21c   : > { %v1019_v7 = vpop.f32.mrb[0].mxu0 }
 0x21d   : > { %v3157_v10 = vadd.f32 %v1019_v7, %v866_v5  ;;  %v1021_v11 = vpop.f32.mrb[1].mxu0  ;;  %v2850_v5 = vpack.c.bf16 %v1515_v58, %v1509_v25  ;;  %v1521_v7 = vld [vmem:[%s3826_s17 + $0x780] sm:$0xff]  ;;  %v1572_v25 = vld [vmem:[%s3826_s17 + $0x918] sm:$0xff]  ;;  %v1578_v58 = vld [vmem:[%s3826_s17 + $0x948] sm:$0xff] }
 0x21e   : > { %v3159_v15 = vadd.f32 %v1021_v11, %v868_v6  ;;  %v2978_v6 = vpack.c.bf16 %v1517_v60, %v1511_v59  ;;  %v1523_v11 = vld [vmem:[%s3826_s17 + $0x790] sm:$0xff]  ;;  %v2854_v21 = vpack.c.bf16 %v1527_v8, %v1521_v7  ;;  %v1569_v59 = vld [vmem:[%s3826_s17 + $0x900] sm:$0xff]  ;;  %v2996_v62 = vpack.c.bf16 %v1578_v58, %v1572_v25  ;;  %v1584_v7 = vld [vmem:[%s3826_s17 + $0x978] sm:$0xff] }
 0x21f   : > { %v4433_v33 = vmax.f32 %v3157_v10, 0.0  ;;  %v2980_v10 = vpack.c.bf16 %v1530_v4, %v1524_v3  ;;  %v2982_v22 = vpack.c.bf16 %v1529_v12, %v1523_v11  ;;  %v1575_v60 = vld [vmem:[%s3826_s17 + $0x930] sm:$0xff]  ;;  %v1577_v4 = vld [vmem:[%s3826_s17 + $0x940] sm:$0xff]  ;;  %v1590_v8 = vld [vmem:[%s3826_s17 + $0x9a8] sm:$0xff] }
 0x220   : > { %v4429_v1 = vmax.f32 %v3159_v15, 0.0  ;;  %v1025_v27 = vpop.f32.mrb[2].mxu0  ;;  %v1536_v15 = vld [vmem:[%s3826_s17 + $0x7f8] sm:$0xff]  ;;  %v1571_v3 = vld [vmem:[%s3826_s17 + $0x910] sm:$0xff]  ;;  %v1581_v11 = vld [vmem:[%s3826_s17 + $0x960] sm:$0xff] }
 0x221   : > { %v3161_v34 = vadd.f32 %v1025_v27, %v872_v20  ;;  %v1027_v35 = vpop.f32.mrb[3].mxu0  ;;  %v1533_v20 = vld [vmem:[%s3826_s17 + $0x7e0] sm:$0xff]  ;;  %v2856_v27 = vpack.c.bf16 %v1540_v14, %v1534_v13  ;;  %v1587_v12 = vld [vmem:[%s3826_s17 + $0x990] sm:$0xff]  ;;  %v3000_v14 = vpack.c.bf16 %v1590_v8, %v1584_v7 }
 0x222   : > { %v3163_v43 = vadd.f32 %v1027_v35, %v874_v26  ;;  %1729 = vmatprep.mubr.f32.mxu0 %v4429_v1  ;;  %1883 = vmatprep.mubr.f32.mxu1 %v4429_v1  ;;  %v1539_v26 = vld [vmem:[%s3826_s17 + $0x810] sm:$0xff]  ;;  %v1548_v35 = vld [vmem:[%s3826_s17 + $0x858] sm:$0xff]  ;;  %v1625_v58 = vld [vmem:[%s3826_s17 + $0xac0] sm:$0xff] }
 0x223   : > { %1730 = vmatmul.mubr.f32.vlgmr.msra.gmra.mrb[4].mxu0 %v4433_v33  ;;  %1884 = vmatmul.mubr.f32.vlgmr.msra.gmra.mrb[8].mxu1 %v4433_v33  ;;  %v4449_v19 = vmax.f32 %v3161_v34, 0.0  ;;  %v1552_v34 = vld [vmem:[%s3826_s17 + $0x878] sm:$0xff]  ;;  %v1619_v25 = vld [vmem:[%s3826_s17 + $0xa90] sm:$0xff]  ;;  %v1637_v8 = vld [vmem:[%s3826_s17 + $0xb20] sm:$0xff] }
 0x224   : > { %v4445_v49 = vmax.f32 %v3163_v43, 0.0  ;;  %2839 = vmatpush1.bf16.msra.mxu0 %v2838_v28  ;;  %2967 = vmatpush1.bf16.msra.mxu1 %v2966_v29  ;;  %v2984_v28 = vpack.c.bf16 %v1542_v16, %v1536_v15  ;;  %v1535_v29 = vld [vmem:[%s3826_s17 + $0x7f0] sm:$0xff]  ;;  %v2860_v43 = vpack.c.bf16 %v1552_v34, %v1546_v32  ;;  %v1589_v16 = vld [vmem:[%s3826_s17 + $0x9a0] sm:$0xff] }
 0x225   : > { %2841 = vmatprep.subr.bf16.mxu0 %v2840_v36  ;;  %2969 = vmatprep.subr.bf16.mxu1 %v2968_v37  ;;  %v1554_v36 = vld [vmem:[%s3826_s17 + $0x888] sm:$0xff]  ;;  %v2858_v37 = vpack.c.bf16 %v1539_v26, %v1533_v20  ;;  %v2986_v39 = vpack.c.bf16 %v1541_v31, %v1535_v29  ;;  %v1583_v15 = vld [vmem:[%s3826_s17 + $0x970] sm:$0xff]  ;;  %v1596_v20 = vld [vmem:[%s3826_s17 + $0x9d8] sm:$0xff] }
 0x226   : > { %1735 = vmatprep.mubr.f32.mxu0 %v4445_v49  ;;  %1889 = vmatprep.mubr.f32.mxu1 %v4445_v49  ;;  %v2988_v45 = vpack.c.bf16 %v1554_v36, %v1548_v35  ;;  %v1602_v26 = vld [vmem:[%s3826_s17 + $0xa08] sm:$0xff]  ;;  %v1593_v29 = vld [vmem:[%s3826_s17 + $0x9c0] sm:$0xff]  ;;  %v1599_v31 = vld [vmem:[%s3826_s17 + $0x9f0] sm:$0xff] }
 0x227   : > { %1736 = vmatmul.mubr.f32.gmra.mrb[6].mxu0 %v4449_v19  ;;  %1890 = vmatmul.mubr.f32.gmra.mrb[10].mxu1 %v4449_v19  ;;  %v3004_v34 = vpack.c.bf16 %v1602_v26, %v1596_v20  ;;  %v1595_v35 = vld [vmem:[%s3826_s17 + $0x9d0] sm:$0xff]  ;;  %v1601_v36 = vld [vmem:[%s3826_s17 + $0xa00] sm:$0xff] }
 0x228   : > { %2843 = vmatpush1.bf16.msra.mxu0 %v2842_v50  ;;  %2971 = vmatpush1.bf16.msra.mxu1 %v2970_v51  ;;  %v1558_v50 = vld [vmem:[%s3826_s17 + $0x8a8] sm:$0xff]  ;;  %v1564_v51 = vld [vmem:[%s3826_s17 + $0x8d8] sm:$0xff]  ;;  %v1631_v7 = vld [vmem:[%s3826_s17 + $0xaf0] sm:$0xff] }
 0x229   : > { %2845 = vmatprep.subr.bf16.mxu0 %v2844_v52  ;;  %2973 = vmatprep.subr.bf16.mxu1 %v2972_v53  ;;  %v2862_v52 = vpack.c.bf16 %v1551_v42, %v1545_v41  ;;  %v2990_v53 = vpack.c.bf16 %v1553_v47, %v1547_v46  ;;  %v2864_v54 = vpack.c.bf16 %v1564_v51, %v1558_v50  ;;  %v1608_v41 = vld [vmem:[%s3826_s17 + $0xa38] sm:$0xff]  ;;  %v1614_v42 = vld [vmem:[%s3826_s17 + $0xa68] sm:$0xff]  ;;  %v1605_v46 = vld [vmem:[%s3826_s17 + $0xa20] sm:$0xff] }
 0x22a   : > { %v1611_v47 = vld [vmem:[%s3826_s17 + $0xa50] sm:$0xff]  ;;  %v3008_v51 = vpack.c.bf16 %v1614_v42, %v1608_v41  ;;  %v1649_v26 = vld [vmem:[%s3826_s17 + $0xb80] sm:$0xff] }
 0x22b   : > { %v1643_v20 = vld [vmem:[%s3826_s17 + $0xb50] sm:$0xff]  ;;  %v1661_v42 = vld [vmem:[%s3826_s17 + $0xbe0] sm:$0xff] }
 0x22c   : > { %2847 = vmatpush1.bf16.msra.mxu0 %v2846_v57  ;;  %2975 = vmatpush1.bf16.msra.mxu1 %v2974_v23  ;;  %v1570_v57 = vld [vmem:[%s3826_s17 + $0x908] sm:$0xff]  ;;  %v1576_v23 = vld [vmem:[%s3826_s17 + $0x938] sm:$0xff]  ;;  %v1655_v41 = vld [vmem:[%s3826_s17 + $0xbb0] sm:$0xff] }
 0x22d   : > { %2849 = vmatprep.subr.bf16.mxu0 %v2848_v30  ;;  %2977 = vmatprep.subr.bf16.mxu1 %v2976_v17  ;;  %v2866_v30 = vpack.c.bf16 %v1563_v24, %v1557_v18  ;;  %v2994_v17 = vpack.c.bf16 %v1565_v56, %v1559_v48  ;;  %v2868_v61 = vpack.c.bf16 %v1576_v23, %v1570_v57  ;;  %v1620_v18 = vld [vmem:[%s3826_s17 + $0xa98] sm:$0xff]  ;;  %v1626_v24 = vld [vmem:[%s3826_s17 + $0xac8] sm:$0xff]  ;;  %v1617_v48 = vld [vmem:[%s3826_s17 + $0xa80] sm:$0xff] }
 0x22e   : > { %v1623_v56 = vld [vmem:[%s3826_s17 + $0xab0] sm:$0xff]  ;;  %v3012_v23 = vpack.c.bf16 %v1626_v24, %v1620_v18 }
 0x230   : > { %2851 = vmatpush1.bf16.msra.mxu0 %v2850_v5  ;;  %2979 = vmatpush1.bf16.msra.mxu1 %v2978_v6  ;;  %v1582_v5 = vld [vmem:[%s3826_s17 + $0x968] sm:$0xff]  ;;  %v1588_v6 = vld [vmem:[%s3826_s17 + $0x998] sm:$0xff] }
 0x231   : > { %2853 = vmatprep.subr.bf16.mxu0 %v2852_v9  ;;  %2981 = vmatprep.subr.bf16.mxu1 %v2980_v10  ;;  %v2870_v9 = vpack.c.bf16 %v1575_v60, %v1569_v59  ;;  %v2998_v10 = vpack.c.bf16 %v1577_v4, %v1571_v3  ;;  %v2872_v13 = vpack.c.bf16 %v1588_v6, %v1582_v5  ;;  %v1632_v59 = vld [vmem:[%s3826_s17 + $0xaf8] sm:$0xff]  ;;  %v1638_v60 = vld [vmem:[%s3826_s17 + $0xb28] sm:$0xff]  ;;  %v1629_v3 = vld [vmem:[%s3826_s17 + $0xae0] sm:$0xff] }
 0x232   : > { %v1635_v4 = vld [vmem:[%s3826_s17 + $0xb10] sm:$0xff]  ;;  %v3016_v6 = vpack.c.bf16 %v1638_v60, %v1632_v59  ;;  %v1297_v60 = vld [vmem:[%s3826_s17 + $0x80] sm:$0xff] }
 0x234   : > { %2855 = vmatpush1.bf16.msra.mxu0 %v2854_v21  ;;  %2983 = vmatpush1.bf16.msra.mxu1 %v2982_v22  ;;  %v1594_v21 = vld [vmem:[%s3826_s17 + $0x9c8] sm:$0xff]  ;;  %v1600_v22 = vld [vmem:[%s3826_s17 + $0x9f8] sm:$0xff] }
 0x235   : > { %2857 = vmatprep.subr.bf16.mxu0 %v2856_v27  ;;  %2985 = vmatprep.subr.bf16.mxu1 %v2984_v28  ;;  %v2874_v27 = vpack.c.bf16 %v1587_v12, %v1581_v11  ;;  %v3002_v28 = vpack.c.bf16 %v1589_v16, %v1583_v15  ;;  %v2876_v32 = vpack.c.bf16 %v1600_v22, %v1594_v21  ;;  %v1644_v11 = vld [vmem:[%s3826_s17 + $0xb58] sm:$0xff]  ;;  %v1650_v12 = vld [vmem:[%s3826_s17 + $0xb88] sm:$0xff]  ;;  %v1641_v15 = vld [vmem:[%s3826_s17 + $0xb40] sm:$0xff] }
 0x236   : > { %v1647_v16 = vld [vmem:[%s3826_s17 + $0xb70] sm:$0xff]  ;;  %v3020_v22 = vpack.c.bf16 %v1650_v12, %v1644_v11  ;;  %v1322_v11 = vld [vmem:[%s3826_s17 + $0x148] sm:$0xff]  ;;  %v1328_v12 = vld [vmem:[%s3826_s17 + $0x178] sm:$0xff] }
 0x238   : > { %2859 = vmatpush1.bf16.msra.mxu0 %v2858_v37  ;;  %2987 = vmatpush1.bf16.msra.mxu1 %v2986_v39  ;;  %v1606_v37 = vld [vmem:[%s3826_s17 + $0xa28] sm:$0xff]  ;;  %v1612_v39 = vld [vmem:[%s3826_s17 + $0xa58] sm:$0xff] }
 0x239   : > { %2861 = vmatprep.subr.bf16.mxu0 %v2860_v43  ;;  %2989 = vmatprep.subr.bf16.mxu1 %v2988_v45  ;;  %v2878_v43 = vpack.c.bf16 %v1599_v31, %v1593_v29  ;;  %v3006_v45 = vpack.c.bf16 %v1601_v36, %v1595_v35  ;;  %v2880_v50 = vpack.c.bf16 %v1612_v39, %v1606_v37  ;;  %v1656_v29 = vld [vmem:[%s3826_s17 + $0xbb8] sm:$0xff]  ;;  %v1662_v31 = vld [vmem:[%s3826_s17 + $0xbe8] sm:$0xff]  ;;  %v1653_v35 = vld [vmem:[%s3826_s17 + $0xba0] sm:$0xff] }
 0x23a   : > { %v1659_v37 = vld [vmem:[%s3826_s17 + $0xbd0] sm:$0xff]  ;;  %v3024_v39 = vpack.c.bf16 %v1662_v31, %v1656_v29  ;;  %v1352_v29 = vld [vmem:[%s3826_s17 + $0x238] sm:$0xff] }
 0x23c   : > { %2863 = vmatpush1.bf16.msra.mxu0 %v2862_v52  ;;  %2991 = vmatpush1.bf16.msra.mxu1 %v2990_v53  ;;  %v1618_v52 = vld [vmem:[%s3826_s17 + $0xa88] sm:$0xff]  ;;  %v1624_v53 = vld [vmem:[%s3826_s17 + $0xab8] sm:$0xff] }
 0x23d   : > { %2865 = vmatprep.subr.bf16.mxu0 %v2864_v54  ;;  %2993 = vmatprep.subr.bf16.mxu1 %v2992_v55  ;;  %v2882_v54 = vpack.c.bf16 %v1611_v47, %v1605_v46  ;;  %v3010_v55 = vpack.c.bf16 %v1613_v44, %v1607_v40  ;;  %v2884_v57 = vpack.c.bf16 %v1624_v53, %v1618_v52  ;;  %v793_v40 = vsub.s32 3, %v4405_v38 }
 0x23e   : > { %v2898_v46 = vpack.c.bf16 %v1659_v37, %v1653_v35  ;;  %v3026_v47 = vpack.c.bf16 %v1661_v42, %v1655_v41  ;;  %v1351_v35 = vld [vmem:[%s3826_s17 + $0x230] sm:$0xff]  ;;  %v1364_v37 = vld [vmem:[%s3826_s17 + $0x298] sm:$0xff]  ;;  %v1357_v42 = vld [vmem:[%s3826_s17 + $0x260] sm:$0xff] }
 0x23f   : > { %v794_v52 = vrot.slane %v4410_v0, %v793_v40 }
 0x240   : > { %2867 = vmatpush1.bf16.msra.mxu0 %v2866_v30  ;;  %2995 = vmatpush1.bf16.msra.mxu1 %v2994_v17  ;;  %v1630_v30 = vld [vmem:[%s3826_s17 + $0xae8] sm:$0xff]  ;;  %v1636_v17 = vld [vmem:[%s3826_s17 + $0xb18] sm:$0xff] }
 0x241   : > { %2869 = vmatprep.subr.bf16.mxu0 %v2868_v61  ;;  %2997 = vmatprep.subr.bf16.mxu1 %v2996_v62  ;;  %v2886_v61 = vpack.c.bf16 %v1623_v56, %v1617_v48  ;;  %v3014_v62 = vpack.c.bf16 %v1625_v58, %v1619_v25  ;;  %v2888_v5 = vpack.c.bf16 %v1636_v17, %v1630_v30  ;;  %v1298_v56 = vld [vmem:[%s3826_s17 + $0x88] sm:$0xff] }
 0x244   : > { %2871 = vmatpush1.bf16.msra.mxu0 %v2870_v9  ;;  %2999 = vmatpush1.bf16.msra.mxu1 %v2998_v10  ;;  %v1642_v9 = vld [vmem:[%s3826_s17 + $0xb48] sm:$0xff]  ;;  %v1648_v10 = vld [vmem:[%s3826_s17 + $0xb78] sm:$0xff] }
 0x245   : > { %2873 = vmatprep.subr.bf16.mxu0 %v2872_v13  ;;  %3001 = vmatprep.subr.bf16.mxu1 %v3000_v14  ;;  %v2890_v13 = vpack.c.bf16 %v1635_v4, %v1629_v3  ;;  %v3018_v14 = vpack.c.bf16 %v1637_v8, %v1631_v7  ;;  %v2892_v21 = vpack.c.bf16 %v1648_v10, %v1642_v9  ;;  %v1310_v3 = vld [vmem:[%s3826_s17 + $0xe8] sm:$0xff]  ;;  %v1316_v4 = vld [vmem:[%s3826_s17 + $0x118] sm:$0xff]  ;;  %v1309_v9 = vld [vmem:[%s3826_s17 + $0xe0] sm:$0xff] }
 0x246   : > { %v3036_v8 = vpack.c.bf16 %v1316_v4, %v1310_v3  ;;  %v1315_v10 = vld [vmem:[%s3826_s17 + $0x110] sm:$0xff]  ;;  %v1405_v3 = vld [vmem:[%s3826_s17 + $0x3e0] sm:$0xff] }
 0x247   : > { %v1411_v4 = vld [vmem:[%s3826_s17 + $0x410] sm:$0xff] }
 0x248   : > { %2875 = vmatpush1.bf16.msra.mxu0 %v2874_v27  ;;  %3003 = vmatpush1.bf16.msra.mxu1 %v3002_v28  ;;  %v1654_v27 = vld [vmem:[%s3826_s17 + $0xba8] sm:$0xff]  ;;  %v1660_v28 = vld [vmem:[%s3826_s17 + $0xbd8] sm:$0xff] }
 0x249   : > { %2877 = vmatprep.subr.bf16.mxu0 %v2876_v32  ;;  %3005 = vmatprep.subr.bf16.mxu1 %v3004_v34  ;;  %v2894_v32 = vpack.c.bf16 %v1647_v16, %v1641_v15  ;;  %v3022_v34 = vpack.c.bf16 %v1649_v26, %v1643_v20  ;;  %v2896_v36 = vpack.c.bf16 %v1660_v28, %v1654_v27  ;;  %v1321_v15 = vld [vmem:[%s3826_s17 + $0x140] sm:$0xff]  ;;  %v1327_v16 = vld [vmem:[%s3826_s17 + $0x170] sm:$0xff] }
 0x24a   : > { %v3042_v20 = vpack.c.bf16 %v1327_v16, %v1321_v15  ;;  %v1333_v27 = vld [vmem:[%s3826_s17 + $0x1a0] sm:$0xff]  ;;  %v1339_v28 = vld [vmem:[%s3826_s17 + $0x1d0] sm:$0xff] }
 0x24b   : > { %v3046_v31 = vpack.c.bf16 %v1339_v28, %v1333_v27 }
 0x24c   : > { %2879 = vmatpush1.bf16.msra.mxu0 %v2878_v43  ;;  %3007 = vmatpush1.bf16.msra.mxu1 %v3006_v45  ;;  %v1286_v43 = vld [vmem:[%s3826_s17 + $0x28] sm:$0xff]  ;;  %v1292_v45 = vld [vmem:[%s3826_s17 + $0x58] sm:$0xff] }
 0x24d   : > { %2881 = vmatprep.subr.bf16.mxu0 %v2880_v50  ;;  %3009 = vmatprep.subr.bf16.mxu1 %v3008_v51  ;;  %v3028_v50 = vpack.c.bf16 %v1292_v45, %v1286_v43  ;;  %v789_v51 = vsub.s32 2, %v4405_v38  ;;  %v1363_v43 = vld [vmem:[%s3826_s17 + $0x290] sm:$0xff]  ;;  %v1370_v45 = vld [vmem:[%s3826_s17 + $0x2c8] sm:$0xff] }
 0x24f   : > { %v790_v44 = vrot.slane %v4410_v0, %v789_v51 }
 0x250   : > { %2883 = vmatpush1.bf16.msra.mxu0 %v2882_v54  ;;  %3011 = vmatpush1.bf16.msra.mxu1 %v3010_v55  ;;  %v1285_v54 = vld [vmem:[%s3826_s17 + $0x20] sm:$0xff]  ;;  %v1291_v55 = vld [vmem:[%s3826_s17 + $0x50] sm:$0xff] }
 0x251   : > { %2885 = vmatprep.subr.bf16.mxu0 %v2884_v57  ;;  %3013 = vmatprep.subr.bf16.mxu1 %v3012_v23  ;;  %v1304_v57 = vld [vmem:[%s3826_s17 + $0xb8] sm:$0xff]  ;;  %v3030_v58 = vpack.c.bf16 %v1291_v55, %v1285_v54  ;;  %v1381_v55 = vld [vmem:[%s3826_s17 + $0x320] sm:$0xff] }
 0x252   : > { %v3032_v59 = vpack.c.bf16 %v1304_v57, %v1298_v56  ;;  %v1394_v56 = vld [vmem:[%s3826_s17 + $0x388] sm:$0xff]  ;;  %v1400_v57 = vld [vmem:[%s3826_s17 + $0x3b8] sm:$0xff] }
 0x254   : > { %2887 = vmatpush1.bf16.msra.mxu0 %v2886_v61  ;;  %3015 = vmatpush1.bf16.msra.mxu1 %v3014_v62  ;;  %v1303_v61 = vld [vmem:[%s3826_s17 + $0xb0] sm:$0xff] }
 0x255   : > { %2889 = vmatprep.subr.bf16.mxu0 %v2888_v5  ;;  %3017 = vmatprep.subr.bf16.mxu1 %v3016_v6  ;;  %v3034_v6 = vpack.c.bf16 %v1303_v61, %v1297_v60  ;;  %v1412_v60 = vld [vmem:[%s3826_s17 + $0x418] sm:$0xff] }
 0x258   : > { %2891 = vmatpush1.bf16.msra.mxu0 %v2890_v13  ;;  %3019 = vmatpush1.bf16.msra.mxu1 %v3018_v14  ;;  %v3038_v13 = vpack.c.bf16 %v1315_v10, %v1309_v9  ;;  %v3040_v14 = vpack.c.bf16 %v1328_v12, %v1322_v11  ;;  %v3070_v9 = vpack.c.bf16 %v1411_v4, %v1405_v3  ;;  %v1417_v11 = vld [vmem:[%s3826_s17 + $0x440] sm:$0xff]  ;;  %v1423_v12 = vld [vmem:[%s3826_s17 + $0x470] sm:$0xff] }
 0x259   : > { %2893 = vmatprep.subr.bf16.mxu0 %v2892_v21  ;;  %3021 = vmatprep.subr.bf16.mxu1 %v3020_v22  ;;  %v1334_v21 = vld [vmem:[%s3826_s17 + $0x1a8] sm:$0xff]  ;;  %v1340_v22 = vld [vmem:[%s3826_s17 + $0x1d8] sm:$0xff]  ;;  %v3074_v15 = vpack.c.bf16 %v1423_v12, %v1417_v11  ;;  %v1513_v3 = vld [vmem:[%s3826_s17 + $0x740] sm:$0xff] }
 0x25a   : > { %v3044_v26 = vpack.c.bf16 %v1340_v22, %v1334_v21  ;;  %v1429_v21 = vld [vmem:[%s3826_s17 + $0x4a0] sm:$0xff]  ;;  %v1435_v22 = vld [vmem:[%s3826_s17 + $0x4d0] sm:$0xff]  ;;  %v1544_v12 = vld [vmem:[%s3826_s17 + $0x838] sm:$0xff] }
 0x25b   : > { %v3078_v27 = vpack.c.bf16 %v1435_v22, %v1429_v21  ;;  %v1519_v4 = vld [vmem:[%s3826_s17 + $0x770] sm:$0xff]  ;;  %v1550_v21 = vld [vmem:[%s3826_s17 + $0x868] sm:$0xff]  ;;  %v1556_v22 = vld [vmem:[%s3826_s17 + $0x898] sm:$0xff] }
 0x25c   : > { %2895 = vmatpush1.bf16.msra.mxu0 %v2894_v32  ;;  %3023 = vmatpush1.bf16.msra.mxu1 %v3022_v34  ;;  %v1345_v34 = vld [vmem:[%s3826_s17 + $0x200] sm:$0xff]  ;;  %v1531_v11 = vld [vmem:[%s3826_s17 + $0x7d0] sm:$0xff] }
 0x25d   : > { %2897 = vmatprep.subr.bf16.mxu0 %v2896_v36  ;;  %3025 = vmatprep.subr.bf16.mxu1 %v3024_v39  ;;  %v1358_v36 = vld [vmem:[%s3826_s17 + $0x268] sm:$0xff]  ;;  %v3050_v39 = vpack.c.bf16 %v1351_v35, %v1345_v34 }
 0x25e   : > { %v3052_v41 = vpack.c.bf16 %v1364_v37, %v1358_v36  ;;  %v1453_v36 = vld [vmem:[%s3826_s17 + $0x560] sm:$0xff]  ;;  %v1459_v37 = vld [vmem:[%s3826_s17 + $0x590] sm:$0xff] }
 0x260   : > { %2899 = vmatpush1.bf16.msra.mxu0 %v2898_v46  ;;  %3027 = vmatpush1.bf16.msra.mxu1 %v3026_v47  ;;  %v1376_v46 = vld [vmem:[%s3826_s17 + $0x2f8] sm:$0xff]  ;;  %v3054_v47 = vpack.c.bf16 %v1363_v43, %v1357_v42  ;;  %v3086_v42 = vpack.c.bf16 %v1459_v37, %v1453_v36  ;;  %v1574_v36 = vld [vmem:[%s3826_s17 + $0x928] sm:$0xff] }
 0x261   : > { %3029 = vmatprep.subr.bf16.mxu0 %v3028_v50  ;;  %v3056_v50 = vpack.c.bf16 %v1376_v46, %v1370_v45  ;;  %v1465_v45 = vld [vmem:[%s3826_s17 + $0x5c0] sm:$0xff]  ;;  %v1471_v46 = vld [vmem:[%s3826_s17 + $0x5f0] sm:$0xff]  ;;  %v1580_v37 = vld [vmem:[%s3826_s17 + $0x958] sm:$0xff] }
 0x29a   : > { %v1250_v53 = vpop.f32.mrb[4].mxu1 }
 0x29b   : > { %v3164_v18 = vadd.f32 %v1250_v53, %v790_v44  ;;  %v1252_v24 = vpop.f32.mrb[5].mxu1  ;;  %v1382_v53 = vld [vmem:[%s3826_s17 + $0x328] sm:$0xff] }
 0x29c   : > { %v3165_v48 = vadd.f32 %v1252_v24, %v794_v52 }
 0x29d   : > { %v4577_v30 = vmax.f32 %v3164_v18, 0.0  ;;  %v1388_v18 = vld [vmem:[%s3826_s17 + $0x358] sm:$0xff] }
 0x29e   : > { %v4575_v23 = vmax.f32 %v3165_v48, 0.0  ;;  %v1256_v25 = vpop.f32.mrb[6].mxu1  ;;  %v3060_v54 = vpack.c.bf16 %v1388_v18, %v1382_v53  ;;  %v1387_v48 = vld [vmem:[%s3826_s17 + $0x350] sm:$0xff]  ;;  %v1477_v53 = vld [vmem:[%s3826_s17 + $0x620] sm:$0xff] }
 0x29f   : > { %v3166_v17 = vadd.f32 %v1256_v25, %v790_v44  ;;  %v1258_v0 = vpop.f32.mrb[7].mxu1  ;;  %v1369_v44 = vld [vmem:[%s3826_s17 + $0x2c0] sm:$0xff]  ;;  %v3062_v25 = vpack.c.bf16 %v1387_v48, %v1381_v55  ;;  %v1483_v18 = vld [vmem:[%s3826_s17 + $0x650] sm:$0xff] }
 0x2a0   : > { %v3167_v62 = vadd.f32 %v1258_v0, %v794_v52  ;;  %1806 = vmatprep.mubr.f32.mxu0 %v4575_v23  ;;  %1960 = vmatprep.mubr.f32.mxu1 %v4575_v23  ;;  %v1375_v52 = vld [vmem:[%s3826_s17 + $0x2f0] sm:$0xff]  ;;  %v3094_v55 = vpack.c.bf16 %v1483_v18, %v1477_v53  ;;  %v1598_v53 = vld [vmem:[%s3826_s17 + $0x9e8] sm:$0xff]  ;;  %v1604_v18 = vld [vmem:[%s3826_s17 + $0xa18] sm:$0xff] }
 0x2a1   : > { %1807 = vmatmul.mubr.f32.vlgmr.msra.gmra.mrb[4].mxu0 %v4577_v30  ;;  %1961 = vmatmul.mubr.f32.vlgmr.msra.gmra.mrb[8].mxu1 %v4577_v30  ;;  %v4589_v7 = vmax.f32 %v3166_v17, 0.0  ;;  %v3058_v24 = vpack.c.bf16 %v1375_v52, %v1369_v44  ;;  %v1393_v17 = vld [vmem:[%s3826_s17 + $0x380] sm:$0xff]  ;;  %v1399_v0 = vld [vmem:[%s3826_s17 + $0x3b0] sm:$0xff]  ;;  %v3090_v44 = vpack.c.bf16 %v1471_v46, %v1465_v45  ;;  %v1586_v45 = vld [vmem:[%s3826_s17 + $0x988] sm:$0xff] }
 0x2a2   : > { %v4587_v5 = vmax.f32 %v3167_v62, 0.0  ;;  %3031 = vmatpush1.bf16.msra.mxu0 %v3030_v58  ;;  %v3064_v58 = vpack.c.bf16 %v1400_v57, %v1394_v56  ;;  %v3066_v61 = vpack.c.bf16 %v1399_v0, %v1393_v17  ;;  %v1489_v56 = vld [vmem:[%s3826_s17 + $0x680] sm:$0xff]  ;;  %v1495_v57 = vld [vmem:[%s3826_s17 + $0x6b0] sm:$0xff]  ;;  %v1592_v46 = vld [vmem:[%s3826_s17 + $0x9b8] sm:$0xff] }
 0x2a3   : > { %3033 = vmatprep.subr.bf16.mxu0 %v3032_v59  ;;  %v1406_v59 = vld [vmem:[%s3826_s17 + $0x3e8] sm:$0xff]  ;;  %v3098_v17 = vpack.c.bf16 %v1495_v57, %v1489_v56  ;;  %v1616_v57 = vld [vmem:[%s3826_s17 + $0xa78] sm:$0xff] }
 0x2a4   : > { %1812 = vmatprep.mubr.f32.mxu0 %v4587_v5  ;;  %1966 = vmatprep.mubr.f32.mxu1 %v4587_v5  ;;  %v3068_v62 = vpack.c.bf16 %v1412_v60, %v1406_v59  ;;  %v1501_v59 = vld [vmem:[%s3826_s17 + $0x6e0] sm:$0xff]  ;;  %v1507_v60 = vld [vmem:[%s3826_s17 + $0x710] sm:$0xff]  ;;  %v1610_v56 = vld [vmem:[%s3826_s17 + $0xa48] sm:$0xff] }
 0x2a5   : > { %1813 = vmatmul.mubr.f32.gmra.mrb[6].mxu0 %v4589_v7  ;;  %1967 = vmatmul.mubr.f32.gmra.mrb[10].mxu1 %v4589_v7 }
 0x2a6   : > { %3035 = vmatpush1.bf16.msra.mxu0 %v3034_v6  ;;  %2037 = vmatprep.mubr.f32.mxu0 %v4429_v1  ;;  %v1346_v1 = vld [vmem:[%s3826_s17 + $0x208] sm:$0xff] }
 0x2a7   : > { %3037 = vmatprep.subr.bf16.mxu0 %v3036_v8  ;;  %v3048_v32 = vpack.c.bf16 %v1352_v29, %v1346_v1  ;;  %v1418_v6 = vld [vmem:[%s3826_s17 + $0x448] sm:$0xff]  ;;  %v1424_v8 = vld [vmem:[%s3826_s17 + $0x478] sm:$0xff]  ;;  %v1441_v1 = vld [vmem:[%s3826_s17 + $0x500] sm:$0xff] }
 0x2a8   : > { %v3072_v10 = vpack.c.bf16 %v1424_v8, %v1418_v6  ;;  %v1447_v29 = vld [vmem:[%s3826_s17 + $0x530] sm:$0xff]  ;;  %v1526_v6 = vld [vmem:[%s3826_s17 + $0x7a8] sm:$0xff]  ;;  %v1532_v8 = vld [vmem:[%s3826_s17 + $0x7d8] sm:$0xff] }
 0x2a9   : > { %v3082_v34 = vpack.c.bf16 %v1447_v29, %v1441_v1  ;;  %v1562_v1 = vld [vmem:[%s3826_s17 + $0x8c8] sm:$0xff]  ;;  %v1568_v29 = vld [vmem:[%s3826_s17 + $0x8f8] sm:$0xff] }
 0x2aa   : > { %3039 = vmatpush1.bf16.msra.mxu0 %v3038_v13  ;;  %v1430_v13 = vld [vmem:[%s3826_s17 + $0x4a8] sm:$0xff] }
 0x2ab   : > { %3041 = vmatprep.subr.bf16.mxu0 %v3040_v14  ;;  %v1436_v14 = vld [vmem:[%s3826_s17 + $0x4d8] sm:$0xff] }
 0x2ac   : > { %v3076_v16 = vpack.c.bf16 %v1436_v14, %v1430_v13 }
 0x2ae   : > { %3043 = vmatpush1.bf16.msra.mxu0 %v3042_v20  ;;  %v1442_v20 = vld [vmem:[%s3826_s17 + $0x508] sm:$0xff] }
 0x2af   : > { %3045 = vmatprep.subr.bf16.mxu0 %v3044_v26  ;;  %v1448_v26 = vld [vmem:[%s3826_s17 + $0x538] sm:$0xff] }
 0x2b0   : > { %v3080_v28 = vpack.c.bf16 %v1448_v26, %v1442_v20  ;;  %v3116_v26 = vpack.c.bf16 %v1556_v22, %v1550_v21 }
 0x2b2   : > { %3047 = vmatpush1.bf16.msra.mxu0 %v3046_v31  ;;  %v1454_v31 = vld [vmem:[%s3826_s17 + $0x568] sm:$0xff] }
 0x2b3   : > { %3049 = vmatprep.subr.bf16.mxu0 %v3048_v32  ;;  %v1460_v32 = vld [vmem:[%s3826_s17 + $0x598] sm:$0xff] }
 0x2b4   : > { %v3084_v35 = vpack.c.bf16 %v1460_v32, %v1454_v31  ;;  %v3120_v32 = vpack.c.bf16 %v1568_v29, %v1562_v1  ;;  %v1271_v1 = vld [vmem:[#allocation2 + $0x10] sm:$0xff]  ;;  %v1270_v29 = vld [vmem:[#allocation2 + $0x8] sm:$0xff] }
 0x2b6   : > { %3051 = vmatpush1.bf16.msra.mxu0 %v3050_v39  ;;  %v1466_v39 = vld [vmem:[%s3826_s17 + $0x5c8] sm:$0xff] }
 0x2b7   : > { %3053 = vmatprep.subr.bf16.mxu0 %v3052_v41  ;;  %v1472_v41 = vld [vmem:[%s3826_s17 + $0x5f8] sm:$0xff] }
 0x2b8   : > { %v3088_v43 = vpack.c.bf16 %v1472_v41, %v1466_v39  ;;  %v3124_v41 = vpack.c.bf16 %v1580_v37, %v1574_v36 }
 0x2ba   : > { %3055 = vmatpush1.bf16.msra.mxu0 %v3054_v47  ;;  %v1478_v47 = vld [vmem:[%s3826_s17 + $0x628] sm:$0xff] }
 0x2bb   : > { %3057 = vmatprep.subr.bf16.mxu0 %v3056_v50  ;;  %v1484_v50 = vld [vmem:[%s3826_s17 + $0x658] sm:$0xff] }
 0x2bc   : > { %v3092_v52 = vpack.c.bf16 %v1484_v50, %v1478_v47  ;;  %v3128_v50 = vpack.c.bf16 %v1592_v46, %v1586_v45  ;;  %v1277_v45 = vld [vmem:[#allocation2 + $0x40] sm:$0xff] }
 0x2be   : > { %3059 = vmatpush1.bf16.msra.mxu0 %v3058_v24  ;;  %v1490_v24 = vld [vmem:[%s3826_s17 + $0x688] sm:$0xff] }
 0x2bf   : > { %3061 = vmatprep.subr.bf16.mxu0 %v3060_v54  ;;  %v1496_v54 = vld [vmem:[%s3826_s17 + $0x6b8] sm:$0xff] }
 0x2c0   : > { %v3096_v48 = vpack.c.bf16 %v1496_v54, %v1490_v24  ;;  %v3132_v54 = vpack.c.bf16 %v1604_v18, %v1598_v53 }
 0x2c2   : > { %3063 = vmatpush1.bf16.msra.mxu0 %v3062_v25  ;;  %v1502_v25 = vld [vmem:[%s3826_s17 + $0x6e8] sm:$0xff] }
 0x2c3   : > { %3065 = vmatprep.subr.bf16.mxu0 %v3064_v58  ;;  %v1508_v58 = vld [vmem:[%s3826_s17 + $0x718] sm:$0xff] }
 0x2c4   : > { %v3100_v0 = vpack.c.bf16 %v1508_v58, %v1502_v25  ;;  %v3136_v58 = vpack.c.bf16 %v1616_v57, %v1610_v56 }
 0x2c6   : > { %3067 = vmatpush1.bf16.msra.mxu0 %v3066_v61  ;;  %v1514_v61 = vld [vmem:[%s3826_s17 + $0x748] sm:$0xff] }
 0x2c7   : > { %3069 = vmatprep.subr.bf16.mxu0 %v3068_v62  ;;  %v1520_v62 = vld [vmem:[%s3826_s17 + $0x778] sm:$0xff] }
 0x2ca   : > { %3071 = vmatpush1.bf16.msra.mxu0 %v3070_v9  ;;  %v3106_v9 = vpack.c.bf16 %v1519_v4, %v1513_v3  ;;  %v1634_v3 = vld [vmem:[%s3826_s17 + $0xb08] sm:$0xff]  ;;  %v1640_v4 = vld [vmem:[%s3826_s17 + $0xb38] sm:$0xff] }
 0x2cb   : > { %3073 = vmatprep.subr.bf16.mxu0 %v3072_v10  ;;  %v1525_v10 = vld [vmem:[%s3826_s17 + $0x7a0] sm:$0xff] }
 0x2cc   : > { %v3110_v13 = vpack.c.bf16 %v1531_v11, %v1525_v10  ;;  %v1646_v10 = vld [vmem:[%s3826_s17 + $0xb68] sm:$0xff]  ;;  %v1652_v11 = vld [vmem:[%s3826_s17 + $0xb98] sm:$0xff] }
 0x2ce   : > { %3075 = vmatpush1.bf16.msra.mxu0 %v3074_v15  ;;  %v1537_v15 = vld [vmem:[%s3826_s17 + $0x800] sm:$0xff] }
 0x2cf   : > { %3077 = vmatprep.subr.bf16.mxu0 %v3076_v16  ;;  %v1543_v16 = vld [vmem:[%s3826_s17 + $0x830] sm:$0xff] }
 0x2d0   : > { %v3114_v20 = vpack.c.bf16 %v1543_v16, %v1537_v15  ;;  %v1658_v15 = vld [vmem:[%s3826_s17 + $0xbc8] sm:$0xff]  ;;  %v1664_v16 = vld [vmem:[%s3826_s17 + $0xbf8] sm:$0xff] }
 0x2d1   : > { %v3152_v22 = vpack.c.bf16 %v1664_v16, %v1658_v15 }
 0x2d2   : > { %3079 = vmatpush1.bf16.msra.mxu0 %v3078_v27  ;;  %v1549_v27 = vld [vmem:[%s3826_s17 + $0x860] sm:$0xff] }
 0x2d3   : > { %3081 = vmatprep.subr.bf16.mxu0 %v3080_v28  ;;  %v1555_v28 = vld [vmem:[%s3826_s17 + $0x890] sm:$0xff] }
 0x2d4   : > { %v3118_v31 = vpack.c.bf16 %v1555_v28, %v1549_v27  ;;  %v1269_v28 = vld [vmem:[#allocation2] sm:$0xff] }
 0x2d6   : > { %3083 = vmatpush1.bf16.msra.mxu0 %v3082_v34  ;;  %v1561_v34 = vld [vmem:[%s3826_s17 + $0x8c0] sm:$0xff] }
 0x2d7   : > { %3085 = vmatprep.subr.bf16.mxu0 %v3084_v35  ;;  %v1567_v35 = vld [vmem:[%s3826_s17 + $0x8f0] sm:$0xff] }
 0x2d8   : > { %v3122_v39 = vpack.c.bf16 %v1567_v35, %v1561_v34 }
 0x2da   : > { %3087 = vmatpush1.bf16.msra.mxu0 %v3086_v42  ;;  %v1573_v42 = vld [vmem:[%s3826_s17 + $0x920] sm:$0xff] }
 0x2db   : > { %3089 = vmatprep.subr.bf16.mxu0 %v3088_v43  ;;  %v1579_v43 = vld [vmem:[%s3826_s17 + $0x950] sm:$0xff] }
 0x2dc   : > { %v3126_v47 = vpack.c.bf16 %v1579_v43, %v1573_v42  ;;  %v1275_v43 = vld [vmem:[#allocation2 + $0x30] sm:$0xff] }
 0x2de   : > { %3091 = vmatpush1.bf16.msra.mxu0 %v3090_v44  ;;  %v1585_v44 = vld [vmem:[%s3826_s17 + $0x980] sm:$0xff] }
 0x2df   : > { %3093 = vmatprep.subr.bf16.mxu0 %v3092_v52  ;;  %v1591_v52 = vld [vmem:[%s3826_s17 + $0x9b0] sm:$0xff] }
 0x2e0   : > { %v3130_v24 = vpack.c.bf16 %v1591_v52, %v1585_v44 }
 0x2e1   : > { %2038 = vmatmul.mubr.f32.vlgmr.msra.gmra.mrb[8].mxu0 %v4433_v33  ;;  %v3102_v33 = vpack.c.bf16 %v1507_v60, %v1501_v59  ;;  %v1622_v59 = vld [vmem:[%s3826_s17 + $0xaa8] sm:$0xff]  ;;  %v1628_v60 = vld [vmem:[%s3826_s17 + $0xad8] sm:$0xff] }
 0x2e2   : > { %2043 = vmatprep.mubr.f32.mxu0 %v4445_v49  ;;  %3095 = vmatpush1.bf16.msra.mxu0 %v3094_v55  ;;  %v3104_v49 = vpack.c.bf16 %v1520_v62, %v1514_v61  ;;  %v1597_v55 = vld [vmem:[%s3826_s17 + $0x9e0] sm:$0xff]  ;;  %v3140_v62 = vpack.c.bf16 %v1628_v60, %v1622_v59 }
 0x2e3   : > { %3097 = vmatprep.subr.bf16.mxu0 %v3096_v48  ;;  %v1603_v48 = vld [vmem:[%s3826_s17 + $0xa10] sm:$0xff] }
 0x2e4   : > { %v3134_v25 = vpack.c.bf16 %v1603_v48, %v1597_v55 }
 0x2e5   : > { %2044 = vmatmul.mubr.f32.gmra.mrb[10].mxu0 %v4449_v19  ;;  %v3108_v19 = vpack.c.bf16 %v1532_v8, %v1526_v6  ;;  %v3144_v8 = vpack.c.bf16 %v1640_v4, %v1634_v3  ;;  %v2191_v3 = vsub.s32 (!%p2381_p12), 5, %v4405_v38 }
 0x2e6   : > { %3099 = vmatpush1.bf16.msra.mxu0 %v3098_v17  ;;  %2114 = vmatprep.mubr.f32.mxu0 %v4575_v23  ;;  %v1538_v23 = vld [vmem:[%s3826_s17 + $0x808] sm:$0xff]  ;;  %v1609_v17 = vld [vmem:[%s3826_s17 + $0xa40] sm:$0xff] }
 0x2e7   : > { %3101 = vmatprep.subr.bf16.mxu0 %v3100_v0  ;;  %v3112_v14 = vpack.c.bf16 %v1544_v12, %v1538_v23  ;;  %v1615_v0 = vld [vmem:[%s3826_s17 + $0xa70] sm:$0xff]  ;;  %v3148_v12 = vpack.c.bf16 %v1652_v11, %v1646_v10 }
 0x2e8   : > { %v3138_v61 = vpack.c.bf16 %v1615_v0, %v1609_v17 }
 0x2ea   : > { %3103 = vmatpush1.bf16.msra.mxu0 %v3102_v33  ;;  %v1621_v33 = vld [vmem:[%s3826_s17 + $0xaa0] sm:$0xff] }
 0x2eb   : > { %3105 = vmatprep.subr.bf16.mxu0 %v3104_v49  ;;  %v1627_v49 = vld [vmem:[%s3826_s17 + $0xad0] sm:$0xff] }
 0x2ec   : > { %v3142_v6 = vpack.c.bf16 %v1627_v49, %v1621_v33  ;;  %v2187_v49 = vsub.s32 (!%p2381_p12), 4, %v4405_v38 }
 0x2ee   : > { %3107 = vmatpush1.bf16.msra.mxu0 %v3106_v9  ;;  %v1633_v9 = vld [vmem:[%s3826_s17 + $0xb00] sm:$0xff] }
 0x2ef   : > { %3109 = vmatprep.subr.bf16.mxu0 %v3108_v19  ;;  %v1639_v19 = vld [vmem:[%s3826_s17 + $0xb30] sm:$0xff] }
 0x2f0   : > { %v3146_v23 = vpack.c.bf16 %v1639_v19, %v1633_v9 }
 0x2f2   : > { %3111 = vmatpush1.bf16.msra.mxu0 %v3110_v13  ;;  %v1645_v13 = vld [vmem:[%s3826_s17 + $0xb60] sm:$0xff] }
 0x2f3   : > { %3113 = vmatprep.subr.bf16.mxu0 %v3112_v14  ;;  %v1651_v14 = vld [vmem:[%s3826_s17 + $0xb90] sm:$0xff] }
 0x2f4   : > { %v3150_v21 = vpack.c.bf16 %v1651_v14, %v1645_v13 }
 0x2f6   : > { %3115 = vmatpush1.bf16.msra.mxu0 %v3114_v20  ;;  %v1657_v20 = vld [vmem:[%s3826_s17 + $0xbc0] sm:$0xff] }
 0x2f7   : > { %3117 = vmatprep.subr.bf16.mxu0 %v3116_v26  ;;  %v1663_v26 = vld [vmem:[%s3826_s17 + $0xbf0] sm:$0xff] }
 0x2f8   : > { %v3154_v27 = vpack.c.bf16 %v1663_v26, %v1657_v20 }
 0x2fa   : > { %3119 = vmatpush1.bf16.msra.mxu0 %v3118_v31  ;;  %v1272_v31 = vld [vmem:[#allocation2 + $0x18] sm:$0xff] }
 0x2fb   : > { %3121 = vmatprep.subr.bf16.mxu0 %v3120_v32 }
 0x2fe   : > { %3123 = vmatpush1.bf16.msra.mxu0 %v3122_v39 }
 0x2ff   : > { %3125 = vmatprep.subr.bf16.mxu0 %v3124_v41 }
 0x302   : > { %3127 = vmatpush1.bf16.msra.mxu0 %v3126_v47 }
 0x303   : > { %3129 = vmatprep.subr.bf16.mxu0 %v3128_v50 }
 0x306   : > { %3131 = vmatpush1.bf16.msra.mxu0 %v3130_v24  ;;  %v1273_v24 = vld [vmem:[#allocation2 + $0x20] sm:$0xff] }
 0x307   : > { %3133 = vmatprep.subr.bf16.mxu0 %v3132_v54  ;;  %v1274_v54 = vld [vmem:[#allocation2 + $0x28] sm:$0xff] }
 0x30a   : > { %3135 = vmatpush1.bf16.msra.mxu0 %v3134_v25  ;;  %v1279_v25 = vld [vmem:[#allocation2 + $0x50] sm:$0xff] }
 0x30b   : > { %3137 = vmatprep.subr.bf16.mxu0 %v3136_v58  ;;  %v1280_v58 = vld [vmem:[#allocation2 + $0x58] sm:$0xff] }
 0x30e   : > { %3139 = vmatpush1.bf16.msra.mxu0 %v3138_v61 }
 0x30f   : > { %3141 = vmatprep.subr.bf16.mxu0 %v3140_v62  ;;  %v2167_v62 = vld [vmem:[#allocation11] sm:$0x3f] (!%p2381_p12) }
 0x310   : > { %v2172_v4 = vrot.slane (!%p2381_p12), %v2167_v62, %v781_v63  ;;  %v2180_v9 = vrot.slane (!%p2381_p12), %v2167_v62, %v789_v51  ;;  %v2184_v10 = vrot.slane (!%p2381_p12), %v2167_v62, %v793_v40  ;;  %v2192_v13 = vrot.slane (!%p2381_p12), %v2167_v62, %v2191_v3 }
 0x312   : > { %3143 = vmatpush1.bf16.msra.mxu0 %v3142_v6  ;;  %v2176_v6 = vrot.slane (!%p2381_p12), %v2167_v62, %v785_v2 }
 0x313   : > { %3145 = vmatprep.subr.bf16.mxu0 %v3144_v8 }
 0x316   : > { %3147 = vmatpush1.bf16.msra.mxu0 %v3146_v23  ;;  %v2188_v23 = vrot.slane (!%p2381_p12), %v2167_v62, %v2187_v49 }
 0x317   : > { %3149 = vmatprep.subr.bf16.mxu0 %v3148_v12 }
 0x31a   : > { %3151 = vmatpush1.bf16.msra.mxu0 %v3150_v21 }
 0x31b   : > { %3153 = vmatprep.subr.bf16.mxu0 %v3152_v22 }
 0x31e   : > { %3155 = vmatpush1.bf16.msra.mxu0 %v3154_v27 }
 0x321   : > { %2115 = vmatmul.mubr.f32.vlgmr.msra.gmra.mrb[8].mxu0 %v4577_v30  ;;  %v1276_v30 = vld [vmem:[#allocation2 + $0x38] sm:$0xff] }
 0x322   : > { %2120 = vmatprep.mubr.f32.mxu0 %v4587_v5  ;;  %v1278_v5 = vld [vmem:[#allocation2 + $0x48] sm:$0xff] }
 0x325   : > { %2121 = vmatmul.mubr.f32.gmra.mrb[10].mxu0 %v4589_v7 }
 0x374   : > { %v1808_v32 = vpop.f32.mrb[4].mxu0  ;;  %v1962_v34 = vpop.f32.mrb[8].mxu1 }
 0x375   : > { %v2127_v35 = vadd.f32 %v1808_v32, %v1269_v28  ;;  %v2129_v36 = vadd.f32 %v1962_v34, %v1271_v1  ;;  %v1810_v37 = vpop.f32.mrb[5].mxu0  ;;  %v1964_v39 = vpop.f32.mrb[9].mxu1 }
 0x376   : > { %v2128_v41 = vadd.f32 %v1810_v37, %v1270_v29  ;;  %v2130_v42 = vadd.f32 %v1964_v39, %v1272_v31 }
 0x377   : > { %2139 = vst [vmem:[#allocation2] sm:$0xff] %v2127_v35  ;;  %2141 = vst [vmem:[#allocation2 + $0x10] sm:$0xff] %v2129_v36 }
 0x378   : > { %2140 = vst [vmem:[#allocation2 + $0x8] sm:$0xff] %v2128_v41  ;;  %2142 = vst [vmem:[#allocation2 + $0x18] sm:$0xff] %v2130_v42  ;;  %v1814_v7 = vpop.f32.mrb[6].mxu0  ;;  %v1968_v46 = vpop.f32.mrb[10].mxu1 }
 0x379   : > { %v2133_v47 = vadd.f32 %v1814_v7, %v1275_v43  ;;  %v2135_v50 = vadd.f32 %v1968_v46, %v1277_v45  ;;  %v1816_v44 = vpop.f32.mrb[7].mxu0  ;;  %v1970_v52 = vpop.f32.mrb[11].mxu1 }
 0x37a   : > { %v2134_v53 = vadd.f32 %v1816_v44, %v1276_v30  ;;  %v2136_v18 = vadd.f32 %v1970_v52, %v1278_v5 }
 0x37b   : > { %2145 = vst [vmem:[#allocation2 + $0x30] sm:$0xff] %v2133_v47  ;;  %2147 = vst [vmem:[#allocation2 + $0x40] sm:$0xff] %v2135_v50 }
 0x37c   : > { %2146 = vst [vmem:[#allocation2 + $0x38] sm:$0xff] %v2134_v53  ;;  %2148 = vst [vmem:[#allocation2 + $0x48] sm:$0xff] %v2136_v18 }
 0x37e   : > { %v2155_v61 = vld [vmem:[#allocation2] sm:$0xff] (!%p2381_p12)  ;;  %v2157_v8 = vld [vmem:[#allocation2 + $0x10] sm:$0xff] (!%p2381_p12) }
 0x37f   : > { %v2156_v33 = vld [vmem:[#allocation2 + $0x8] sm:$0xff] (!%p2381_p12)  ;;  %v2158_v19 = vld [vmem:[#allocation2 + $0x18] sm:$0xff] (!%p2381_p12)  ;;  %v2199_v16 = vadd.f32 (!%p2381_p12), %v2172_v4, %v2155_v61  ;;  %v2201_v63 = vadd.f32 (!%p2381_p12), %v2180_v9, %v2157_v8 }
 0x380   : > { %v2200_v21 = vadd.f32 (!%p2381_p12), %v2176_v6, %v2156_v33  ;;  %v2202_v22 = vadd.f32 (!%p2381_p12), %v2184_v10, %v2158_v19 }
 0x381   : > { %2211 = vst [vmem:[#allocation12] sm:$0xff] (!%p2381_p12), %v2199_v16  ;;  %2213 = vst [vmem:[#allocation12 + $0x10] sm:$0xff] (!%p2381_p12), %v2201_v63 }
 0x382   : > { %v2161_v14 = vld [vmem:[#allocation2 + $0x30] sm:$0xff] (!%p2381_p12)  ;;  %v2163_v20 = vld [vmem:[#allocation2 + $0x40] sm:$0xff] (!%p2381_p12)  ;;  %2212 = vst [vmem:[#allocation12 + $0x8] sm:$0xff] (!%p2381_p12), %v2200_v21  ;;  %2214 = vst [vmem:[#allocation12 + $0x18] sm:$0xff] (!%p2381_p12), %v2202_v22 }
 0x383   : > { %v2162_v15 = vld [vmem:[#allocation2 + $0x38] sm:$0xff] (!%p2381_p12)  ;;  %v2164_v2 = vld [vmem:[#allocation2 + $0x48] sm:$0xff] (!%p2381_p12)  ;;  %v2205_v51 = vadd.f32 (!%p2381_p12), %v2172_v4, %v2161_v14  ;;  %v2207_v38 = vadd.f32 (!%p2381_p12), %v2180_v9, %v2163_v20 }
 0x384   : > { %v2206_v1 = vadd.f32 (!%p2381_p12), %v2176_v6, %v2162_v15  ;;  %v2208_v40 = vadd.f32 (!%p2381_p12), %v2184_v10, %v2164_v2 }
 0x385   : > { %2217 = vst [vmem:[#allocation12 + $0x30] sm:$0xff] (!%p2381_p12), %v2205_v51  ;;  %2219 = vst [vmem:[#allocation12 + $0x40] sm:$0xff] (!%p2381_p12), %v2207_v38 }
 0x386   : > { %2218 = vst [vmem:[#allocation12 + $0x38] sm:$0xff] (!%p2381_p12), %v2206_v1  ;;  %2220 = vst [vmem:[#allocation12 + $0x48] sm:$0xff] (!%p2381_p12), %v2208_v40 }
 0x3f4   : > { %v2116_v55 = vpop.f32.mrb[8].mxu0 }
 0x3f5   : > { %v2131_v48 = vadd.f32 %v2116_v55, %v1273_v24  ;;  %v2118_v56 = vpop.f32.mrb[9].mxu0 }
 0x3f6   : > { %v2132_v57 = vadd.f32 %v2118_v56, %v1274_v54  ;;  %2154 = sbr.rel (%p2381_p12) target bundleno = 1031 (0x407), region = 68 }
 0x3f7   : > { %2143 = vst [vmem:[#allocation2 + $0x20] sm:$0xff] %v2131_v48 }
 0x3f8   : > { %2144 = vst [vmem:[#allocation2 + $0x28] sm:$0xff] %v2132_v57  ;;  %v2122_v17 = vpop.f32.mrb[10].mxu0 }
 0x3f9   : > { %v2137_v0 = vadd.f32 %v2122_v17, %v1279_v25  ;;  %v2124_v59 = vpop.f32.mrb[11].mxu0 }
 0x3fa   : > { %v2138_v60 = vadd.f32 %v2124_v59, %v1280_v58 }
 0x3fb   : > { %2149 = vst [vmem:[#allocation2 + $0x50] sm:$0xff] %v2137_v0 }
 0x3fc   : > { %2150 = vst [vmem:[#allocation2 + $0x58] sm:$0xff] %v2138_v60 }
 0x3fe   : > { %v2159_v11 = vld [vmem:[#allocation2 + $0x20] sm:$0xff] }
 0x3ff   : > { %v2160_v12 = vld [vmem:[#allocation2 + $0x28] sm:$0xff]  ;;  %v2203_v27 = vadd.f32 %v2188_v23, %v2159_v11 }
 0x400   : > { %v2204_v28 = vadd.f32 %v2192_v13, %v2160_v12 }
 0x401   : > { %2215 = vst [vmem:[#allocation12 + $0x20] sm:$0xff] %v2203_v27 }
 0x402   : > { %v2165_v26 = vld [vmem:[#allocation2 + $0x50] sm:$0xff]  ;;  %2216 = vst [vmem:[#allocation12 + $0x28] sm:$0xff] %v2204_v28 }
 0x403   : > { %v2166_v29 = vld [vmem:[#allocation2 + $0x58] sm:$0xff]  ;;  %v2209_v31 = vadd.f32 %v2188_v23, %v2165_v26 }
 0x404   : > { %v2210_v32 = vadd.f32 %v2192_v13, %v2166_v29 }
 0x405   : > { %2221 = vst [vmem:[#allocation12 + $0x50] sm:$0xff] %v2209_v31 }
 0x406   : > { %2222 = vst [vmem:[#allocation12 + $0x58] sm:$0xff] %v2210_v32 }
 0x407 PF: > { %p3236_p11 = scmp.eq.s32.totalorder %s3610_s24, 5  ;;  %s3548_s30 = smov [#allocation12]  }
 0x408   : > { %s2233_s25 = sshll.u32 %s3548_s30, 4  ;;  %s2234_s25 = int_to_ptr.vmem [resolvable:$true] %s2233_s25 }
 0x409   : > { %s3443_s28 = scalar_lea.vmem %s2234_s25, 1536  ;;  %p3450_p6 = scmp.lt.s32.totalorder %s2234_s25, %s2234_s25 }
 0x40a   : > { %p3444_p0 = scmp.ne.s32.totalorder %s2234_s25, %s3443_s28  ;;  %p3451_p8 = scmp.lt.s32.totalorder %s3443_s28, %s3443_s28 }
 0x40c   : > { %p3445_p7 = pnand %p3444_p0, %p3236_p11  ;;  %p3452_p13 = por %p3451_p8, %p3450_p6 }
 0x40e   : > { %p3446_p10 = pneg %p3445_p7 }
 0x410   : > { %p3453_p3 = pnand %p3452_p13, %p3446_p10 }
 0x412   : > { %3456 = shalt.err (!%p3453_p3)
}
 0x413   : > { %s4822_s15 = sld [smem:[#allocation23_spill]] }
 0x419   : > { %s3457_s29 = scalar_lea.hbm %s4822_s15, 1536 }
 0x41a   : > { %p3458_p1 = scmp.ne.s32.totalorder %s4822_s15, %s3457_s29  ;;  %p3463_p5 = scmp.lt.u32.totalorder %s3457_s29, %s4822_s15 }
 0x41c   : > { %p3459_p4 = pnand %p3458_p1, %p3236_p11 }
 0x41e   : > { %p3460_p9 = pneg %p3459_p4 }
 0x420   : > { %p3465_p2 = pnand %p3463_p5, %p3460_p9 }
 0x422   : > { %3468 = shalt.err (!%p3465_p2)
}
 0x423   : > { %s3549_s12 = smov 768   ;;  %s3550_s7 = smov 48  }
 0x424   : > { %3211 = dma.vmem_to_hbm [thread:$0]  (%p3236_p11), %s2234_s25, 1536, %s4822_s15, [#allocation5], %s3549_s12, %s3549_s12, %s3550_s7  }
 0x425   : > { %3510 = dma.done.wait (%p3236_p11), [#allocation5], 1536  }
 0x426   : > { %3512 = vsyncadd (%p3236_p11), [#allocation5], 4294965760 }
 0x427 PF: > { %s23_s23 = sadd.s32 1, %s3535_s23   ;;  %s4823_s6 = sld [smem:[#allocation20_spill]] }
 0x428   : > { %p20_p12 = scmp.ge.s32.totalorder %s23_s23, 8   ;;  %s4824_s13 = sld [smem:[#allocation19_spill]] }
 0x429   : > { %s4825_s18 = smov %s3519_s19  ;;  %s4826_s19 = smov %s3523_s20 }
 0x42a   : > { %s4828_s21 = smov %s3531_s22  ;;  %22 = sbr.rel (!%p20_p12) target bundleno = 12 (0xc), region = 120 }
 0x42d   : > { %s4827_s20 = smov %s4823_s6 }
 0x42e   : > { %s4829_s22 = smov %s4824_s13 }
 0x431   :  { %2249 = vsyncpa [#allocation4], 1 }
 0x432   :  { %2251 = vsyncpa [#allocation4 + $0x1], 1 }
 0x433   :  { %2252 = vsyncpa [#allocation7], 1 }
 0x434   :  { %2254 = vsyncpa [#allocation7 + $0x1], 1 }
 0x435   :  { %2255 = vsyncpa [#allocation10], 1 }
 0x436   :  { %2257 = vsyncpa [#allocation10 + $0x1], 1 }
 0x437   :  { %2258 = vsyncpa [#allocation5], 1 }
 0x438   :  { %2260 = vsyncpa [#allocation5 + $0x1], 1 }

</bundles_post_ra>
